<compile_context>
chip_gen: v7x
topology: tpu7x:2x2x1
jax: 0.10.0
libtpu: 0.0.40
codegen_flags: <defaults>
</compile_context>

<pallas_src>
import functools

import numpy as np
import jax
import jax.numpy as jnp
from jax.experimental import pallas as pl
from jax.experimental.pallas import tpu as pltpu


# ----------------------------------------------------------------------------
# Parameters (deterministic, synthetic)
# ----------------------------------------------------------------------------
def init_params(num_channels, key):
    C = num_channels
    k1, k2, k3, k4, k5, k6 = jax.random.split(key, 6)
    s = 0.1
    return dict(
        w1=s * jax.random.normal(k1, (C, C), jnp.float32),       # Conv1x1: (Cin, Cout)
        b1=s * jax.random.normal(k2, (1, C), jnp.float32),
        w2=s * jax.random.normal(k3, (3, 3, C, C), jnp.float32),  # Conv3x3: (kh, kw, Cin, Cout)
        b2=s * jax.random.normal(k4, (1, C), jnp.float32),
        ws=s * jax.random.normal(k5, (1, C), jnp.float32),        # scoring 1x1 conv
        bs=s * jax.random.normal(k6, (1, 1), jnp.float32),
    )


# ----------------------------------------------------------------------------
# Glue ops (pooling + bilinear resize, exact PyTorch semantics)
# ----------------------------------------------------------------------------
def max_pool2d_nchw(x, k, s):
    # nn.MaxPool2d(kernel_size=k, stride=s), no padding, floor mode.
    return jax.lax.reduce_window(
        x, -jnp.inf, jax.lax.max, (1, 1, k, k), (1, 1, s, s), "VALID")


def _resize_coords(in_size, out_size):
    scale = in_size / out_size
    o = jnp.arange(out_size, dtype=jnp.float32)
    src = (o + 0.5) * scale - 0.5
    src = jnp.clip(src, 0.0, float(in_size - 1))
    lo = jnp.floor(src).astype(jnp.int32)
    hi = jnp.minimum(lo + 1, in_size - 1)
    frac = src - lo.astype(jnp.float32)
    return lo, hi, frac


def bilinear_resize_nchw(x, out_hw):
    # F.interpolate(..., mode='bilinear', align_corners=False), no antialias.
    _, _, H, W = x.shape
    Ho, Wo = out_hw
    lo_h, hi_h, fh = _resize_coords(H, Ho)
    lo_w, hi_w, fw = _resize_coords(W, Wo)
    top = x[:, :, lo_h, :]
    bot = x[:, :, hi_h, :]
    rows = top + (bot - top) * fh[None, None, :, None]
    left = rows[:, :, :, lo_w]
    right = rows[:, :, :, hi_w]
    return left + (right - left) * fw[None, None, None, :]


# ----------------------------------------------------------------------------
# Block-diagonal / folded weight packing (hoisted; do this once per params).
# ----------------------------------------------------------------------------
def pack_fused_weights(params):
    C = params["w1"].shape[0]
    P = max(1, 128 // C)                       # image pairs packed along 128 lanes
    # NOTE: best performance when P * C == 128; larger C still works (blocks
    # equal to the full array dim), just with partially masked lanes.
    eyeP = jnp.eye(P, dtype=jnp.float32)

    w1bd = jnp.kron(eyeP, params["w1"])                          # (PC, PC)
    b1p = jnp.tile(params["b1"], (1, P))                         # (1, PC) f32

    ws_block = params["ws"].T @ jnp.ones((1, C), jnp.float32)    # outer(ws, 1)
    wsbd = jnp.kron(eyeP, ws_block)                              # (PC, PC)

    # Fold the scoring projection into each 3x3 tap weight:
    #   [ w2_t | w2_t @ ws ]  -> one N=2*PC matmul yields features and scores.
    taps = []
    for i in range(3):
        for j in range(3):
            w2bd_t = jnp.kron(eyeP, params["w2"][i, j])          # (PC, PC)
            taps.append(jnp.concatenate([w2bd_t, w2bd_t @ wsbd], axis=1))
    w2f = jnp.stack(taps, axis=0)                                # (9, PC, 2*PC)

    b2p = jnp.tile(params["b2"], (1, P))                         # (1, PC) f32

    return dict(
        w1bd=w1bd.astype(jnp.bfloat16),
        b1p=b1p,
        w2f=w2f.astype(jnp.bfloat16),
        b2p=b2p,
    )


# ----------------------------------------------------------------------------
# Fused Pallas kernel.
#
# Per grid step it receives ONE lane-packed group of P image pairs:
#   x_ref : (1, 2*Lpad, PC) bf16; rows [0:Lpad] = branch1, [Lpad:2*Lpad] =
#           branch2; lane column t*C + c = image t (of P), channel c.
# It computes conv1x1(pad=1)+ReLU -> conv3x3(pad=1) (+ folded 1x1 scoring) ->
# softmax-over-the-two-branches weighted selection.
# ----------------------------------------------------------------------------
def _c_scoring2_kernel(x_ref, w1_ref, b1_ref, w2_ref, b2_ref, mask_ref,
                       o_ref, hpad_ref, *, Lpad, W4, HALO):
    R = 2 * Lpad                           # branch-1 rows then branch-2 rows
    PC = w1_ref.shape[0]

    x = x_ref[0]                           # (R, PC) bf16

    # Conv1x1(padding=1) + ReLU for both branches / all packed images at once.
    # bf16 MXU operands, f32 accumulate; bias/ReLU/mask stay f32 on the VPU.
    # On the pad-by-2 grid the k=1 conv is a plain matmul; padded pixels of the
    # k=1 conv become relu(b1) (correct), and the dense mask then zeroes the
    # outermost ring which acts as the k=3 conv's zero padding.
    h = jnp.dot(x, w1_ref[...], preferred_element_type=jnp.float32) + b1_ref[...]
    h = jnp.maximum(h, 0.0) * mask_ref[...]                       # (R, PC) f32

    # Stage once (f32, sublane-aligned); only halo rows need zeroing — the R
    # interior rows are fully overwritten every step.
    zeros_halo = jnp.zeros((HALO, PC), jnp.float32)
    hpad_ref[:HALO, :] = zeros_halo
    hpad_ref[HALO + R:, :] = zeros_halo
    hpad_ref[HALO:HALO + R, :] = h

    # Conv3x3(padding=1) with the scoring projection folded into the widened
    # (PC, 2*PC) tap weights. Processed per scale branch so the f32 accumulator
    # stays at (Lpad, 2*PC). Taps that cross a branch / halo boundary only
    # influence ring-0 output rows, which the wrapper discards.
    ys, ss = [], []
    for b in range(2):
        base = HALO + b * Lpad
        acc = None
        for t in range(9):
            off = (t // 3 - 1) * W4 + (t % 3 - 1)
            tap = hpad_ref[base + off:base + off + Lpad, :].astype(jnp.bfloat16)
            d = jnp.dot(tap, w2_ref[t], preferred_element_type=jnp.float32)
            acc = d if acc is None else acc + d
        ys.append(acc[:, :PC] + b2_ref[...])       # feature map y_b  (Lpad, PC)
        ss.append(acc[:, PC:])                     # scores s_b; the b2@ws and
        # scoring-bias constants are identical for both branches and cancel in
        # the 2-way softmax, so they are dropped here.

    # soft_selection: softmax over the 2-scale axis, then weighted sum (f32).
    y1, y2 = ys
    s1, s2 = ss
    m = jnp.maximum(s1, s2)
    e1 = jnp.exp(s1 - m)
    e2 = jnp.exp(s2 - m)
    sel = (e1 * y1 + e2 * y2) * pl.reciprocal(e1 + e2, approx=True)
    o_ref[0] = sel.astype(o_ref.dtype)


def fused_select_pallas(x1_nhwc, x2_nhwc, params, packed=None):
    """x*_nhwc: (NB, Hf, Wf, C) -> selected feature map (NB, Hf+2, Wf+2, C)."""
    if packed is None:
        packed = pack_fused_weights(params)

    NB, Hf, Wf, C = x1_nhwc.shape
    PC = packed["w1bd"].shape[0]
    P = PC // C
    H4, W4 = Hf + 4, Wf + 4
    L4 = H4 * W4
    Lpad = (L4 + 7) // 8 * 8                 # sublane-aligned rows per branch
    G = -(-NB // P)                          # grid size (groups of P pairs)
    R = 2 * Lpad
    HALO = ((W4 + 1) + 7) // 8 * 8           # aligned halo for the 3x3 taps

    def pack(x):                             # (NB,Hf,Wf,C) -> (G, Lpad, PC) bf16
        xp = jnp.pad(x, ((0, G * P - NB), (2, 2), (2, 2), (0, 0)))
        xp = xp.reshape(G * P, L4, C)
        xp = jnp.pad(xp, ((0, 0), (0, Lpad - L4), (0, 0)))
        xp = xp.reshape(G, P, Lpad, C).transpose(0, 2, 1, 3).reshape(G, Lpad, PC)
        return xp.astype(jnp.bfloat16)

    xin = jnp.concatenate([pack(x1_nhwc), pack(x2_nhwc)], axis=1)   # (G, R, PC)

    # Host-precomputed dense interior mask (ring-0 of the H4xW4 grid and the
    # alignment-pad rows are zero); identical for both branches, lane-dense.
    rows = np.arange(L4) // W4
    cols = np.arange(L4) % W4
    interior = ((rows >= 1) & (rows <= H4 - 2) &
                (cols >= 1) & (cols <= W4 - 2)).astype(np.float32)
    mrow = np.zeros((Lpad,), np.float32)
    mrow[:L4] = interior
    mask = jnp.asarray(
        np.ascontiguousarray(np.broadcast_to(np.tile(mrow, 2)[:, None], (R, PC))))

    kernel = functools.partial(_c_scoring2_kernel, Lpad=Lpad, W4=W4, HALO=HALO)

    out = pl.pallas_call(
        kernel,
        out_shape=jax.ShapeDtypeStruct((G, Lpad, PC), jnp.float32),
        grid_spec=pltpu.PrefetchScalarGridSpec(
            num_scalar_prefetch=0,
            grid=(G,),
            in_specs=[
                pl.BlockSpec((1, R, PC), lambda g: (g, 0, 0)),        # x (bf16)
                pl.BlockSpec((PC, PC), lambda g: (0, 0)),             # w1 (bf16)
                pl.BlockSpec((1, PC), lambda g: (0, 0)),              # b1 (f32)
                pl.BlockSpec((9, PC, 2 * PC), lambda g: (0, 0, 0)),   # w2|ws (bf16)
                pl.BlockSpec((1, PC), lambda g: (0, 0)),              # b2 (f32)
                pl.BlockSpec((R, PC), lambda g: (0, 0)),              # mask (f32)
            ],
            out_specs=pl.BlockSpec((1, Lpad, PC), lambda g: (g, 0, 0)),
            scratch_shapes=[pltpu.VMEM((2 * HALO + R, PC), jnp.float32)],
        ),
        compiler_params=pltpu.CompilerParams(
            dimension_semantics=("parallel",),        # groups are independent
            vmem_limit_bytes=32 * 1024 * 1024),
    )(xin, packed["w1bd"], packed["b1p"], packed["w2f"], packed["b2p"], mask)

    # Unpack lanes -> images, drop padding, keep the (Hf+2, Wf+2) interior.
    out = out.reshape(G, Lpad, P, C).transpose(0, 2, 1, 3).reshape(G * P, Lpad, C)
    out = out[:NB, :L4, :].reshape(NB, H4, W4, C)[:, 1:H4 - 1, 1:W4 - 1, :]
    return out


# Pure-JAX reference of the fused part (for the sanity check in __main__).
def fused_select_reference(x1_nhwc, x2_nhwc, p):
    C = x1_nhwc.shape[-1]

    def resize_layers(x):
        y = jax.lax.conv_general_dilated(
            x, p["w1"].reshape(1, 1, C, C), (1, 1), [(1, 1), (1, 1)],
            dimension_numbers=("NHWC", "HWIO", "NHWC")) + p["b1"][0]
        y = jnp.maximum(y, 0.0)
        y = jax.lax.conv_general_dilated(
            y, p["w2"], (1, 1), [(1, 1), (1, 1)],
            dimension_numbers=("NHWC", "HWIO", "NHWC")) + p["b2"][0]
        return y

    y1 = resize_layers(x1_nhwc)
    y2 = resize_layers(x2_nhwc)
    s1 = jnp.sum(y1 * p["ws"][0], axis=-1, keepdims=True) + p["bs"][0, 0]
    s2 = jnp.sum(y2 * p["ws"][0], axis=-1, keepdims=True) + p["bs"][0, 0]
    w = jax.nn.softmax(jnp.stack([s1, s2], axis=0), axis=0)
    return w[0] * y1 + w[1] * y2


# ----------------------------------------------------------------------------
# Full forward (global_scale_pool=False branch of C_scoring2)
# ----------------------------------------------------------------------------
def _prepare_pairs(x_pyramid, skip=1):
    n = len(x_pyramid)
    mid = max_pool2d_nchw(x_pyramid[n // 2], 4, 3)          # pool2 on middle level
    final_size = mid.shape[-2:]
    indices = list(range(0, n - 1, skip))
    x1 = [bilinear_resize_nchw(max_pool2d_nchw(x_pyramid[i], 3, 2), final_size)
          for i in indices]
    x2 = [bilinear_resize_nchw(max_pool2d_nchw(x_pyramid[i + 1], 4, 3), final_size)
          for i in indices]
    # NCHW -> NHWC, stack pairs on the batch axis (N_pair*B, Hf, Wf, C)
    x1b = jnp.concatenate([jnp.transpose(x, (0, 2, 3, 1)) for x in x1], axis=0)
    x2b = jnp.concatenate([jnp.transpose(x, (0, 2, 3, 1)) for x in x2], axis=0)
    return x1b, x2b, len(indices)


def c_scoring2_optimized_forward(x_pyramid, params, skip=1, packed=None):
    n = len(x_pyramid)
    if n == 1:
        # scoring_conv output is discarded in the original code; skip it.
        return [max_pool2d_nchw(x_pyramid[0], 4, 3)]
    if packed is None:
        packed = pack_fused_weights(params)
    B, C = x_pyramid[0].shape[:2]
    x1b, x2b, n_pair = _prepare_pairs(x_pyramid, skip)
    sel = fused_select_pallas(x1b, x2b, params, packed)       # (N*B, H+2, W+2, C) NHWC
    sel = jnp.transpose(sel, (0, 3, 1, 2))                    # -> NCHW
    H2, W2 = sel.shape[-2:]
    sel = sel.reshape(n_pair, B, C, H2, W2)
    return [sel[i] for i in range(n_pair)]


# ----------------------------------------------------------------------------
if __name__ == "__main__":
    key = jax.random.PRNGKey(0)
    B, C = 2, 8
    sizes = [32, 26, 20]                                     # 3-level image pyramid
    keys = jax.random.split(key, len(sizes) + 1)
    x_pyramid = [jax.random.normal(keys[i], (B, C, s, s), jnp.float32)
                 for i, s in enumerate(sizes)]
    params = init_params(C, keys[-1])
    packed = pack_fused_weights(params)                      # hoisted weight packing

    # Full forward pass through the Pallas kernel.
    out = c_scoring2_optimized_forward(x_pyramid, params, packed=packed)
    out = [jax.block_until_ready(o) for o in out]
    assert len(out) == len(sizes) - 1

    # Shape check: final_size = pool2(mid level) size + 2 (conv k=1 pad=1 growth).
    Hf = (sizes[len(sizes) // 2] - 4) // 3 + 1
    for o in out:
        assert o.shape == (B, C, Hf + 2, Hf + 2), o.shape

    # Sanity check: fused Pallas kernel (bf16 matmuls) vs pure-JAX f32 reference.
    x1b, x2b, _ = _prepare_pairs(x_pyramid)
    sel_pallas = jax.block_until_ready(fused_select_pallas(x1b, x2b, params, packed))
    sel_ref = jax.block_until_ready(fused_select_reference(x1b, x2b, params))
    np.testing.assert_allclose(np.asarray(sel_pallas), np.asarray(sel_ref),
                               rtol=2e-2, atol=2e-2)

    print("KERNEL_OK")
</pallas_src>

<mosaic_0001>
module attributes {stable_mosaic.version = 11 : i64} {
  func.func @_c_scoring2_kernel(%arg0: i32, %arg1: memref<1x288x128xbf16, #tpu.memory_space<vmem>>, %arg2: memref<128x128xbf16, #tpu.memory_space<vmem>>, %arg3: memref<1x128xf32, #tpu.memory_space<vmem>>, %arg4: memref<9x128x256xbf16, #tpu.memory_space<vmem>>, %arg5: memref<1x128xf32, #tpu.memory_space<vmem>>, %arg6: memref<288x128xf32, #tpu.memory_space<vmem>>, %arg7: memref<1x144x128xf32, #tpu.memory_space<vmem>>, %arg8: memref<320x128xf32, #tpu.memory_space<vmem>>) attributes {dimension_semantics = [#tpu.dimension_semantics<parallel>], iteration_bounds = array<i64: 1>, scalar_prefetch = 0 : i64, scratch_operands = 1 : i64, tpu.core_type = #tpu.core_type<tc>, window_params = [{transform_indices = @transform_0, window_bounds = array<i64: 1, 288, 128>}, {pipeline_mode = #tpu.pipeline_mode<synchronous>, transform_indices = @transform_1, window_bounds = array<i64: 128, 128>}, {pipeline_mode = #tpu.pipeline_mode<synchronous>, transform_indices = @transform_2, window_bounds = array<i64: 1, 128>}, {pipeline_mode = #tpu.pipeline_mode<synchronous>, transform_indices = @transform_3, window_bounds = array<i64: 9, 128, 256>}, {pipeline_mode = #tpu.pipeline_mode<synchronous>, transform_indices = @transform_4, window_bounds = array<i64: 1, 128>}, {pipeline_mode = #tpu.pipeline_mode<synchronous>, transform_indices = @transform_5, window_bounds = array<i64: 288, 128>}, {transform_indices = @transform_6, window_bounds = array<i64: 1, 144, 128>}]} {
    %c0 = arith.constant 0 : index
    %c0_0 = arith.constant 0 : index
    %c0_1 = arith.constant 0 : index
    %0 = vector.load %arg1[%c0, %c0_0, %c0_1] : memref<1x288x128xbf16, #tpu.memory_space<vmem>>, vector<1x288x128xbf16>
    %1 = vector.shape_cast %0 : vector<1x288x128xbf16> to vector<288x128xbf16>
    %c0_2 = arith.constant 0 : index
    %c0_3 = arith.constant 0 : index
    %2 = vector.load %arg2[%c0_2, %c0_3] : memref<128x128xbf16, #tpu.memory_space<vmem>>, vector<128x128xbf16>
    %cst = arith.constant dense<0.000000e+00> : vector<288x128xf32>
    %3 = tpu.matmul %1, %2, %cst {dimension_numbers = #tpu.dot_dimension_numbers<[1], [0], [0], [1], [0, 0, 1, 1], [], []>} : vector<288x128xbf16>, vector<128x128xbf16>, vector<288x128xf32> -> vector<288x128xf32>
    %c0_4 = arith.constant 0 : index
    %c0_5 = arith.constant 0 : index
    %4 = vector.load %arg3[%c0_4, %c0_5] : memref<1x128xf32, #tpu.memory_space<vmem>>, vector<1x128xf32>
    %5 = vector.broadcast %4 : vector<1x128xf32> to vector<288x128xf32>
    %6 = arith.addf %3, %5 : vector<288x128xf32>
    %cst_6 = arith.constant 0.000000e+00 : f32
    %7 = vector.broadcast %cst_6 : f32 to vector<288x128xf32>
    %8 = arith.maximumf %6, %7 : vector<288x128xf32>
    %c0_7 = arith.constant 0 : index
    %c0_8 = arith.constant 0 : index
    %9 = vector.load %arg6[%c0_7, %c0_8] : memref<288x128xf32, #tpu.memory_space<vmem>>, vector<288x128xf32>
    %10 = arith.mulf %8, %9 : vector<288x128xf32>
    %cst_9 = arith.constant 0.000000e+00 : f32
    %11 = vector.broadcast %cst_9 : f32 to vector<16x128xf32>
    %c0_10 = arith.constant 0 : index
    %c0_11 = arith.constant 0 : index
    %12 = vector.load %arg8[%c0_10, %c0_11] : memref<320x128xf32, #tpu.memory_space<vmem>>, vector<16x128xf32>
    tpu.vector_store %arg8[%c0_10, %c0_11], %11 {strides = array<i32>} : memref<320x128xf32, #tpu.memory_space<vmem>>, vector<16x128xf32>,
    %c304 = arith.constant 304 : index
    %c0_12 = arith.constant 0 : index
    %13 = vector.load %arg8[%c304, %c0_12] : memref<320x128xf32, #tpu.memory_space<vmem>>, vector<16x128xf32>
    tpu.vector_store %arg8[%c304, %c0_12], %11 {strides = array<i32>} : memref<320x128xf32, #tpu.memory_space<vmem>>, vector<16x128xf32>,
    %c16 = arith.constant 16 : index
    %c0_13 = arith.constant 0 : index
    %14 = vector.load %arg8[%c16, %c0_13] : memref<320x128xf32, #tpu.memory_space<vmem>>, vector<288x128xf32>
    tpu.vector_store %arg8[%c16, %c0_13], %10 {strides = array<i32>} : memref<320x128xf32, #tpu.memory_space<vmem>>, vector<288x128xf32>,
    %c3 = arith.constant 3 : index
    %c0_14 = arith.constant 0 : index
    %15 = vector.load %arg8[%c3, %c0_14] : memref<320x128xf32, #tpu.memory_space<vmem>>, vector<144x128xf32>
    %16 = arith.truncf %15 : vector<144x128xf32> to vector<144x128xbf16>
    %c0_15 = arith.constant 0 : index
    %c0_16 = arith.constant 0 : index
    %c0_17 = arith.constant 0 : index
    %17 = vector.load %arg4[%c0_15, %c0_16, %c0_17] : memref<9x128x256xbf16, #tpu.memory_space<vmem>>, vector<1x128x256xbf16>
    %18 = vector.shape_cast %17 : vector<1x128x256xbf16> to vector<128x256xbf16>
    %cst_18 = arith.constant dense<0.000000e+00> : vector<144x256xf32>
    %19 = tpu.matmul %16, %18, %cst_18 {dimension_numbers = #tpu.dot_dimension_numbers<[1], [0], [0], [1], [0, 0, 1, 1], [], []>} : vector<144x128xbf16>, vector<128x256xbf16>, vector<144x256xf32> -> vector<144x256xf32>
    %c4 = arith.constant 4 : index
    %c0_19 = arith.constant 0 : index
    %20 = vector.load %arg8[%c4, %c0_19] : memref<320x128xf32, #tpu.memory_space<vmem>>, vector<144x128xf32>
    %21 = arith.truncf %20 : vector<144x128xf32> to vector<144x128xbf16>
    %c1 = arith.constant 1 : index
    %c0_20 = arith.constant 0 : index
    %c0_21 = arith.constant 0 : index
    %22 = vector.load %arg4[%c1, %c0_20, %c0_21] : memref<9x128x256xbf16, #tpu.memory_space<vmem>>, vector<1x128x256xbf16>
    %23 = vector.shape_cast %22 : vector<1x128x256xbf16> to vector<128x256xbf16>
    %cst_22 = arith.constant dense<0.000000e+00> : vector<144x256xf32>
    %24 = tpu.matmul %21, %23, %cst_22 {dimension_numbers = #tpu.dot_dimension_numbers<[1], [0], [0], [1], [0, 0, 1, 1], [], []>} : vector<144x128xbf16>, vector<128x256xbf16>, vector<144x256xf32> -> vector<144x256xf32>
    %25 = arith.addf %19, %24 : vector<144x256xf32>
    %c5 = arith.constant 5 : index
    %c0_23 = arith.constant 0 : index
    %26 = vector.load %arg8[%c5, %c0_23] : memref<320x128xf32, #tpu.memory_space<vmem>>, vector<144x128xf32>
    %27 = arith.truncf %26 : vector<144x128xf32> to vector<144x128xbf16>
    %c2 = arith.constant 2 : index
    %c0_24 = arith.constant 0 : index
    %c0_25 = arith.constant 0 : index
    %28 = vector.load %arg4[%c2, %c0_24, %c0_25] : memref<9x128x256xbf16, #tpu.memory_space<vmem>>, vector<1x128x256xbf16>
    %29 = vector.shape_cast %28 : vector<1x128x256xbf16> to vector<128x256xbf16>
    %cst_26 = arith.constant dense<0.000000e+00> : vector<144x256xf32>
    %30 = tpu.matmul %27, %29, %cst_26 {dimension_numbers = #tpu.dot_dimension_numbers<[1], [0], [0], [1], [0, 0, 1, 1], [], []>} : vector<144x128xbf16>, vector<128x256xbf16>, vector<144x256xf32> -> vector<144x256xf32>
    %31 = arith.addf %25, %30 : vector<144x256xf32>
    %c15 = arith.constant 15 : index
    %c0_27 = arith.constant 0 : index
    %32 = vector.load %arg8[%c15, %c0_27] : memref<320x128xf32, #tpu.memory_space<vmem>>, vector<144x128xf32>
    %33 = arith.truncf %32 : vector<144x128xf32> to vector<144x128xbf16>
    %c3_28 = arith.constant 3 : index
    %c0_29 = arith.constant 0 : index
    %c0_30 = arith.constant 0 : index
    %34 = vector.load %arg4[%c3_28, %c0_29, %c0_30] : memref<9x128x256xbf16, #tpu.memory_space<vmem>>, vector<1x128x256xbf16>
    %35 = vector.shape_cast %34 : vector<1x128x256xbf16> to vector<128x256xbf16>
    %cst_31 = arith.constant dense<0.000000e+00> : vector<144x256xf32>
    %36 = tpu.matmul %33, %35, %cst_31 {dimension_numbers = #tpu.dot_dimension_numbers<[1], [0], [0], [1], [0, 0, 1, 1], [], []>} : vector<144x128xbf16>, vector<128x256xbf16>, vector<144x256xf32> -> vector<144x256xf32>
    %37 = arith.addf %31, %36 : vector<144x256xf32>
    %c16_32 = arith.constant 16 : index
    %c0_33 = arith.constant 0 : index
    %38 = vector.load %arg8[%c16_32, %c0_33] : memref<320x128xf32, #tpu.memory_space<vmem>>, vector<144x128xf32>
    %39 = arith.truncf %38 : vector<144x128xf32> to vector<144x128xbf16>
    %c4_34 = arith.constant 4 : index
    %c0_35 = arith.constant 0 : index
    %c0_36 = arith.constant 0 : index
    %40 = vector.load %arg4[%c4_34, %c0_35, %c0_36] : memref<9x128x256xbf16, #tpu.memory_space<vmem>>, vector<1x128x256xbf16>
    %41 = vector.shape_cast %40 : vector<1x128x256xbf16> to vector<128x256xbf16>
    %cst_37 = arith.constant dense<0.000000e+00> : vector<144x256xf32>
    %42 = tpu.matmul %39, %41, %cst_37 {dimension_numbers = #tpu.dot_dimension_numbers<[1], [0], [0], [1], [0, 0, 1, 1], [], []>} : vector<144x128xbf16>, vector<128x256xbf16>, vector<144x256xf32> -> vector<144x256xf32>
    %43 = arith.addf %37, %42 : vector<144x256xf32>
    %c17 = arith.constant 17 : index
    %c0_38 = arith.constant 0 : index
    %44 = vector.load %arg8[%c17, %c0_38] : memref<320x128xf32, #tpu.memory_space<vmem>>, vector<144x128xf32>
    %45 = arith.truncf %44 : vector<144x128xf32> to vector<144x128xbf16>
    %c5_39 = arith.constant 5 : index
    %c0_40 = arith.constant 0 : index
    %c0_41 = arith.constant 0 : index
    %46 = vector.load %arg4[%c5_39, %c0_40, %c0_41] : memref<9x128x256xbf16, #tpu.memory_space<vmem>>, vector<1x128x256xbf16>
    %47 = vector.shape_cast %46 : vector<1x128x256xbf16> to vector<128x256xbf16>
    %cst_42 = arith.constant dense<0.000000e+00> : vector<144x256xf32>
    %48 = tpu.matmul %45, %47, %cst_42 {dimension_numbers = #tpu.dot_dimension_numbers<[1], [0], [0], [1], [0, 0, 1, 1], [], []>} : vector<144x128xbf16>, vector<128x256xbf16>, vector<144x256xf32> -> vector<144x256xf32>
    %49 = arith.addf %43, %48 : vector<144x256xf32>
    %c27 = arith.constant 27 : index
    %c0_43 = arith.constant 0 : index
    %50 = vector.load %arg8[%c27, %c0_43] : memref<320x128xf32, #tpu.memory_space<vmem>>, vector<144x128xf32>
    %51 = arith.truncf %50 : vector<144x128xf32> to vector<144x128xbf16>
    %c6 = arith.constant 6 : index
    %c0_44 = arith.constant 0 : index
    %c0_45 = arith.constant 0 : index
    %52 = vector.load %arg4[%c6, %c0_44, %c0_45] : memref<9x128x256xbf16, #tpu.memory_space<vmem>>, vector<1x128x256xbf16>
    %53 = vector.shape_cast %52 : vector<1x128x256xbf16> to vector<128x256xbf16>
    %cst_46 = arith.constant dense<0.000000e+00> : vector<144x256xf32>
    %54 = tpu.matmul %51, %53, %cst_46 {dimension_numbers = #tpu.dot_dimension_numbers<[1], [0], [0], [1], [0, 0, 1, 1], [], []>} : vector<144x128xbf16>, vector<128x256xbf16>, vector<144x256xf32> -> vector<144x256xf32>
    %55 = arith.addf %49, %54 : vector<144x256xf32>
    %c28 = arith.constant 28 : index
    %c0_47 = arith.constant 0 : index
    %56 = vector.load %arg8[%c28, %c0_47] : memref<320x128xf32, #tpu.memory_space<vmem>>, vector<144x128xf32>
    %57 = arith.truncf %56 : vector<144x128xf32> to vector<144x128xbf16>
    %c7 = arith.constant 7 : index
    %c0_48 = arith.constant 0 : index
    %c0_49 = arith.constant 0 : index
    %58 = vector.load %arg4[%c7, %c0_48, %c0_49] : memref<9x128x256xbf16, #tpu.memory_space<vmem>>, vector<1x128x256xbf16>
    %59 = vector.shape_cast %58 : vector<1x128x256xbf16> to vector<128x256xbf16>
    %cst_50 = arith.constant dense<0.000000e+00> : vector<144x256xf32>
    %60 = tpu.matmul %57, %59, %cst_50 {dimension_numbers = #tpu.dot_dimension_numbers<[1], [0], [0], [1], [0, 0, 1, 1], [], []>} : vector<144x128xbf16>, vector<128x256xbf16>, vector<144x256xf32> -> vector<144x256xf32>
    %61 = arith.addf %55, %60 : vector<144x256xf32>
    %c29 = arith.constant 29 : index
    %c0_51 = arith.constant 0 : index
    %62 = vector.load %arg8[%c29, %c0_51] : memref<320x128xf32, #tpu.memory_space<vmem>>, vector<144x128xf32>
    %63 = arith.truncf %62 : vector<144x128xf32> to vector<144x128xbf16>
    %c8 = arith.constant 8 : index
    %c0_52 = arith.constant 0 : index
    %c0_53 = arith.constant 0 : index
    %64 = vector.load %arg4[%c8, %c0_52, %c0_53] : memref<9x128x256xbf16, #tpu.memory_space<vmem>>, vector<1x128x256xbf16>
    %65 = vector.shape_cast %64 : vector<1x128x256xbf16> to vector<128x256xbf16>
    %cst_54 = arith.constant dense<0.000000e+00> : vector<144x256xf32>
    %66 = tpu.matmul %63, %65, %cst_54 {dimension_numbers = #tpu.dot_dimension_numbers<[1], [0], [0], [1], [0, 0, 1, 1], [], []>} : vector<144x128xbf16>, vector<128x256xbf16>, vector<144x256xf32> -> vector<144x256xf32>
    %67 = arith.addf %61, %66 : vector<144x256xf32>
    %68 = vector.extract_strided_slice %67 {offsets = [0, 0], sizes = [144, 128], strides = [1, 1]} : vector<144x256xf32> to vector<144x128xf32>
    %c0_55 = arith.constant 0 : index
    %c0_56 = arith.constant 0 : index
    %69 = vector.load %arg5[%c0_55, %c0_56] : memref<1x128xf32, #tpu.memory_space<vmem>>, vector<1x128xf32>
    %70 = vector.broadcast %69 : vector<1x128xf32> to vector<144x128xf32>
    %71 = arith.addf %68, %70 : vector<144x128xf32>
    %72 = vector.extract_strided_slice %67 {offsets = [0, 128], sizes = [144, 128], strides = [1, 1]} : vector<144x256xf32> to vector<144x128xf32>
    %c147 = arith.constant 147 : index
    %c0_57 = arith.constant 0 : index
    %73 = vector.load %arg8[%c147, %c0_57] : memref<320x128xf32, #tpu.memory_space<vmem>>, vector<144x128xf32>
    %74 = arith.truncf %73 : vector<144x128xf32> to vector<144x128xbf16>
    %c0_58 = arith.constant 0 : index
    %c0_59 = arith.constant 0 : index
    %c0_60 = arith.constant 0 : index
    %75 = vector.load %arg4[%c0_58, %c0_59, %c0_60] : memref<9x128x256xbf16, #tpu.memory_space<vmem>>, vector<1x128x256xbf16>
    %76 = vector.shape_cast %75 : vector<1x128x256xbf16> to vector<128x256xbf16>
    %cst_61 = arith.constant dense<0.000000e+00> : vector<144x256xf32>
    %77 = tpu.matmul %74, %76, %cst_61 {dimension_numbers = #tpu.dot_dimension_numbers<[1], [0], [0], [1], [0, 0, 1, 1], [], []>} : vector<144x128xbf16>, vector<128x256xbf16>, vector<144x256xf32> -> vector<144x256xf32>
    %c148 = arith.constant 148 : index
    %c0_62 = arith.constant 0 : index
    %78 = vector.load %arg8[%c148, %c0_62] : memref<320x128xf32, #tpu.memory_space<vmem>>, vector<144x128xf32>
    %79 = arith.truncf %78 : vector<144x128xf32> to vector<144x128xbf16>
    %c1_63 = arith.constant 1 : index
    %c0_64 = arith.constant 0 : index
    %c0_65 = arith.constant 0 : index
    %80 = vector.load %arg4[%c1_63, %c0_64, %c0_65] : memref<9x128x256xbf16, #tpu.memory_space<vmem>>, vector<1x128x256xbf16>
    %81 = vector.shape_cast %80 : vector<1x128x256xbf16> to vector<128x256xbf16>
    %cst_66 = arith.constant dense<0.000000e+00> : vector<144x256xf32>
    %82 = tpu.matmul %79, %81, %cst_66 {dimension_numbers = #tpu.dot_dimension_numbers<[1], [0], [0], [1], [0, 0, 1, 1], [], []>} : vector<144x128xbf16>, vector<128x256xbf16>, vector<144x256xf32> -> vector<144x256xf32>
    %83 = arith.addf %77, %82 : vector<144x256xf32>
    %c149 = arith.constant 149 : index
    %c0_67 = arith.constant 0 : index
    %84 = vector.load %arg8[%c149, %c0_67] : memref<320x128xf32, #tpu.memory_space<vmem>>, vector<144x128xf32>
    %85 = arith.truncf %84 : vector<144x128xf32> to vector<144x128xbf16>
    %c2_68 = arith.constant 2 : index
    %c0_69 = arith.constant 0 : index
    %c0_70 = arith.constant 0 : index
    %86 = vector.load %arg4[%c2_68, %c0_69, %c0_70] : memref<9x128x256xbf16, #tpu.memory_space<vmem>>, vector<1x128x256xbf16>
    %87 = vector.shape_cast %86 : vector<1x128x256xbf16> to vector<128x256xbf16>
    %cst_71 = arith.constant dense<0.000000e+00> : vector<144x256xf32>
    %88 = tpu.matmul %85, %87, %cst_71 {dimension_numbers = #tpu.dot_dimension_numbers<[1], [0], [0], [1], [0, 0, 1, 1], [], []>} : vector<144x128xbf16>, vector<128x256xbf16>, vector<144x256xf32> -> vector<144x256xf32>
    %89 = arith.addf %83, %88 : vector<144x256xf32>
    %c159 = arith.constant 159 : index
    %c0_72 = arith.constant 0 : index
    %90 = vector.load %arg8[%c159, %c0_72] : memref<320x128xf32, #tpu.memory_space<vmem>>, vector<144x128xf32>
    %91 = arith.truncf %90 : vector<144x128xf32> to vector<144x128xbf16>
    %c3_73 = arith.constant 3 : index
    %c0_74 = arith.constant 0 : index
    %c0_75 = arith.constant 0 : index
    %92 = vector.load %arg4[%c3_73, %c0_74, %c0_75] : memref<9x128x256xbf16, #tpu.memory_space<vmem>>, vector<1x128x256xbf16>
    %93 = vector.shape_cast %92 : vector<1x128x256xbf16> to vector<128x256xbf16>
    %cst_76 = arith.constant dense<0.000000e+00> : vector<144x256xf32>
    %94 = tpu.matmul %91, %93, %cst_76 {dimension_numbers = #tpu.dot_dimension_numbers<[1], [0], [0], [1], [0, 0, 1, 1], [], []>} : vector<144x128xbf16>, vector<128x256xbf16>, vector<144x256xf32> -> vector<144x256xf32>
    %95 = arith.addf %89, %94 : vector<144x256xf32>
    %c160 = arith.constant 160 : index
    %c0_77 = arith.constant 0 : index
    %96 = vector.load %arg8[%c160, %c0_77] : memref<320x128xf32, #tpu.memory_space<vmem>>, vector<144x128xf32>
    %97 = arith.truncf %96 : vector<144x128xf32> to vector<144x128xbf16>
    %c4_78 = arith.constant 4 : index
    %c0_79 = arith.constant 0 : index
    %c0_80 = arith.constant 0 : index
    %98 = vector.load %arg4[%c4_78, %c0_79, %c0_80] : memref<9x128x256xbf16, #tpu.memory_space<vmem>>, vector<1x128x256xbf16>
    %99 = vector.shape_cast %98 : vector<1x128x256xbf16> to vector<128x256xbf16>
    %cst_81 = arith.constant dense<0.000000e+00> : vector<144x256xf32>
    %100 = tpu.matmul %97, %99, %cst_81 {dimension_numbers = #tpu.dot_dimension_numbers<[1], [0], [0], [1], [0, 0, 1, 1], [], []>} : vector<144x128xbf16>, vector<128x256xbf16>, vector<144x256xf32> -> vector<144x256xf32>
    %101 = arith.addf %95, %100 : vector<144x256xf32>
    %c161 = arith.constant 161 : index
    %c0_82 = arith.constant 0 : index
    %102 = vector.load %arg8[%c161, %c0_82] : memref<320x128xf32, #tpu.memory_space<vmem>>, vector<144x128xf32>
    %103 = arith.truncf %102 : vector<144x128xf32> to vector<144x128xbf16>
    %c5_83 = arith.constant 5 : index
    %c0_84 = arith.constant 0 : index
    %c0_85 = arith.constant 0 : index
    %104 = vector.load %arg4[%c5_83, %c0_84, %c0_85] : memref<9x128x256xbf16, #tpu.memory_space<vmem>>, vector<1x128x256xbf16>
    %105 = vector.shape_cast %104 : vector<1x128x256xbf16> to vector<128x256xbf16>
    %cst_86 = arith.constant dense<0.000000e+00> : vector<144x256xf32>
    %106 = tpu.matmul %103, %105, %cst_86 {dimension_numbers = #tpu.dot_dimension_numbers<[1], [0], [0], [1], [0, 0, 1, 1], [], []>} : vector<144x128xbf16>, vector<128x256xbf16>, vector<144x256xf32> -> vector<144x256xf32>
    %107 = arith.addf %101, %106 : vector<144x256xf32>
    %c171 = arith.constant 171 : index
    %c0_87 = arith.constant 0 : index
    %108 = vector.load %arg8[%c171, %c0_87] : memref<320x128xf32, #tpu.memory_space<vmem>>, vector<144x128xf32>
    %109 = arith.truncf %108 : vector<144x128xf32> to vector<144x128xbf16>
    %c6_88 = arith.constant 6 : index
    %c0_89 = arith.constant 0 : index
    %c0_90 = arith.constant 0 : index
    %110 = vector.load %arg4[%c6_88, %c0_89, %c0_90] : memref<9x128x256xbf16, #tpu.memory_space<vmem>>, vector<1x128x256xbf16>
    %111 = vector.shape_cast %110 : vector<1x128x256xbf16> to vector<128x256xbf16>
    %cst_91 = arith.constant dense<0.000000e+00> : vector<144x256xf32>
    %112 = tpu.matmul %109, %111, %cst_91 {dimension_numbers = #tpu.dot_dimension_numbers<[1], [0], [0], [1], [0, 0, 1, 1], [], []>} : vector<144x128xbf16>, vector<128x256xbf16>, vector<144x256xf32> -> vector<144x256xf32>
    %113 = arith.addf %107, %112 : vector<144x256xf32>
    %c172 = arith.constant 172 : index
    %c0_92 = arith.constant 0 : index
    %114 = vector.load %arg8[%c172, %c0_92] : memref<320x128xf32, #tpu.memory_space<vmem>>, vector<144x128xf32>
    %115 = arith.truncf %114 : vector<144x128xf32> to vector<144x128xbf16>
    %c7_93 = arith.constant 7 : index
    %c0_94 = arith.constant 0 : index
    %c0_95 = arith.constant 0 : index
    %116 = vector.load %arg4[%c7_93, %c0_94, %c0_95] : memref<9x128x256xbf16, #tpu.memory_space<vmem>>, vector<1x128x256xbf16>
    %117 = vector.shape_cast %116 : vector<1x128x256xbf16> to vector<128x256xbf16>
    %cst_96 = arith.constant dense<0.000000e+00> : vector<144x256xf32>
    %118 = tpu.matmul %115, %117, %cst_96 {dimension_numbers = #tpu.dot_dimension_numbers<[1], [0], [0], [1], [0, 0, 1, 1], [], []>} : vector<144x128xbf16>, vector<128x256xbf16>, vector<144x256xf32> -> vector<144x256xf32>
    %119 = arith.addf %113, %118 : vector<144x256xf32>
    %c173 = arith.constant 173 : index
    %c0_97 = arith.constant 0 : index
    %120 = vector.load %arg8[%c173, %c0_97] : memref<320x128xf32, #tpu.memory_space<vmem>>, vector<144x128xf32>
    %121 = arith.truncf %120 : vector<144x128xf32> to vector<144x128xbf16>
    %c8_98 = arith.constant 8 : index
    %c0_99 = arith.constant 0 : index
    %c0_100 = arith.constant 0 : index
    %122 = vector.load %arg4[%c8_98, %c0_99, %c0_100] : memref<9x128x256xbf16, #tpu.memory_space<vmem>>, vector<1x128x256xbf16>
    %123 = vector.shape_cast %122 : vector<1x128x256xbf16> to vector<128x256xbf16>
    %cst_101 = arith.constant dense<0.000000e+00> : vector<144x256xf32>
    %124 = tpu.matmul %121, %123, %cst_101 {dimension_numbers = #tpu.dot_dimension_numbers<[1], [0], [0], [1], [0, 0, 1, 1], [], []>} : vector<144x128xbf16>, vector<128x256xbf16>, vector<144x256xf32> -> vector<144x256xf32>
    %125 = arith.addf %119, %124 : vector<144x256xf32>
    %126 = vector.extract_strided_slice %125 {offsets = [0, 0], sizes = [144, 128], strides = [1, 1]} : vector<144x256xf32> to vector<144x128xf32>
    %c0_102 = arith.constant 0 : index
    %c0_103 = arith.constant 0 : index
    %127 = vector.load %arg5[%c0_102, %c0_103] : memref<1x128xf32, #tpu.memory_space<vmem>>, vector<1x128xf32>
    %128 = vector.broadcast %127 : vector<1x128xf32> to vector<144x128xf32>
    %129 = arith.addf %126, %128 : vector<144x128xf32>
    %130 = vector.extract_strided_slice %125 {offsets = [0, 128], sizes = [144, 128], strides = [1, 1]} : vector<144x256xf32> to vector<144x128xf32>
    %131 = arith.maximumf %72, %130 : vector<144x128xf32>
    %132 = arith.subf %72, %131 : vector<144x128xf32>
    %133 = math.exp %132 : vector<144x128xf32>
    %134 = arith.subf %130, %131 : vector<144x128xf32>
    %135 = math.exp %134 : vector<144x128xf32>
    %136 = arith.mulf %133, %71 : vector<144x128xf32>
    %137 = arith.mulf %135, %129 : vector<144x128xf32>
    %138 = arith.addf %136, %137 : vector<144x128xf32>
    %139 = arith.addf %133, %135 : vector<144x128xf32>
    %140 = tpu.reciprocal %139 {approx = true} : vector<144x128xf32> -> vector<144x128xf32>
    %141 = arith.mulf %138, %140 : vector<144x128xf32>
    %c0_104 = arith.constant 0 : index
    %c0_105 = arith.constant 0 : index
    %c0_106 = arith.constant 0 : index
    %142 = vector.load %arg7[%c0_104, %c0_105, %c0_106] : memref<1x144x128xf32, #tpu.memory_space<vmem>>, vector<1x144x128xf32>
    %143 = vector.shape_cast %142 : vector<1x144x128xf32> to vector<144x128xf32>
    %144 = vector.shape_cast %141 : vector<144x128xf32> to vector<1x144x128xf32>
    tpu.vector_store %arg7[%c0_104, %c0_105, %c0_106], %144 {strides = array<i32>} : memref<1x144x128xf32, #tpu.memory_space<vmem>>, vector<1x144x128xf32>,
    return
  }
  func.func @transform_0(%arg0: i32) -> (i32, i32, i32) {
    %c0_i32 = arith.constant 0 : i32
    %c0_i32_0 = arith.constant 0 : i32
    %c0_i32_1 = arith.constant 0 : i32
    return %arg0, %c0_i32, %c0_i32_0 : i32, i32, i32
  }
  func.func @transform_1(%arg0: i32) -> (i32, i32) {
    %c0_i32 = arith.constant 0 : i32
    %c0_i32_0 = arith.constant 0 : i32
    %c0_i32_1 = arith.constant 0 : i32
    return %c0_i32, %c0_i32_0 : i32, i32
  }
  func.func @transform_2(%arg0: i32) -> (i32, i32) {
    %c0_i32 = arith.constant 0 : i32
    %c0_i32_0 = arith.constant 0 : i32
    %c0_i32_1 = arith.constant 0 : i32
    return %c0_i32, %c0_i32_0 : i32, i32
  }
  func.func @transform_3(%arg0: i32) -> (i32, i32, i32) {
    %c0_i32 = arith.constant 0 : i32
    %c0_i32_0 = arith.constant 0 : i32
    %c0_i32_1 = arith.constant 0 : i32
    %c0_i32_2 = arith.constant 0 : i32
    return %c0_i32, %c0_i32_0, %c0_i32_1 : i32, i32, i32
  }
  func.func @transform_4(%arg0: i32) -> (i32, i32) {
    %c0_i32 = arith.constant 0 : i32
    %c0_i32_0 = arith.constant 0 : i32
    %c0_i32_1 = arith.constant 0 : i32
    return %c0_i32, %c0_i32_0 : i32, i32
  }
  func.func @transform_5(%arg0: i32) -> (i32, i32) {
    %c0_i32 = arith.constant 0 : i32
    %c0_i32_0 = arith.constant 0 : i32
    %c0_i32_1 = arith.constant 0 : i32
    return %c0_i32, %c0_i32_0 : i32, i32
  }
  func.func @transform_6(%arg0: i32) -> (i32, i32, i32) {
    %c0_i32 = arith.constant 0 : i32
    %c0_i32_0 = arith.constant 0 : i32
    %c0_i32_1 = arith.constant 0 : i32
    return %arg0, %c0_i32, %c0_i32_0 : i32, i32, i32
  }
}

</mosaic_0001>

<bundles_post_ra>
// kernel: tpu_custom_call.1
= control target key start
LH: loop header
LB: loop body
LE: loop exit
PB: predicated region body
PF: predicated region fallthrough
CT: control target
= control target key end

     0   :  { %11 = vsyncpa [#allocation4], 0  ;;  %s6802_s0 = inlined_call_operand.hbm [shape: bf16[1,288,128], index: 0, kind: input, shape index: {}]   ;;  %s6803_s1 = inlined_call_operand.hbm [shape: bf16[128,128], index: 1, kind: input, shape index: {}]   ;;  %s6804_s2 = inlined_call_operand.vmem [shape: f32[1,128], index: 2, kind: input, shape index: {}]   ;;  %s6805_s3 = inlined_call_operand.hbm [shape: bf16[9,128,256], index: 3, kind: input, shape index: {}]   ;;  %s6806_s4 = inlined_call_operand.vmem [shape: f32[1,128], index: 4, kind: input, shape index: {}]   ;;  %s6807_s5 = inlined_call_operand.hbm [shape: f32[288,128], index: 5, kind: input, shape index: {}]   ;;  %s6808_s6 = inlined_call_operand.hbm [shape: f32[1,144,128], index: 6, kind: output, shape index: {}]  }
   0x1   :  { %12 = vsyncpa [#allocation7], 0 }
   0x2   :  { %13 = vsyncpa [#allocation10], 0 }
   0x3   :  { %14 = vsyncpa [#allocation5], 0  ;;  %s6331_s21 = smov [#allocation6]   ;;  %s6332_s23 = smov [#allocation3]  }
   0x4   :  { %s32_s22 = sshll.u32 %s6331_s21, 4  ;;  %s20_s24 = sshll.u32 %s6332_s23, 4  ;;  %s33_s22 = int_to_ptr.vmem [resolvable:$true] %s32_s22  ;;  %s6377_s24 = int_to_ptr.vmem [resolvable:$true] %s20_s24 }
   0x5   :  { %s6213_s27 = scalar_lea.hbm %s6803_s1, 1024 }
   0x6   :  { %p6214_p0 = scmp.ne.s32.totalorder %s6803_s1, %s6213_s27  ;;  %p6217_p1 = scmp.lt.u32.totalorder %s6213_s27, %s6803_s1 }
   0x8   :  { %p6219_p2 = pnand %p6217_p1, %p6214_p0 }
   0xa   :  { %6222 = shalt.err (!%p6219_p2)
}
   0xb   :  { %s6223_s8 = scalar_lea.vmem %s33_s22, 1024  ;;  %p6228_p4 = scmp.lt.s32.totalorder %s33_s22, %s33_s22 }
   0xc   :  { %p6224_p3 = scmp.ne.s32.totalorder %s33_s22, %s6223_s8  ;;  %p6229_p5 = scmp.lt.s32.totalorder %s6223_s8, %s6223_s8 }
   0xe   :  { %p6230_p6 = por %p6229_p5, %p6228_p4 }
  0x10   :  { %p6231_p7 = pnand %p6230_p6, %p6224_p3 }
  0x12   :  { %6234 = shalt.err (!%p6231_p7)
}
  0x13   :  { %s6333_s9 = smov 64   ;;  %s6334_s10 = smov 4  }
  0x14   :  { %38 = dma.hbm_to_vmem [thread:$0]  %s6803_s1, 1024, %s33_s22, [#allocation7], %s6333_s9, %s6333_s9, %s6334_s10  }
  0x15   :  { %s6235_s15 = scalar_lea.hbm %s6802_s0, 2304 }
  0x16   :  { %p6236_p8 = scmp.ne.s32.totalorder %s6802_s0, %s6235_s15  ;;  %p6239_p9 = scmp.lt.u32.totalorder %s6235_s15, %s6802_s0 }
  0x18   :  { %p6241_p10 = pnand %p6239_p9, %p6236_p8 }
  0x1a   :  { %6244 = shalt.err (!%p6241_p10)
}
  0x1b   :  { %s6245_s20 = scalar_lea.vmem %s6377_s24, 2304  ;;  %p6250_p12 = scmp.lt.s32.totalorder %s6377_s24, %s6377_s24 }
  0x1c   :  { %p6246_p11 = scmp.ne.s32.totalorder %s6377_s24, %s6245_s20  ;;  %p6251_p13 = scmp.lt.s32.totalorder %s6245_s20, %s6245_s20 }
  0x1e   :  { %p6252_p0 = por %p6251_p13, %p6250_p12 }
  0x20   :  { %p6253_p1 = pnand %p6252_p0, %p6246_p11 }
  0x22   :  { %6256 = shalt.err (!%p6253_p1)
}
  0x23   :  { %26 = dma.hbm_to_vmem [thread:$0]  %s6802_s0, 2304, %s6377_s24, [#allocation4], %s6333_s9, %s6333_s9, %s6334_s10  }
  0x24   :  { %s6335_s22 = smov [#allocation8]   ;;  %s6257_s27 = scalar_lea.hbm %s6805_s3, 18432 }
  0x25   :  { %s46_s23 = sshll.u32 %s6335_s22, 4  ;;  %p6258_p2 = scmp.ne.s32.totalorder %s6805_s3, %s6257_s27  ;;  %s47_s23 = int_to_ptr.vmem [resolvable:$true] %s46_s23 }
  0x26   :  { %p6261_p3 = scmp.lt.u32.totalorder %s6257_s27, %s6805_s3 }
  0x28   :  { %p6263_p4 = pnand %p6261_p3, %p6258_p2 }
  0x2a   :  { %6266 = shalt.err (!%p6263_p4)
}
  0x2b   :  { %s6267_s8 = scalar_lea.vmem %s47_s23, 18432  ;;  %p6272_p6 = scmp.lt.s32.totalorder %s47_s23, %s47_s23 }
  0x2c   :  { %p6268_p5 = scmp.ne.s32.totalorder %s47_s23, %s6267_s8  ;;  %p6273_p7 = scmp.lt.s32.totalorder %s6267_s8, %s6267_s8 }
  0x2e   :  { %p6274_p8 = por %p6273_p7, %p6272_p6 }
  0x30   :  { %p6275_p9 = pnand %p6274_p8, %p6268_p5 }
  0x32   :  { %6278 = shalt.err (!%p6275_p9)
}
  0x33   :  { %s6336_s0 = smov 128   ;;  %s6337_s24 = smov 8  }
  0x34   :  { %52 = dma.hbm_to_vmem [thread:$0]  %s6805_s3, 18432, %s47_s23, [#allocation7], %s6336_s0, %s6336_s0, %s6337_s24  }
  0x35   :  { %s6338_s11 = smov [#allocation9]   ;;  %s6279_s15 = scalar_lea.hbm %s6807_s5, 4608 }
  0x36   :  { %s60_s12 = sshll.u32 %s6338_s11, 4  ;;  %p6280_p10 = scmp.ne.s32.totalorder %s6807_s5, %s6279_s15  ;;  %s61_s12 = int_to_ptr.vmem [resolvable:$true] %s60_s12 }
  0x37   :  { %p6283_p11 = scmp.lt.u32.totalorder %s6279_s15, %s6807_s5 }
  0x39   :  { %p6285_p12 = pnand %p6283_p11, %p6280_p10 }
  0x3b   :  { %6288 = shalt.err (!%p6285_p12)
}
  0x3c   :  { %s6289_s20 = scalar_lea.vmem %s61_s12, 4608  ;;  %p6294_p0 = scmp.lt.s32.totalorder %s61_s12, %s61_s12 }
  0x3d   :  { %p6290_p13 = scmp.ne.s32.totalorder %s61_s12, %s6289_s20  ;;  %p6295_p1 = scmp.lt.s32.totalorder %s6289_s20, %s6289_s20 }
  0x3f   :  { %p6296_p2 = por %p6295_p1, %p6294_p0 }
  0x41   :  { %p6297_p3 = pnand %p6296_p2, %p6290_p13 }
  0x43   :  { %6300 = shalt.err (!%p6297_p3)
}
  0x44   :  { %66 = dma.hbm_to_vmem [thread:$0]  %s6807_s5, 4608, %s61_s12, [#allocation10], %s6336_s0, %s6336_s0, %s6337_s24  }
  0x45   :  { %6323 = dma.done.wait [#allocation4], 2304  }
  0x46   :  { %6324 = vsyncadd [#allocation4], 4294964992 }
  0x47   :  { %6325 = dma.done.wait [#allocation7], 19456  }
  0x48   :  { %6326 = vsyncadd [#allocation7], 4294947840 }
  0x49   :  { %6327 = dma.done.wait [#allocation10], 4608  }
  0x4a   :  { %6328 = vsyncadd [#allocation10], 4294962688  ;;  %v5863_v0 = vld [vmem:[#allocation6] sm:$0xff]   ;;  %v5864_v1 = vld [vmem:[#allocation6 + $0x8] sm:$0xff]   ;;  %v6339_v39 = vmov 0.0   ;;  %v6340_v43 = vmov 0  }
  0x4b   :  { %5208 = vmatprep.subr.bf16.mxu0 %v5863_v0  ;;  %5260 = vmatprep.subr.bf16.mxu1 %v5863_v0  ;;  %v5865_v2 = vld [vmem:[#allocation6 + $0x10] sm:$0xff]   ;;  %v5866_v3 = vld [vmem:[#allocation6 + $0x18] sm:$0xff]   ;;  %v5867_v6 = vld [vmem:[#allocation6 + $0x20] sm:$0xff]   ;;  %580 = vst [vmem:[#allocation2] sm:$0xff] %v6339_v39 }
  0x4c   :  { %5209 = vmatpush3.bf16.msra.mxu0 %v5863_v0  ;;  %5268 = vmatpush3.bf16.msra.mxu1 %v5863_v0  ;;  %v5871_v4 = vld [vmem:[#allocation3] sm:$0xff]   ;;  %v5868_v7 = vld [vmem:[#allocation6 + $0x28] sm:$0xff]   ;;  %v5870_v9 = vld [vmem:[#allocation6 + $0x38] sm:$0xff]   ;;  %581 = vst [vmem:[#allocation2 + $0x8] sm:$0xff] %v6339_v39 }
  0x4d   :  { %5210 = vmatprep.subr.bf16.mxu0 %v5864_v1  ;;  %5261 = vmatprep.subr.bf16.mxu1 %v5864_v1  ;;  %v5872_v5 = vld [vmem:[#allocation3 + $0x40] sm:$0xff]   ;;  %v5891_v10 = vld [vmem:[#allocation8 + $0x84] ss:$8 sps:$4 sm:$0xff]   ;;  %v5873_v11 = vld [vmem:[#allocation3 + $0x8] sm:$0xff]   ;;  %582 = vst [vmem:[#allocation2 + $0x130] sm:$0xff] %v6339_v39 }
  0x4e   :  { %5224 = vmatprep.mubr.bf16.mxu0 %v5871_v4  ;;  %5240 = vmatprep.mubr.bf16.mxu1 %v5872_v5  ;;  %v5869_v8 = vld [vmem:[#allocation6 + $0x30] sm:$0xff]   ;;  %v5874_v12 = vld [vmem:[#allocation3 + $0x48] sm:$0xff]   ;;  %v5875_v13 = vld [vmem:[#allocation3 + $0x10] sm:$0xff]   ;;  %583 = vst [vmem:[#allocation2 + $0x138] sm:$0xff] %v6339_v39 }
  0x4f   :  { %v5876_v14 = vld [vmem:[#allocation3 + $0x50] sm:$0xff]   ;;  %v5894_v16 = vld [vmem:[#allocation8 + $0x94] ss:$8 sps:$4 sm:$0xff]   ;;  %v5892_v17 = vld [vmem:[#allocation8 + $0x90] ss:$8 sps:$4 sm:$0xff]  }
  0x50   :  { %5211 = vmatpush3.bf16.msra.mxu0 %v5864_v1  ;;  %5269 = vmatpush3.bf16.msra.mxu1 %v5864_v1  ;;  %v5889_v15 = vld [vmem:[#allocation8 + $0x80] ss:$8 sps:$4 sm:$0xff]   ;;  %v5897_v18 = vld [vmem:[#allocation8 + $0xa4] ss:$8 sps:$4 sm:$0xff]   ;;  %v5879_v21 = vld [vmem:[#allocation3 + $0x20] sm:$0xff]  }
  0x51   :  { %5212 = vmatprep.subr.bf16.mxu0 %v5865_v2  ;;  %5262 = vmatprep.subr.bf16.mxu1 %v5865_v2  ;;  %v5877_v19 = vld [vmem:[#allocation3 + $0x18] sm:$0xff]   ;;  %v5880_v22 = vld [vmem:[#allocation3 + $0x60] sm:$0xff]   ;;  %v5881_v27 = vld [vmem:[#allocation3 + $0x28] sm:$0xff]  }
  0x52   :  { %v5878_v20 = vld [vmem:[#allocation3 + $0x58] sm:$0xff]   ;;  %v5900_v24 = vld [vmem:[#allocation8 + $0xb4] ss:$8 sps:$4 sm:$0xff]   ;;  %v5898_v25 = vld [vmem:[#allocation8 + $0xb0] ss:$8 sps:$4 sm:$0xff]  }
  0x53   :  { %v5895_v23 = vld [vmem:[#allocation8 + $0xa0] ss:$8 sps:$4 sm:$0xff]   ;;  %v5903_v26 = vld [vmem:[#allocation8 + $0xc4] ss:$8 sps:$4 sm:$0xff]   ;;  %v5882_v28 = vld [vmem:[#allocation3 + $0x68] sm:$0xff]  }
  0x54   :  { %5213 = vmatpush3.bf16.msra.mxu0 %v5865_v2  ;;  %5270 = vmatpush3.bf16.msra.mxu1 %v5865_v2  ;;  %v5883_v29 = vld [vmem:[#allocation3 + $0x30] sm:$0xff]   ;;  %v5885_v32 = vld [vmem:[#allocation3 + $0x38] sm:$0xff]   ;;  %v5887_v34 = vld [vmem:[#allocation3 + $0x80] sm:$0xff]  }
  0x55   :  { %5214 = vmatprep.subr.bf16.mxu0 %v5866_v3  ;;  %5263 = vmatprep.subr.bf16.mxu1 %v5866_v3  ;;  %v5884_v30 = vld [vmem:[#allocation3 + $0x70] sm:$0xff]   ;;  %v5886_v33 = vld [vmem:[#allocation3 + $0x78] sm:$0xff]   ;;  %v5888_v35 = vld [vmem:[#allocation3 + $0x88] sm:$0xff]  }
  0x56   :  { %v5901_v31 = vld [vmem:[#allocation8 + $0xc0] ss:$8 sps:$4 sm:$0xff]   ;;  %v5906_v36 = vld [vmem:[#allocation8 + $0xd4] ss:$8 sps:$4 sm:$0xff]   ;;  %v5904_v37 = vld [vmem:[#allocation8 + $0xd0] ss:$8 sps:$4 sm:$0xff]  }
  0x57   :  { %v5909_v38 = vld [vmem:[#allocation8 + $0xe4] ss:$8 sps:$4 sm:$0xff]   ;;  %v5907_v40 = vld [vmem:[#allocation8 + $0xe0] ss:$8 sps:$4 sm:$0xff]   ;;  %v5912_v41 = vld [vmem:[#allocation8 + $0xf4] ss:$8 sps:$4 sm:$0xff]  }
  0x58   :  { %5215 = vmatpush3.bf16.msra.mxu0 %v5866_v3  ;;  %5271 = vmatpush3.bf16.msra.mxu1 %v5866_v3  ;;  %v5910_v42 = vld [vmem:[#allocation8 + $0xf0] ss:$8 sps:$4 sm:$0xff]   ;;  %v5915_v44 = vld [vmem:[#allocation8 + $0x4] ss:$8 sps:$4 sm:$0xff]  }
  0x59   :  { %5216 = vmatprep.subr.bf16.mxu0 %v5867_v6  ;;  %5264 = vmatprep.subr.bf16.mxu1 %v5867_v6  ;;  %v6443_v45 = vld [vmem:[%s6804_s2] ss:$0 sm:$0xff]  ;;  %v508_v60 = vld [vmem:[#allocation9] sm:$0xff]  ;;  %v511_v4 = vld [vmem:[#allocation9 + $0x18] sm:$0xff] }
  0x5a   :  { %v510_v52 = vld [vmem:[#allocation9 + $0x10] sm:$0xff]  ;;  %v524_v61 = vld [vmem:[#allocation9 + $0x80] sm:$0xff]  ;;  %v527_v5 = vld [vmem:[#allocation9 + $0x98] sm:$0xff] }
  0x5b   :  { %v526_v53 = vld [vmem:[#allocation9 + $0x90] sm:$0xff] }
  0x5c   :  { %5217 = vmatpush3.bf16.msra.mxu0 %v5867_v6  ;;  %5272 = vmatpush3.bf16.msra.mxu1 %v5867_v6 }
  0x5d   :  { %5218 = vmatprep.subr.bf16.mxu0 %v5868_v7  ;;  %5265 = vmatprep.subr.bf16.mxu1 %v5868_v7 }
  0x60   :  { %5219 = vmatpush3.bf16.msra.mxu0 %v5868_v7  ;;  %5273 = vmatpush3.bf16.msra.mxu1 %v5868_v7 }
  0x61   :  { %5220 = vmatprep.subr.bf16.mxu0 %v5869_v8  ;;  %5266 = vmatprep.subr.bf16.mxu1 %v5869_v8 }
  0x64   :  { %5221 = vmatpush3.bf16.msra.mxu0 %v5869_v8  ;;  %5274 = vmatpush3.bf16.msra.mxu1 %v5869_v8 }
  0x65   :  { %5222 = vmatprep.subr.bf16.mxu0 %v5870_v9  ;;  %5267 = vmatprep.subr.bf16.mxu1 %v5870_v9 }
  0x68   :  { %5223 = vmatpush3.bf16.msra.mxu0 %v5870_v9  ;;  %5275 = vmatpush3.bf16.msra.mxu1 %v5870_v9 }
  0x69   :  { %787 = vmatprep.subr.bf16.mxu1 %v5891_v10  ;;  %3173 = vmatprep.subr.bf16.mxu0 %v5891_v10 }
  0x6b   :  { %5225 = vmatmul.mubr.bf16.vlgmr.msra.gmra.mrb[0].mxu0 %v5873_v11  ;;  %5241 = vmatmul.mubr.bf16.vlgmr.msra.gmra.mrb[0].mxu1 %v5874_v12  ;;  %v509_v12 = vld [vmem:[#allocation9 + $0x8] sm:$0xff] }
  0x6c   :  { %5228 = vmatprep.mubr.bf16.mxu0 %v5875_v13  ;;  %5244 = vmatprep.mubr.bf16.mxu1 %v5876_v14  ;;  %v525_v13 = vld [vmem:[#allocation9 + $0x88] sm:$0xff] }
  0x6d   :  { %788 = vmatpush1.bf16.msra.mxu1 %v5889_v15  ;;  %3174 = vmatpush1.bf16.msra.mxu0 %v5889_v15 }
  0x6e   :  { %789 = vmatprep.subr.bf16.mxu1 %v5894_v16  ;;  %3175 = vmatprep.subr.bf16.mxu0 %v5894_v16 }
  0x71   :  { %790 = vmatpush1.bf16.msra.mxu1 %v5892_v17  ;;  %3176 = vmatpush1.bf16.msra.mxu0 %v5892_v17 }
  0x72   :  { %791 = vmatprep.subr.bf16.mxu1 %v5897_v18  ;;  %3177 = vmatprep.subr.bf16.mxu0 %v5897_v18 }
  0x73   :  { %5229 = vmatmul.mubr.bf16.gmra.mrb[4].mxu0 %v5877_v19  ;;  %5245 = vmatmul.mubr.bf16.gmra.mrb[4].mxu1 %v5878_v20 }
  0x74   :  { %5232 = vmatprep.mubr.bf16.mxu0 %v5879_v21  ;;  %5248 = vmatprep.mubr.bf16.mxu1 %v5880_v22 }
  0x75   :  { %792 = vmatpush1.bf16.msra.mxu1 %v5895_v23  ;;  %3178 = vmatpush1.bf16.msra.mxu0 %v5895_v23 }
  0x76   :  { %793 = vmatprep.subr.bf16.mxu1 %v5900_v24  ;;  %3179 = vmatprep.subr.bf16.mxu0 %v5900_v24 }
  0x79   :  { %794 = vmatpush1.bf16.msra.mxu1 %v5898_v25  ;;  %3180 = vmatpush1.bf16.msra.mxu0 %v5898_v25 }
  0x7a   :  { %795 = vmatprep.subr.bf16.mxu1 %v5903_v26  ;;  %3181 = vmatprep.subr.bf16.mxu0 %v5903_v26 }
  0x7b   :  { %5233 = vmatmul.mubr.bf16.gmra.mrb[8].mxu0 %v5881_v27  ;;  %5249 = vmatmul.mubr.bf16.gmra.mrb[8].mxu1 %v5882_v28  ;;  %v514_v28 = vld [vmem:[#allocation9 + $0x30] sm:$0xff] }
  0x7c   :  { %5236 = vmatprep.mubr.bf16.mxu0 %v5883_v29  ;;  %5252 = vmatprep.mubr.bf16.mxu1 %v5884_v30  ;;  %v530_v29 = vld [vmem:[#allocation9 + $0xb0] sm:$0xff] }
  0x7d   :  { %796 = vmatpush1.bf16.msra.mxu1 %v5901_v31  ;;  %3182 = vmatpush1.bf16.msra.mxu0 %v5901_v31 }
  0x7e   :  { %797 = vmatprep.subr.bf16.mxu1 %v5906_v36  ;;  %3183 = vmatprep.subr.bf16.mxu0 %v5906_v36  ;;  %v512_v36 = vld [vmem:[#allocation9 + $0x20] sm:$0xff] }
  0x81   :  { %798 = vmatpush1.bf16.msra.mxu1 %v5904_v37  ;;  %3184 = vmatpush1.bf16.msra.mxu0 %v5904_v37  ;;  %v528_v37 = vld [vmem:[#allocation9 + $0xa0] sm:$0xff] }
  0x82   :  { %799 = vmatprep.subr.bf16.mxu1 %v5909_v38  ;;  %3185 = vmatprep.subr.bf16.mxu0 %v5909_v38 }
  0x83   :  { %5237 = vmatmul.mubr.bf16.gmra.mrb[12].mxu0 %v5885_v32  ;;  %5253 = vmatmul.mubr.bf16.gmra.mrb[12].mxu1 %v5886_v33 }
  0x84   :  { %5256 = vmatprep.mubr.bf16.mxu1 %v5887_v34  ;;  %3205 = vmatprep.mubr.bf16.mxu0 %v6340_v43 }
  0x85   :  { %800 = vmatpush1.bf16.msra.mxu1 %v5907_v40  ;;  %3186 = vmatpush1.bf16.msra.mxu0 %v5907_v40 }
  0x86   :  { %801 = vmatprep.subr.bf16.mxu1 %v5912_v41  ;;  %3187 = vmatprep.subr.bf16.mxu0 %v5912_v41 }
  0x89   :  { %802 = vmatpush1.bf16.msra.mxu1 %v5910_v42  ;;  %3188 = vmatpush1.bf16.msra.mxu0 %v5910_v42 }
  0x8a   :  { %990 = vmatprep.subr.bf16.mxu1 %v5915_v44  ;;  %3296 = vmatprep.subr.bf16.mxu0 %v5915_v44 }
  0x8b   :  { %5257 = vmatmul.mubr.bf16.gmra.mrb[16].mxu1 %v5888_v35 }
  0x8c   :  { %819 = vmatprep.mubr.bf16.mxu1 %v6340_v43 }
 0x13e   :  { %v5226_v46 = vpop.f32.mrb[0].mxu0  ;;  %v5242_v47 = vpop.f32.mrb[0].mxu1 }
 0x13f   :  { %v338_v48 = vadd.f32 %v5226_v46, %v6443_v45  ;;  %v402_v49 = vadd.f32 %v5242_v47, %v6443_v45  ;;  %v329_v50 = vpop.f32.mrb[1].mxu0  ;;  %v393_v51 = vpop.f32.mrb[1].mxu1  ;;  %v515_v46 = vld [vmem:[#allocation9 + $0x38] sm:$0xff] }
 0x140   :  { %v330_v54 = vadd.f32 %v6443_v45, %v329_v50  ;;  %v394_v55 = vadd.f32 %v6443_v45, %v393_v51  ;;  %v5227_v56 = vpop.f32.mrb[2].mxu0  ;;  %v5243_v57 = vpop.f32.mrb[2].mxu1  ;;  %v531_v47 = vld [vmem:[#allocation9 + $0xb8] sm:$0xff] }
 0x141   :  { %v474_v58 = vmax.f32 %v338_v48, 0.0  ;;  %v490_v59 = vmax.f32 %v402_v49, 0.0  ;;  %v341_v62 = vadd.f32 %v5227_v56, %v6443_v45  ;;  %v405_v63 = vadd.f32 %v5243_v57, %v6443_v45  ;;  %v332_v0 = vpop.f32.mrb[3].mxu0  ;;  %v396_v1 = vpop.f32.mrb[3].mxu1  ;;  %v663_v56 = vld [vmem:[#allocation2 + $0x4] sm:$0xff] }
 0x142   :  { %v472_v2 = vmax.f32 %v330_v54, 0.0  ;;  %v488_v3 = vmax.f32 %v394_v55, 0.0  ;;  %v333_v6 = vadd.f32 %v6443_v45, %v332_v0  ;;  %v397_v7 = vadd.f32 %v6443_v45, %v396_v1  ;;  %v513_v54 = vld [vmem:[#allocation9 + $0x28] sm:$0xff] }
 0x143   :  { %v546_v8 = vmul.f32 %v510_v52, %v474_v58  ;;  %v562_v9 = vmul.f32 %v526_v53, %v490_v59  ;;  %v475_v10 = vmax.f32 %v341_v62, 0.0  ;;  %v491_v11 = vmax.f32 %v405_v63, 0.0  ;;  %v529_v55 = vld [vmem:[#allocation9 + $0xa8] sm:$0xff] }
 0x144   :  { %v544_v14 = vmul.f32 %v508_v60, %v472_v2  ;;  %v560_v15 = vmul.f32 %v524_v61, %v488_v3  ;;  %v473_v16 = vmax.f32 %v333_v6, 0.0  ;;  %v489_v17 = vmax.f32 %v397_v7, 0.0  ;;  %v5913_v0 = vld [vmem:[#allocation8] ss:$8 sps:$4 sm:$0xff]   ;;  %v5918_v6 = vld [vmem:[#allocation8 + $0x14] ss:$8 sps:$4 sm:$0xff]  }
 0x145   :  { %586 = vst [vmem:[#allocation2 + $0x20] sm:$0xff] %v546_v8  ;;  %602 = vst [vmem:[#allocation2 + $0xa0] sm:$0xff] %v562_v9  ;;  %v547_v18 = vmul.f32 %v511_v4, %v475_v10  ;;  %v563_v19 = vmul.f32 %v527_v5, %v491_v11  ;;  %v518_v8 = vld [vmem:[#allocation9 + $0x50] sm:$0xff] }
 0x146   :  { %584 = vst [vmem:[#allocation2 + $0x10] sm:$0xff] %v544_v14  ;;  %600 = vst [vmem:[#allocation2 + $0x90] sm:$0xff] %v560_v15  ;;  %v545_v20 = vmul.f32 %v509_v12, %v473_v16  ;;  %v561_v21 = vmul.f32 %v525_v13, %v489_v17  ;;  %v5230_v22 = vpop.f32.mrb[4].mxu0  ;;  %v5246_v23 = vpop.f32.mrb[4].mxu1  ;;  %v534_v14 = vld [vmem:[#allocation9 + $0xd0] sm:$0xff]  ;;  %v516_v16 = vld [vmem:[#allocation9 + $0x40] sm:$0xff] }
 0x147   :  { %587 = vst [vmem:[#allocation2 + $0x28] sm:$0xff] %v547_v18  ;;  %603 = vst [vmem:[#allocation2 + $0xa8] sm:$0xff] %v563_v19  ;;  %v354_v24 = vadd.f32 %v5230_v22, %v6443_v45  ;;  %v418_v25 = vadd.f32 %v5246_v23, %v6443_v45  ;;  %v345_v26 = vpop.f32.mrb[5].mxu0  ;;  %v409_v27 = vpop.f32.mrb[5].mxu1  ;;  %v532_v18 = vld [vmem:[#allocation9 + $0xc0] sm:$0xff] }
 0x148   :  { %585 = vst [vmem:[#allocation2 + $0x18] sm:$0xff] %v545_v20  ;;  %601 = vst [vmem:[#allocation2 + $0x98] sm:$0xff] %v561_v21  ;;  %v346_v30 = vadd.f32 %v6443_v45, %v345_v26  ;;  %v410_v31 = vadd.f32 %v6443_v45, %v409_v27  ;;  %v5231_v32 = vpop.f32.mrb[6].mxu0  ;;  %v5247_v33 = vpop.f32.mrb[6].mxu1  ;;  %v517_v27 = vld [vmem:[#allocation9 + $0x48] sm:$0xff] }
 0x149   :  { %v478_v34 = vmax.f32 %v354_v24, 0.0  ;;  %v494_v35 = vmax.f32 %v418_v25, 0.0  ;;  %v357_v38 = vadd.f32 %v5231_v32, %v6443_v45  ;;  %v421_v39 = vadd.f32 %v5247_v33, %v6443_v45  ;;  %v348_v40 = vpop.f32.mrb[7].mxu0  ;;  %v412_v41 = vpop.f32.mrb[7].mxu1  ;;  %v519_v32 = vld [vmem:[#allocation9 + $0x58] sm:$0xff] }
 0x14a   :  { %v476_v42 = vmax.f32 %v346_v30, 0.0  ;;  %v492_v44 = vmax.f32 %v410_v31, 0.0  ;;  %v349_v48 = vadd.f32 %v6443_v45, %v348_v40  ;;  %v413_v49 = vadd.f32 %v6443_v45, %v412_v41  ;;  %v535_v33 = vld [vmem:[#allocation9 + $0xd8] sm:$0xff]  ;;  %v533_v41 = vld [vmem:[#allocation9 + $0xc8] sm:$0xff] }
 0x14b   :  { %v550_v50 = vmul.f32 %v514_v28, %v478_v34  ;;  %v566_v51 = vmul.f32 %v530_v29, %v494_v35  ;;  %v479_v52 = vmax.f32 %v357_v38, 0.0  ;;  %v495_v53 = vmax.f32 %v421_v39, 0.0  ;;  %v5916_v29 = vld [vmem:[#allocation8 + $0x10] ss:$8 sps:$4 sm:$0xff]  }
 0x14c   :  { %v548_v57 = vmul.f32 %v512_v36, %v476_v42  ;;  %v564_v58 = vmul.f32 %v528_v37, %v492_v44  ;;  %v477_v59 = vmax.f32 %v349_v48, 0.0  ;;  %v493_v60 = vmax.f32 %v413_v49, 0.0  ;;  %v5921_v36 = vld [vmem:[#allocation8 + $0x24] ss:$8 sps:$4 sm:$0xff]  }
 0x14d   :  { %590 = vst [vmem:[#allocation2 + $0x40] sm:$0xff] %v550_v50  ;;  %606 = vst [vmem:[#allocation2 + $0xc0] sm:$0xff] %v566_v51  ;;  %v551_v61 = vmul.f32 %v515_v46, %v479_v52  ;;  %v567_v62 = vmul.f32 %v531_v47, %v495_v53  ;;  %v664_v63 = vld [vmem:[#allocation2 + $0xc] sm:$0xff] }
 0x14e   :  { %588 = vst [vmem:[#allocation2 + $0x30] sm:$0xff] %v548_v57  ;;  %604 = vst [vmem:[#allocation2 + $0xb0] sm:$0xff] %v564_v58  ;;  %v549_v1 = vmul.f32 %v513_v54, %v477_v59  ;;  %v565_v2 = vmul.f32 %v529_v55, %v493_v60  ;;  %v5234_v3 = vpop.f32.mrb[8].mxu0  ;;  %v5250_v4 = vpop.f32.mrb[8].mxu1  ;;  %v681_v5 = vpack.c.bf16 %v664_v63, %v663_v56  ;;  %v5919_v53 = vld [vmem:[#allocation8 + $0x20] ss:$8 sps:$4 sm:$0xff]  }
 0x14f   :  { %591 = vst [vmem:[#allocation2 + $0x48] sm:$0xff] %v551_v61  ;;  %607 = vst [vmem:[#allocation2 + $0xc8] sm:$0xff] %v567_v62  ;;  %v370_v7 = vadd.f32 %v5234_v3, %v6443_v45  ;;  %v434_v9 = vadd.f32 %v5250_v4, %v6443_v45  ;;  %v361_v10 = vpop.f32.mrb[9].mxu0  ;;  %v425_v11 = vpop.f32.mrb[9].mxu1  ;;  %v3146_v12 = vld [vmem:[#allocation2 + $0x94] sm:$0xff]  ;;  %v3147_v13 = vld [vmem:[#allocation2 + $0x9c] sm:$0xff] }
 0x150   :  { %589 = vst [vmem:[#allocation2 + $0x38] sm:$0xff] %v549_v1  ;;  %605 = vst [vmem:[#allocation2 + $0xb8] sm:$0xff] %v565_v2  ;;  %v362_v15 = vadd.f32 %v6443_v45, %v361_v10  ;;  %v426_v17 = vadd.f32 %v6443_v45, %v425_v11  ;;  %v5235_v19 = vpop.f32.mrb[10].mxu0  ;;  %v5251_v20 = vpop.f32.mrb[10].mxu1  ;;  %820 = vmatmul.mubr.bf16.vlgmr.msra.gmra.mrb[20].mxu1 %v681_v5  ;;  %v3164_v21 = vpack.c.bf16 %v3147_v13, %v3146_v12  ;;  %v665_v42 = vld [vmem:[#allocation2 + $0x14] sm:$0xff]  ;;  %v666_v44 = vld [vmem:[#allocation2 + $0x1c] sm:$0xff] }
 0x151   :  { %v482_v22 = vmax.f32 %v370_v7, 0.0  ;;  %v498_v23 = vmax.f32 %v434_v9, 0.0  ;;  %v373_v24 = vadd.f32 %v5235_v19, %v6443_v45  ;;  %v437_v25 = vadd.f32 %v5251_v20, %v6443_v45  ;;  %v364_v26 = vpop.f32.mrb[11].mxu0  ;;  %v428_v28 = vpop.f32.mrb[11].mxu1  ;;  %991 = vmatpush1.bf16.msra.mxu1 %v5913_v0  ;;  %829 = vmatprep.mubr.bf16.mxu1 %v6340_v43  ;;  %v5924_v59 = vld [vmem:[#allocation8 + $0x34] ss:$8 sps:$4 sm:$0xff]  }
 0x152   :  { %v480_v30 = vmax.f32 %v362_v15, 0.0  ;;  %v496_v31 = vmax.f32 %v426_v17, 0.0  ;;  %v365_v34 = vadd.f32 %v6443_v45, %v364_v26  ;;  %v429_v35 = vadd.f32 %v6443_v45, %v428_v28  ;;  %3206 = vmatmul.mubr.bf16.vlgmr.msra.gmra.mrb[16].mxu0 %v3164_v21  ;;  %992 = vmatprep.subr.bf16.mxu1 %v5918_v6  ;;  %v522_v61 = vld [vmem:[#allocation9 + $0x70] sm:$0xff]  ;;  %v520_v4 = vld [vmem:[#allocation9 + $0x60] sm:$0xff]  ;;  %v523_v19 = vld [vmem:[#allocation9 + $0x78] sm:$0xff] }
 0x153   :  { %v554_v37 = vmul.f32 %v518_v8, %v482_v22  ;;  %v570_v38 = vmul.f32 %v534_v14, %v498_v23  ;;  %v483_v39 = vmax.f32 %v373_v24, 0.0  ;;  %v499_v40 = vmax.f32 %v437_v25, 0.0  ;;  %3297 = vmatpush1.bf16.msra.mxu0 %v5913_v0  ;;  %3215 = vmatprep.mubr.bf16.mxu0 %v6340_v43  ;;  %v3148_v1 = vld [vmem:[#allocation2 + $0xa4] sm:$0xff]  ;;  %v5927_v23 = vld [vmem:[#allocation8 + $0x44] ss:$8 sps:$4 sm:$0xff]  }
 0x154   :  { %v552_v46 = vmul.f32 %v516_v16, %v480_v30  ;;  %v568_v47 = vmul.f32 %v532_v18, %v496_v31  ;;  %v481_v48 = vmax.f32 %v365_v34, 0.0  ;;  %v497_v49 = vmax.f32 %v429_v35, 0.0  ;;  %3298 = vmatprep.subr.bf16.mxu0 %v5918_v6  ;;  %v538_v2 = vld [vmem:[#allocation9 + $0xf0] sm:$0xff]  ;;  %v536_v6 = vld [vmem:[#allocation9 + $0xe0] sm:$0xff]  ;;  %v539_v20 = vld [vmem:[#allocation9 + $0xf8] sm:$0xff] }
 0x155   :  { %594 = vst [vmem:[#allocation2 + $0x60] sm:$0xff] %v554_v37  ;;  %610 = vst [vmem:[#allocation2 + $0xe0] sm:$0xff] %v570_v38  ;;  %v555_v50 = vmul.f32 %v519_v32, %v483_v39  ;;  %v571_v51 = vmul.f32 %v535_v33, %v499_v40  ;;  %v3149_v52 = vld [vmem:[#allocation2 + $0xac] sm:$0xff]  ;;  %993 = vmatpush1.bf16.msra.mxu1 %v5916_v29  ;;  %v682_v58 = vpack.c.bf16 %v666_v44, %v665_v42  ;;  %v5922_v16 = vld [vmem:[#allocation8 + $0x30] ss:$8 sps:$4 sm:$0xff]  }
 0x156   :  { %592 = vst [vmem:[#allocation2 + $0x50] sm:$0xff] %v552_v46  ;;  %608 = vst [vmem:[#allocation2 + $0xd0] sm:$0xff] %v568_v47  ;;  %v553_v54 = vmul.f32 %v517_v27, %v481_v48  ;;  %v569_v55 = vmul.f32 %v533_v41, %v497_v49  ;;  %v5238_v56 = vpop.f32.mrb[12].mxu0  ;;  %v5254_v57 = vpop.f32.mrb[12].mxu1  ;;  %994 = vmatprep.subr.bf16.mxu1 %v5921_v36  ;;  %v3165_v9 = vpack.c.bf16 %v3149_v52, %v3148_v1  ;;  %v537_v28 = vld [vmem:[#allocation9 + $0xe8] sm:$0xff]  ;;  %v668_v30 = vld [vmem:[#allocation2 + $0x2c] sm:$0xff] }
 0x157   :  { %595 = vst [vmem:[#allocation2 + $0x68] sm:$0xff] %v555_v50  ;;  %611 = vst [vmem:[#allocation2 + $0xe8] sm:$0xff] %v571_v51  ;;  %v386_v60 = vadd.f32 %v5238_v56, %v6443_v45  ;;  %v450_v62 = vadd.f32 %v5254_v57, %v6443_v45  ;;  %v377_v63 = vpop.f32.mrb[13].mxu0  ;;  %v441_v0 = vpop.f32.mrb[13].mxu1  ;;  %3299 = vmatpush1.bf16.msra.mxu0 %v5916_v29  ;;  %v521_v29 = vld [vmem:[#allocation9 + $0x68] sm:$0xff]  ;;  %v667_v38 = vld [vmem:[#allocation2 + $0x24] sm:$0xff] }
 0x158   :  { %593 = vst [vmem:[#allocation2 + $0x58] sm:$0xff] %v553_v54  ;;  %609 = vst [vmem:[#allocation2 + $0xd8] sm:$0xff] %v569_v55  ;;  %v378_v3 = vadd.f32 %v6443_v45, %v377_v63  ;;  %v442_v5 = vadd.f32 %v6443_v45, %v441_v0  ;;  %v5239_v7 = vpop.f32.mrb[14].mxu0  ;;  %v5255_v8 = vpop.f32.mrb[14].mxu1  ;;  %830 = vmatmul.mubr.bf16.gmra.mrb[24].mxu1 %v682_v58  ;;  %3300 = vmatprep.subr.bf16.mxu0 %v5921_v36  ;;  %v5925_v35 = vld [vmem:[#allocation8 + $0x40] ss:$8 sps:$4 sm:$0xff]  }
 0x159   :  { %v486_v10 = vmax.f32 %v386_v60, 0.0  ;;  %v502_v11 = vmax.f32 %v450_v62, 0.0  ;;  %v389_v12 = vadd.f32 %v5239_v7, %v6443_v45  ;;  %v453_v13 = vadd.f32 %v5255_v8, %v6443_v45  ;;  %v444_v14 = vpop.f32.mrb[15].mxu1  ;;  %839 = vmatprep.mubr.bf16.mxu1 %v6340_v43  ;;  %v380_v15 = vpop.f32.mrb[15].mxu0  ;;  %995 = vmatpush1.bf16.msra.mxu1 %v5919_v53  ;;  %v3150_v39 = vld [vmem:[#allocation2 + $0xb4] sm:$0xff]  ;;  %v3151_v40 = vld [vmem:[#allocation2 + $0xbc] sm:$0xff] }
 0x15a   :  { %v484_v17 = vmax.f32 %v378_v3, 0.0  ;;  %v500_v18 = vmax.f32 %v442_v5, 0.0  ;;  %v445_v21 = vadd.f32 %v6443_v45, %v444_v14  ;;  %3216 = vmatmul.mubr.bf16.gmra.mrb[20].mxu0 %v3165_v9  ;;  %v381_v22 = vadd.f32 %v6443_v45, %v380_v15  ;;  %996 = vmatprep.subr.bf16.mxu1 %v5924_v59  ;;  %v5930_v47 = vld [vmem:[#allocation8 + $0x54] ss:$8 sps:$4 sm:$0xff]   ;;  %v540_v55 = vld [vmem:[#allocation9 + $0x100] sm:$0xff]  ;;  %v541_v1 = vld [vmem:[#allocation9 + $0x108] sm:$0xff] }
 0x15b   :  { %v558_v24 = vmul.f32 %v522_v61, %v486_v10  ;;  %v574_v25 = vmul.f32 %v538_v2, %v502_v11  ;;  %v487_v26 = vmax.f32 %v389_v12, 0.0  ;;  %v503_v27 = vmax.f32 %v453_v13, 0.0  ;;  %3225 = vmatprep.mubr.bf16.mxu0 %v6340_v43  ;;  %3301 = vmatpush1.bf16.msra.mxu0 %v5919_v53  ;;  %v542_v51 = vld [vmem:[#allocation9 + $0x110] sm:$0xff]  ;;  %v543_v60 = vld [vmem:[#allocation9 + $0x118] sm:$0xff]  ;;  %v5933_v62 = vld [vmem:[#allocation8 + $0x64] ss:$8 sps:$4 sm:$0xff]  }
 0x15c   :  { %v556_v31 = vmul.f32 %v520_v4, %v484_v17  ;;  %v572_v32 = vmul.f32 %v536_v6, %v500_v18  ;;  %v501_v33 = vmax.f32 %v445_v21, 0.0  ;;  %v485_v34 = vmax.f32 %v381_v22, 0.0  ;;  %3302 = vmatprep.subr.bf16.mxu0 %v5924_v59  ;;  %v5928_v58 = vld [vmem:[#allocation8 + $0x50] ss:$8 sps:$4 sm:$0xff]   ;;  %v669_v2 = vld [vmem:[#allocation2 + $0x34] sm:$0xff] }
 0x15d   :  { %598 = vst [vmem:[#allocation2 + $0x80] sm:$0xff] %v558_v24  ;;  %614 = vst [vmem:[#allocation2 + $0x100] sm:$0xff] %v574_v25  ;;  %v559_v36 = vmul.f32 %v523_v19, %v487_v26  ;;  %v575_v37 = vmul.f32 %v539_v20, %v503_v27  ;;  %997 = vmatpush1.bf16.msra.mxu1 %v5922_v16  ;;  %v683_v44 = vpack.c.bf16 %v668_v30, %v667_v38  ;;  %v670_v3 = vld [vmem:[#allocation2 + $0x3c] sm:$0xff]  ;;  %v3153_v7 = vld [vmem:[#allocation2 + $0xcc] sm:$0xff] }
 0x15e   :  { %596 = vst [vmem:[#allocation2 + $0x70] sm:$0xff] %v556_v31  ;;  %612 = vst [vmem:[#allocation2 + $0xf0] sm:$0xff] %v572_v32  ;;  %v573_v41 = vmul.f32 %v537_v28, %v501_v33  ;;  %v557_v42 = vmul.f32 %v521_v29, %v485_v34  ;;  %v5258_v46 = vpop.f32.mrb[16].mxu1  ;;  %998 = vmatprep.subr.bf16.mxu1 %v5927_v23  ;;  %v3166_v50 = vpack.c.bf16 %v3151_v40, %v3150_v39  ;;  %v5931_v8 = vld [vmem:[#allocation8 + $0x60] ss:$8 sps:$4 sm:$0xff]   ;;  %v3152_v11 = vld [vmem:[#allocation2 + $0xc4] sm:$0xff] }
 0x15f   :  { %599 = vst [vmem:[#allocation2 + $0x88] sm:$0xff] %v559_v36  ;;  %615 = vst [vmem:[#allocation2 + $0x108] sm:$0xff] %v575_v37  ;;  %v466_v48 = vadd.f32 %v5258_v46, %v6443_v45  ;;  %v457_v49 = vpop.f32.mrb[17].mxu1  ;;  %3303 = vmatpush1.bf16.msra.mxu0 %v5922_v16  ;;  %v684_v9 = vpack.c.bf16 %v670_v3, %v669_v2  ;;  %v5936_v10 = vld [vmem:[#allocation8 + $0x74] ss:$8 sps:$4 sm:$0xff]   ;;  %v3167_v12 = vpack.c.bf16 %v3153_v7, %v3152_v11  ;;  %v3154_v17 = vld [vmem:[#allocation2 + $0xd4] sm:$0xff] }
 0x160   :  { %613 = vst [vmem:[#allocation2 + $0xf8] sm:$0xff] %v573_v41  ;;  %597 = vst [vmem:[#allocation2 + $0x78] sm:$0xff] %v557_v42  ;;  %840 = vmatmul.mubr.bf16.gmra.mrb[28].mxu1 %v683_v44  ;;  %v458_v52 = vadd.f32 %v6443_v45, %v457_v49  ;;  %v5259_v53 = vpop.f32.mrb[18].mxu1  ;;  %3304 = vmatprep.subr.bf16.mxu0 %v5927_v23  ;;  %v5934_v13 = vld [vmem:[#allocation8 + $0x70] ss:$8 sps:$4 sm:$0xff]   ;;  %v672_v16 = vld [vmem:[#allocation2 + $0x4c] sm:$0xff] }
 0x161   :  { %v506_v54 = vmax.f32 %v466_v48, 0.0  ;;  %v469_v56 = vadd.f32 %v5259_v53, %v6443_v45  ;;  %849 = vmatprep.mubr.bf16.mxu1 %v6340_v43  ;;  %v460_v57 = vpop.f32.mrb[19].mxu1  ;;  %999 = vmatpush1.bf16.msra.mxu1 %v5925_v35  ;;  %v5939_v14 = vld [vmem:[#allocation8 + $0x104] ss:$8 sps:$4 sm:$0xff]   ;;  %v671_v15 = vld [vmem:[#allocation2 + $0x44] sm:$0xff] }
 0x162   :  { %3226 = vmatmul.mubr.bf16.gmra.mrb[24].mxu0 %v3166_v50  ;;  %v504_v59 = vmax.f32 %v458_v52, 0.0  ;;  %v461_v61 = vadd.f32 %v6443_v45, %v460_v57  ;;  %1000 = vmatprep.subr.bf16.mxu1 %v5930_v47  ;;  %v3155_v18 = vld [vmem:[#allocation2 + $0xdc] sm:$0xff]  ;;  %v685_v19 = vpack.c.bf16 %v672_v16, %v671_v15  ;;  %v673_v21 = vld [vmem:[#allocation2 + $0x54] sm:$0xff]  ;;  %v3156_v23 = vld [vmem:[#allocation2 + $0xe4] sm:$0xff] }
 0x163   :  { %v578_v63 = vmul.f32 %v542_v51, %v506_v54  ;;  %v507_v0 = vmax.f32 %v469_v56, 0.0  ;;  %3235 = vmatprep.mubr.bf16.mxu0 %v6340_v43  ;;  %3305 = vmatpush1.bf16.msra.mxu0 %v5925_v35  ;;  %v3168_v20 = vpack.c.bf16 %v3155_v18, %v3154_v17  ;;  %v674_v22 = vld [vmem:[#allocation2 + $0x5c] sm:$0xff]  ;;  %v675_v27 = vld [vmem:[#allocation2 + $0x64] sm:$0xff]  ;;  %v5937_v49 = vld [vmem:[#allocation8 + $0x100] ss:$8 sps:$4 sm:$0xff]  }
 0x164   :  { %v576_v4 = vmul.f32 %v540_v55, %v504_v59  ;;  %v505_v5 = vmax.f32 %v461_v61, 0.0  ;;  %3306 = vmatprep.subr.bf16.mxu0 %v5930_v47  ;;  %v686_v25 = vpack.c.bf16 %v674_v22, %v673_v21  ;;  %v620_v47 = vld [vmem:[#allocation2 + $0x3] sm:$0xff]  ;;  %v621_v48 = vld [vmem:[#allocation2 + $0xb] sm:$0xff]  ;;  %v3119_v50 = vld [vmem:[#allocation2 + $0x93] sm:$0xff] }
 0x165   :  { %618 = vst [vmem:[#allocation2 + $0x120] sm:$0xff] %v578_v63  ;;  %v579_v6 = vmul.f32 %v543_v60, %v507_v0  ;;  %1001 = vmatpush1.bf16.msra.mxu1 %v5928_v58  ;;  %v3157_v24 = vld [vmem:[#allocation2 + $0xec] sm:$0xff]  ;;  %v3120_v51 = vld [vmem:[#allocation2 + $0x9b] sm:$0xff]  ;;  %v638_v52 = vpack.c.bf16 %v621_v48, %v620_v47  ;;  %v3121_v63 = vld [vmem:[#allocation2 + $0xa3] sm:$0xff] }
 0x166   :  { %616 = vst [vmem:[#allocation2 + $0x110] sm:$0xff] %v576_v4  ;;  %v577_v45 = vmul.f32 %v541_v1, %v505_v5  ;;  %1002 = vmatprep.subr.bf16.mxu1 %v5933_v62  ;;  %v3169_v26 = vpack.c.bf16 %v3157_v24, %v3156_v23  ;;  %v676_v28 = vld [vmem:[#allocation2 + $0x6c] sm:$0xff]  ;;  %v3160_v35 = vld [vmem:[#allocation2 + $0x104] sm:$0xff]  ;;  %v3137_v54 = vpack.c.bf16 %v3120_v51, %v3119_v50  ;;  %v5945_v56 = vld [vmem:[#allocation8 + $0x124] ss:$8 sps:$4 sm:$0xff]  }
 0x167   :  { %619 = vst [vmem:[#allocation2 + $0x128] sm:$0xff] %v579_v6  ;;  %3307 = vmatpush1.bf16.msra.mxu0 %v5928_v58  ;;  %v3158_v29 = vld [vmem:[#allocation2 + $0xf4] sm:$0xff]  ;;  %v3159_v30 = vld [vmem:[#allocation2 + $0xfc] sm:$0xff]  ;;  %v687_v31 = vpack.c.bf16 %v676_v28, %v675_v27  ;;  %v679_v39 = vld [vmem:[#allocation2 + $0x84] sm:$0xff] }
 0x168   :  { %617 = vst [vmem:[#allocation2 + $0x118] sm:$0xff] %v577_v45  ;;  %850 = vmatmul.mubr.bf16.gmra.mrb[32].mxu1 %v684_v9  ;;  %3308 = vmatprep.subr.bf16.mxu0 %v5933_v62  ;;  %v3170_v32 = vpack.c.bf16 %v3159_v30, %v3158_v29  ;;  %v677_v33 = vld [vmem:[#allocation2 + $0x74] sm:$0xff]  ;;  %v678_v34 = vld [vmem:[#allocation2 + $0x7c] sm:$0xff]  ;;  %v680_v40 = vld [vmem:[#allocation2 + $0x8c] sm:$0xff] }
 0x169   :  { %859 = vmatprep.mubr.bf16.mxu1 %v6340_v43  ;;  %1003 = vmatpush1.bf16.msra.mxu1 %v5931_v8  ;;  %v688_v37 = vpack.c.bf16 %v678_v34, %v677_v33  ;;  %v689_v44 = vpack.c.bf16 %v680_v40, %v679_v39  ;;  %v5942_v53 = vld [vmem:[#allocation8 + $0x114] ss:$8 sps:$4 sm:$0xff]   ;;  %v5940_v55 = vld [vmem:[#allocation8 + $0x110] ss:$8 sps:$4 sm:$0xff]   ;;  %v622_v57 = vld [vmem:[#allocation2 + $0x13] sm:$0xff] }
 0x16a   :  { %3236 = vmatmul.mubr.bf16.gmra.mrb[28].mxu0 %v3167_v12  ;;  %1004 = vmatprep.subr.bf16.mxu1 %v5936_v10  ;;  %v623_v58 = vld [vmem:[#allocation2 + $0x1b] sm:$0xff]  ;;  %v3122_v59 = vld [vmem:[#allocation2 + $0xab] sm:$0xff]  ;;  %v624_v5 = vld [vmem:[#allocation2 + $0x23] sm:$0xff] }
 0x16b   :  { %3245 = vmatprep.mubr.bf16.mxu0 %v6340_v43  ;;  %3309 = vmatpush1.bf16.msra.mxu0 %v5931_v8  ;;  %v5943_v60 = vld [vmem:[#allocation8 + $0x120] ss:$8 sps:$4 sm:$0xff]   ;;  %v639_v61 = vpack.c.bf16 %v623_v58, %v622_v57  ;;  %v5948_v62 = vld [vmem:[#allocation8 + $0x134] ss:$8 sps:$4 sm:$0xff]   ;;  %v3138_v0 = vpack.c.bf16 %v3122_v59, %v3121_v63  ;;  %v5946_v1 = vld [vmem:[#allocation8 + $0x130] ss:$8 sps:$4 sm:$0xff]  }
 0x16c   :  { %3310 = vmatprep.subr.bf16.mxu0 %v5936_v10  ;;  %v5951_v2 = vld [vmem:[#allocation8 + $0x144] ss:$8 sps:$4 sm:$0xff]   ;;  %v625_v3 = vld [vmem:[#allocation2 + $0x2b] sm:$0xff]  ;;  %v3125_v18 = vld [vmem:[#allocation2 + $0xc3] sm:$0xff] }
 0x16d   :  { %1005 = vmatpush1.bf16.msra.mxu1 %v5934_v13  ;;  %v3161_v36 = vld [vmem:[#allocation2 + $0x10c] sm:$0xff]  ;;  %v3124_v7 = vld [vmem:[#allocation2 + $0xbb] sm:$0xff]  ;;  %v640_v8 = vpack.c.bf16 %v625_v3, %v624_v5  ;;  %v628_v22 = vld [vmem:[#allocation2 + $0x43] sm:$0xff] }
 0x16e   :  { %1237 = vmatprep.subr.bf16.mxu1 %v5939_v14  ;;  %v3171_v38 = vpack.c.bf16 %v3161_v36, %v3160_v35  ;;  %v5949_v4 = vld [vmem:[#allocation8 + $0x140] ss:$8 sps:$4 sm:$0xff]   ;;  %v5954_v45 = vld [vmem:[#allocation8 + $0x154] ss:$8 sps:$4 sm:$0xff]   ;;  %v5952_v10 = vld [vmem:[#allocation8 + $0x150] ss:$8 sps:$4 sm:$0xff]  }
 0x16f   :  { %3311 = vmatpush1.bf16.msra.mxu0 %v5934_v13  ;;  %v3162_v41 = vld [vmem:[#allocation2 + $0x114] sm:$0xff]  ;;  %v3163_v42 = vld [vmem:[#allocation2 + $0x11c] sm:$0xff]  ;;  %v5960_v17 = vld [vmem:[#allocation8 + $0x174] ss:$8 sps:$4 sm:$0xff]  }
 0x170   :  { %860 = vmatmul.mubr.bf16.gmra.mrb[36].mxu1 %v685_v19  ;;  %3446 = vmatprep.subr.bf16.mxu0 %v5939_v14  ;;  %v3172_v46 = vpack.c.bf16 %v3163_v42, %v3162_v41  ;;  %v3123_v6 = vld [vmem:[#allocation2 + $0xb3] sm:$0xff]  ;;  %v627_v13 = vld [vmem:[#allocation2 + $0x3b] sm:$0xff]  ;;  %v3126_v14 = vld [vmem:[#allocation2 + $0xcb] sm:$0xff] }
 0x171   :  { %869 = vmatprep.mubr.bf16.mxu1 %v6340_v43  ;;  %v3139_v9 = vpack.c.bf16 %v3124_v7, %v3123_v6  ;;  %v5957_v11 = vld [vmem:[#allocation8 + $0x164] ss:$8 sps:$4 sm:$0xff]   ;;  %v5955_v15 = vld [vmem:[#allocation8 + $0x160] ss:$8 sps:$4 sm:$0xff]   ;;  %v3140_v19 = vpack.c.bf16 %v3126_v14, %v3125_v18  ;;  %v3129_v30 = vld [vmem:[#allocation2 + $0xe3] sm:$0xff] }
 0x172   :  { %3246 = vmatmul.mubr.bf16.gmra.mrb[32].mxu0 %v3168_v20  ;;  %v626_v12 = vld [vmem:[#allocation2 + $0x33] sm:$0xff]  ;;  %v5958_v20 = vld [vmem:[#allocation8 + $0x170] ss:$8 sps:$4 sm:$0xff]   ;;  %v5972_v5 = vld [vmem:[#allocation8 + $0x1b4] ss:$8 sps:$4 sm:$0xff]  }
 0x173   :  { %3255 = vmatprep.mubr.bf16.mxu0 %v6340_v43  ;;  %v641_v16 = vpack.c.bf16 %v627_v13, %v626_v12  ;;  %v5963_v21 = vld [vmem:[#allocation8 + $0x184] ss:$8 sps:$4 sm:$0xff]   ;;  %v629_v23 = vld [vmem:[#allocation2 + $0x4b] sm:$0xff]  ;;  %v632_v34 = vld [vmem:[#allocation2 + $0x63] sm:$0xff] }
 0x174   :  { %v3127_v24 = vld [vmem:[#allocation2 + $0xd3] sm:$0xff]  ;;  %v631_v29 = vld [vmem:[#allocation2 + $0x5b] sm:$0xff]  ;;  %v633_v35 = vld [vmem:[#allocation2 + $0x6b] sm:$0xff] }
 0x175   :  { %v630_v28 = vld [vmem:[#allocation2 + $0x53] sm:$0xff]  ;;  %v635_v41 = vld [vmem:[#allocation2 + $0x7b] sm:$0xff]  ;;  %v3133_v42 = vld [vmem:[#allocation2 + $0x103] sm:$0xff] }
 0x176   :  { %v3131_v36 = vld [vmem:[#allocation2 + $0xf3] sm:$0xff]  ;;  %v636_v48 = vld [vmem:[#allocation2 + $0x83] sm:$0xff]  ;;  %v3136_v51 = vld [vmem:[#allocation2 + $0x11b] sm:$0xff] }
 0x177   :  { %v634_v40 = vld [vmem:[#allocation2 + $0x73] sm:$0xff]  ;;  %v3420_v58 = vld [vmem:[#allocation2 + $0x9d] sm:$0xff]  ;;  %v3421_v6 = vld [vmem:[#allocation2 + $0xa5] sm:$0xff] }
 0x178   :  { %870 = vmatmul.mubr.bf16.gmra.mrb[40].mxu1 %v686_v25  ;;  %v3128_v25 = vld [vmem:[#allocation2 + $0xdb] sm:$0xff]  ;;  %v3135_v50 = vld [vmem:[#allocation2 + $0x113] sm:$0xff] }
 0x179   :  { %879 = vmatprep.mubr.bf16.mxu1 %v6340_v43  ;;  %v3141_v27 = vpack.c.bf16 %v3128_v25, %v3127_v24  ;;  %v3419_v57 = vld [vmem:[#allocation2 + $0x95] sm:$0xff]  ;;  %v3424_v12 = vld [vmem:[#allocation2 + $0xbd] sm:$0xff]  ;;  %v3425_v25 = vld [vmem:[#allocation2 + $0xc5] sm:$0xff] }
 0x17a   :  { %3256 = vmatmul.mubr.bf16.gmra.mrb[36].mxu0 %v3169_v26  ;;  %v642_v26 = vpack.c.bf16 %v629_v23, %v628_v22  ;;  %v5969_v63 = vld [vmem:[#allocation8 + $0x1a4] ss:$8 sps:$4 sm:$0xff]   ;;  %v5967_v3 = vld [vmem:[#allocation8 + $0x1a0] ss:$8 sps:$4 sm:$0xff]   ;;  %v5984_v24 = vld [vmem:[#allocation8 + $0x1f4] ss:$8 sps:$4 sm:$0xff]  }
 0x17b   :  { %3265 = vmatprep.mubr.bf16.mxu0 %v6340_v43  ;;  %v5973_v13 = vld [vmem:[#allocation8 + $0x1c0] ss:$8 sps:$4 sm:$0xff]   ;;  %v5981_v18 = vld [vmem:[#allocation8 + $0x1e4] ss:$8 sps:$4 sm:$0xff]  }
 0x17c   :  { %v5979_v22 = vld [vmem:[#allocation8 + $0x1e0] ss:$8 sps:$4 sm:$0xff]  }
 0x180   :  { %880 = vmatmul.mubr.bf16.gmra.mrb[44].mxu1 %v687_v31  ;;  %v3130_v31 = vld [vmem:[#allocation2 + $0xeb] sm:$0xff] }
 0x181   :  { %889 = vmatprep.mubr.bf16.mxu1 %v6340_v43  ;;  %v3142_v33 = vpack.c.bf16 %v3130_v31, %v3129_v30  ;;  %v1122_v30 = vld [vmem:[#allocation2 + $0x4d] sm:$0xff]  ;;  %v3427_v31 = vld [vmem:[#allocation2 + $0xd5] sm:$0xff] }
 0x182   :  { %3266 = vmatmul.mubr.bf16.gmra.mrb[40].mxu0 %v3170_v32  ;;  %v643_v32 = vpack.c.bf16 %v631_v29, %v630_v28  ;;  %v5987_v28 = vld [vmem:[#allocation8 + $0x204] ss:$8 sps:$4 sm:$0xff]   ;;  %v1121_v29 = vld [vmem:[#allocation2 + $0x45] sm:$0xff] }
 0x183   :  { %3275 = vmatprep.mubr.bf16.mxu0 %v6340_v43 }
 0x188   :  { %890 = vmatmul.mubr.bf16.gmra.mrb[48].mxu1 %v688_v37  ;;  %v3132_v37 = vld [vmem:[#allocation2 + $0xfb] sm:$0xff] }
 0x189   :  { %899 = vmatprep.mubr.bf16.mxu1 %v6340_v43  ;;  %v3143_v39 = vpack.c.bf16 %v3132_v37, %v3131_v36  ;;  %v1124_v36 = vld [vmem:[#allocation2 + $0x5d] sm:$0xff]  ;;  %v3429_v37 = vld [vmem:[#allocation2 + $0xe5] sm:$0xff] }
 0x18a   :  { %3276 = vmatmul.mubr.bf16.gmra.mrb[44].mxu0 %v3171_v38  ;;  %v644_v38 = vpack.c.bf16 %v633_v35, %v632_v34  ;;  %v1123_v35 = vld [vmem:[#allocation2 + $0x55] sm:$0xff] }
 0x18b   :  { %3285 = vmatprep.mubr.bf16.mxu0 %v6340_v43 }
 0x190   :  { %900 = vmatmul.mubr.bf16.gmra.mrb[52].mxu1 %v689_v44  ;;  %v3134_v44 = vld [vmem:[#allocation2 + $0x10b] sm:$0xff] }
 0x191   :  { %1022 = vmatprep.mubr.bf16.mxu1 %v6340_v43  ;;  %v3144_v47 = vpack.c.bf16 %v3134_v44, %v3133_v42  ;;  %v1126_v42 = vld [vmem:[#allocation2 + $0x6d] sm:$0xff]  ;;  %v3431_v44 = vld [vmem:[#allocation2 + $0xf5] sm:$0xff] }
 0x192   :  { %3286 = vmatmul.mubr.bf16.gmra.mrb[48].mxu0 %v3172_v46  ;;  %v645_v46 = vpack.c.bf16 %v635_v41, %v634_v40  ;;  %v1125_v41 = vld [vmem:[#allocation2 + $0x65] sm:$0xff] }
 0x193   :  { %3328 = vmatprep.mubr.bf16.mxu0 %v6340_v43 }
 0x198   :  { %1023 = vmatmul.mubr.bf16.vlgmr.msra.gmra.mrb[20].mxu1 %v638_v52 }
 0x199   :  { %1238 = vmatpush1.bf16.msra.mxu1 %v5937_v49  ;;  %1032 = vmatprep.mubr.bf16.mxu1 %v6340_v43 }
 0x19a   :  { %3329 = vmatmul.mubr.bf16.vlgmr.msra.gmra.mrb[16].mxu0 %v3137_v54  ;;  %1239 = vmatprep.subr.bf16.mxu1 %v5942_v53  ;;  %v1113_v54 = vld [vmem:[#allocation2 + $0x5] sm:$0xff] }
 0x19b   :  { %3447 = vmatpush1.bf16.msra.mxu0 %v5937_v49  ;;  %3338 = vmatprep.mubr.bf16.mxu0 %v6340_v43  ;;  %v637_v49 = vld [vmem:[#allocation2 + $0x8b] sm:$0xff] }
 0x19c   :  { %3448 = vmatprep.subr.bf16.mxu0 %v5942_v53  ;;  %v646_v52 = vpack.c.bf16 %v637_v49, %v636_v48  ;;  %v3145_v53 = vpack.c.bf16 %v3136_v51, %v3135_v50  ;;  %v1127_v49 = vld [vmem:[#allocation2 + $0x75] sm:$0xff]  ;;  %v1128_v50 = vld [vmem:[#allocation2 + $0x7d] sm:$0xff]  ;;  %v3433_v51 = vld [vmem:[#allocation2 + $0x105] sm:$0xff] }
 0x19d   :  { %1240 = vmatpush1.bf16.msra.mxu1 %v5940_v55 }
 0x19e   :  { %1241 = vmatprep.subr.bf16.mxu1 %v5945_v56 }
 0x19f   :  { %3449 = vmatpush1.bf16.msra.mxu0 %v5940_v55  ;;  %v1114_v55 = vld [vmem:[#allocation2 + $0xd] sm:$0xff] }
 0x1a0   :  { %1033 = vmatmul.mubr.bf16.gmra.mrb[24].mxu1 %v639_v61  ;;  %3450 = vmatprep.subr.bf16.mxu0 %v5945_v56  ;;  %v5961_v56 = vld [vmem:[#allocation8 + $0x180] ss:$8 sps:$4 sm:$0xff]   ;;  %v1131_v59 = vpack.c.bf16 %v1114_v55, %v1113_v54  ;;  %v3437_v61 = vpack.c.bf16 %v3420_v58, %v3419_v57  ;;  %v1129_v55 = vld [vmem:[#allocation2 + $0x85] sm:$0xff]  ;;  %v3436_v58 = vld [vmem:[#allocation2 + $0x11d] sm:$0xff] }
 0x1a1   :  { %1042 = vmatprep.mubr.bf16.mxu1 %v6340_v43  ;;  %1242 = vmatpush1.bf16.msra.mxu1 %v5943_v60  ;;  %v3435_v57 = vld [vmem:[#allocation2 + $0x115] sm:$0xff] }
 0x1a2   :  { %3339 = vmatmul.mubr.bf16.gmra.mrb[20].mxu0 %v3138_v0  ;;  %1243 = vmatprep.subr.bf16.mxu1 %v5948_v62  ;;  %v1115_v0 = vld [vmem:[#allocation2 + $0x15] sm:$0xff] }
 0x1a3   :  { %3348 = vmatprep.mubr.bf16.mxu0 %v6340_v43  ;;  %3451 = vmatpush1.bf16.msra.mxu0 %v5943_v60  ;;  %v5966_v60 = vld [vmem:[#allocation8 + $0x194] ss:$8 sps:$4 sm:$0xff]  }
 0x1a4   :  { %3452 = vmatprep.subr.bf16.mxu0 %v5948_v62  ;;  %v5964_v62 = vld [vmem:[#allocation8 + $0x190] ss:$8 sps:$4 sm:$0xff]  }
 0x1a5   :  { %1244 = vmatpush1.bf16.msra.mxu1 %v5946_v1 }
 0x1a6   :  { %1245 = vmatprep.subr.bf16.mxu1 %v5951_v2 }
 0x1a7   :  { %3453 = vmatpush1.bf16.msra.mxu0 %v5946_v1  ;;  %v1116_v1 = vld [vmem:[#allocation2 + $0x1d] sm:$0xff] }
 0x1a8   :  { %1043 = vmatmul.mubr.bf16.gmra.mrb[28].mxu1 %v640_v8  ;;  %3454 = vmatprep.subr.bf16.mxu0 %v5951_v2  ;;  %v3422_v2 = vld [vmem:[#allocation2 + $0xad] sm:$0xff]  ;;  %v5970_v8 = vld [vmem:[#allocation8 + $0x1b0] ss:$8 sps:$4 sm:$0xff]  }
 0x1a9   :  { %1052 = vmatprep.mubr.bf16.mxu1 %v6340_v43  ;;  %1246 = vmatpush1.bf16.msra.mxu1 %v5949_v4  ;;  %v3438_v7 = vpack.c.bf16 %v3422_v2, %v3421_v6  ;;  %v5993_v6 = vld [vmem:[#allocation8 + $0x224] ss:$8 sps:$4 sm:$0xff]  }
 0x1aa   :  { %3349 = vmatmul.mubr.bf16.gmra.mrb[24].mxu0 %v3139_v9  ;;  %1247 = vmatprep.subr.bf16.mxu1 %v5954_v45  ;;  %v1118_v9 = vld [vmem:[#allocation2 + $0x2d] sm:$0xff] }
 0x1ab   :  { %3358 = vmatprep.mubr.bf16.mxu0 %v6340_v43  ;;  %3455 = vmatpush1.bf16.msra.mxu0 %v5949_v4  ;;  %v1132_v4 = vpack.c.bf16 %v1116_v1, %v1115_v0  ;;  %v3605_v0 = vld [vmem:[#allocation2 + $0x9f] sm:$0xff]  ;;  %v3606_v1 = vld [vmem:[#allocation2 + $0xa7] sm:$0xff] }
 0x1ac   :  { %3456 = vmatprep.subr.bf16.mxu0 %v5954_v45  ;;  %v5975_v45 = vld [vmem:[#allocation8 + $0x1c4] ss:$8 sps:$4 sm:$0xff]  }
 0x1ad   :  { %1248 = vmatpush1.bf16.msra.mxu1 %v5952_v10 }
 0x1ae   :  { %1249 = vmatprep.subr.bf16.mxu1 %v5957_v11 }
 0x1af   :  { %3457 = vmatpush1.bf16.msra.mxu0 %v5952_v10  ;;  %v1117_v10 = vld [vmem:[#allocation2 + $0x25] sm:$0xff] }
 0x1b0   :  { %1053 = vmatmul.mubr.bf16.gmra.mrb[32].mxu1 %v641_v16  ;;  %3458 = vmatprep.subr.bf16.mxu0 %v5957_v11  ;;  %v3423_v11 = vld [vmem:[#allocation2 + $0xb5] sm:$0xff]  ;;  %v1133_v14 = vpack.c.bf16 %v1118_v9, %v1117_v10 }
 0x1b1   :  { %1062 = vmatprep.mubr.bf16.mxu1 %v6340_v43  ;;  %1250 = vmatpush1.bf16.msra.mxu1 %v5955_v15  ;;  %v3439_v16 = vpack.c.bf16 %v3424_v12, %v3423_v11  ;;  %v5991_v9 = vld [vmem:[#allocation8 + $0x220] ss:$8 sps:$4 sm:$0xff]   ;;  %v5996_v11 = vld [vmem:[#allocation8 + $0x234] ss:$8 sps:$4 sm:$0xff]  }
 0x1b2   :  { %3359 = vmatmul.mubr.bf16.gmra.mrb[28].mxu0 %v3140_v19  ;;  %1251 = vmatprep.subr.bf16.mxu1 %v5960_v17  ;;  %v1119_v19 = vld [vmem:[#allocation2 + $0x35] sm:$0xff] }
 0x1b3   :  { %3368 = vmatprep.mubr.bf16.mxu0 %v6340_v43  ;;  %3459 = vmatpush1.bf16.msra.mxu0 %v5955_v15  ;;  %v5978_v15 = vld [vmem:[#allocation8 + $0x1d4] ss:$8 sps:$4 sm:$0xff]  }
 0x1b4   :  { %3460 = vmatprep.subr.bf16.mxu0 %v5960_v17  ;;  %v5976_v17 = vld [vmem:[#allocation8 + $0x1d0] ss:$8 sps:$4 sm:$0xff]   ;;  %v3607_v12 = vld [vmem:[#allocation2 + $0xaf] sm:$0xff] }
 0x1b5   :  { %1252 = vmatpush1.bf16.msra.mxu1 %v5958_v20 }
 0x1b6   :  { %1520 = vmatprep.subr.bf16.mxu1 %v5963_v21 }
 0x1b7   :  { %3461 = vmatpush1.bf16.msra.mxu0 %v5958_v20  ;;  %v1120_v20 = vld [vmem:[#allocation2 + $0x3d] sm:$0xff] }
 0x1b8   :  { %1063 = vmatmul.mubr.bf16.gmra.mrb[36].mxu1 %v642_v26  ;;  %3632 = vmatprep.subr.bf16.mxu0 %v5963_v21  ;;  %v3426_v21 = vld [vmem:[#allocation2 + $0xcd] sm:$0xff]  ;;  %v1134_v23 = vpack.c.bf16 %v1120_v20, %v1119_v19 }
 0x1b9   :  { %1072 = vmatprep.mubr.bf16.mxu1 %v6340_v43  ;;  %v3440_v26 = vpack.c.bf16 %v3426_v21, %v3425_v25  ;;  %v3610_v19 = vld [vmem:[#allocation2 + $0xc7] sm:$0xff]  ;;  %v5997_v20 = vld [vmem:[#allocation8 + $0x240] ss:$8 sps:$4 sm:$0xff]   ;;  %v6005_v25 = vld [vmem:[#allocation8 + $0x264] ss:$8 sps:$4 sm:$0xff]  }
 0x1ba   :  { %3369 = vmatmul.mubr.bf16.gmra.mrb[32].mxu0 %v3141_v27  ;;  %v5982_v27 = vld [vmem:[#allocation8 + $0x1f0] ss:$8 sps:$4 sm:$0xff]  }
 0x1bb   :  { %3378 = vmatprep.mubr.bf16.mxu0 %v6340_v43 }
 0x1c0   :  { %1073 = vmatmul.mubr.bf16.gmra.mrb[40].mxu1 %v643_v32  ;;  %v3428_v32 = vld [vmem:[#allocation2 + $0xdd] sm:$0xff] }
 0x1c1   :  { %1082 = vmatprep.mubr.bf16.mxu1 %v6340_v43  ;;  %v3441_v34 = vpack.c.bf16 %v3428_v32, %v3427_v31  ;;  %v6008_v31 = vld [vmem:[#allocation8 + $0x274] ss:$8 sps:$4 sm:$0xff]  }
 0x1c2   :  { %3379 = vmatmul.mubr.bf16.gmra.mrb[36].mxu0 %v3142_v33  ;;  %v1135_v33 = vpack.c.bf16 %v1122_v30, %v1121_v29  ;;  %v6003_v29 = vld [vmem:[#allocation8 + $0x260] ss:$8 sps:$4 sm:$0xff]  }
 0x1c3   :  { %3388 = vmatprep.mubr.bf16.mxu0 %v6340_v43  ;;  %v3611_v32 = vld [vmem:[#allocation2 + $0xcf] sm:$0xff] }
 0x1c8   :  { %1083 = vmatmul.mubr.bf16.gmra.mrb[44].mxu1 %v644_v38  ;;  %v3430_v38 = vld [vmem:[#allocation2 + $0xed] sm:$0xff] }
 0x1c9   :  { %1092 = vmatprep.mubr.bf16.mxu1 %v6340_v43  ;;  %v3442_v40 = vpack.c.bf16 %v3430_v38, %v3429_v37  ;;  %v1405_v37 = vld [vmem:[#allocation2 + $0x57] sm:$0xff]  ;;  %v3613_v38 = vld [vmem:[#allocation2 + $0xdf] sm:$0xff] }
 0x1ca   :  { %3389 = vmatmul.mubr.bf16.gmra.mrb[40].mxu0 %v3143_v39  ;;  %v1136_v39 = vpack.c.bf16 %v1124_v36, %v1123_v35  ;;  %v6011_v35 = vld [vmem:[#allocation8 + $0x284] ss:$8 sps:$4 sm:$0xff]  }
 0x1cb   :  { %3398 = vmatprep.mubr.bf16.mxu0 %v6340_v43  ;;  %v1404_v36 = vld [vmem:[#allocation2 + $0x4f] sm:$0xff] }
 0x1d0   :  { %1093 = vmatmul.mubr.bf16.gmra.mrb[48].mxu1 %v645_v46  ;;  %v3432_v46 = vld [vmem:[#allocation2 + $0xfd] sm:$0xff] }
 0x1d1   :  { %1102 = vmatprep.mubr.bf16.mxu1 %v6340_v43  ;;  %v3443_v48 = vpack.c.bf16 %v3432_v46, %v3431_v44  ;;  %v1407_v44 = vld [vmem:[#allocation2 + $0x67] sm:$0xff]  ;;  %v3615_v46 = vld [vmem:[#allocation2 + $0xef] sm:$0xff] }
 0x1d2   :  { %3399 = vmatmul.mubr.bf16.gmra.mrb[44].mxu0 %v3144_v47  ;;  %v1137_v47 = vpack.c.bf16 %v1126_v42, %v1125_v41  ;;  %v1406_v42 = vld [vmem:[#allocation2 + $0x5f] sm:$0xff] }
 0x1d3   :  { %3408 = vmatprep.mubr.bf16.mxu0 %v6340_v43 }
 0x1d8   :  { %1103 = vmatmul.mubr.bf16.gmra.mrb[52].mxu1 %v646_v52  ;;  %v3434_v52 = vld [vmem:[#allocation2 + $0x10d] sm:$0xff] }
 0x1d9   :  { %1269 = vmatprep.mubr.bf16.mxu1 %v6340_v43  ;;  %v3444_v54 = vpack.c.bf16 %v3434_v52, %v3433_v51  ;;  %v1409_v51 = vld [vmem:[#allocation2 + $0x77] sm:$0xff]  ;;  %v3617_v52 = vld [vmem:[#allocation2 + $0xff] sm:$0xff] }
 0x1da   :  { %3409 = vmatmul.mubr.bf16.gmra.mrb[48].mxu0 %v3145_v53  ;;  %v1138_v53 = vpack.c.bf16 %v1128_v50, %v1127_v49  ;;  %v1408_v50 = vld [vmem:[#allocation2 + $0x6f] sm:$0xff] }
 0x1db   :  { %3478 = vmatprep.mubr.bf16.mxu0 %v6340_v43 }
 0x1e0   :  { %1270 = vmatmul.mubr.bf16.vlgmr.msra.gmra.mrb[20].mxu1 %v1131_v59 }
 0x1e1   :  { %1521 = vmatpush1.bf16.msra.mxu1 %v5961_v56  ;;  %1279 = vmatprep.mubr.bf16.mxu1 %v6340_v43 }
 0x1e2   :  { %3479 = vmatmul.mubr.bf16.vlgmr.msra.gmra.mrb[16].mxu0 %v3437_v61  ;;  %1522 = vmatprep.subr.bf16.mxu1 %v5966_v60  ;;  %v1396_v61 = vld [vmem:[#allocation2 + $0xf] sm:$0xff] }
 0x1e3   :  { %3633 = vmatpush1.bf16.msra.mxu0 %v5961_v56  ;;  %3488 = vmatprep.mubr.bf16.mxu0 %v6340_v43  ;;  %v1130_v56 = vld [vmem:[#allocation2 + $0x8d] sm:$0xff] }
 0x1e4   :  { %3634 = vmatprep.subr.bf16.mxu0 %v5966_v60  ;;  %v1139_v59 = vpack.c.bf16 %v1130_v56, %v1129_v55  ;;  %v3445_v60 = vpack.c.bf16 %v3436_v58, %v3435_v57  ;;  %v1410_v56 = vld [vmem:[#allocation2 + $0x7f] sm:$0xff]  ;;  %v1411_v57 = vld [vmem:[#allocation2 + $0x87] sm:$0xff]  ;;  %v3619_v58 = vld [vmem:[#allocation2 + $0x10f] sm:$0xff] }
 0x1e5   :  { %1523 = vmatpush1.bf16.msra.mxu1 %v5964_v62 }
 0x1e6   :  { %1524 = vmatprep.subr.bf16.mxu1 %v5969_v63 }
 0x1e7   :  { %3635 = vmatpush1.bf16.msra.mxu0 %v5964_v62  ;;  %v1397_v62 = vld [vmem:[#allocation2 + $0x17] sm:$0xff] }
 0x1e8   :  { %1280 = vmatmul.mubr.bf16.gmra.mrb[24].mxu1 %v1132_v4  ;;  %3636 = vmatprep.subr.bf16.mxu0 %v5969_v63  ;;  %v5985_v63 = vld [vmem:[#allocation8 + $0x200] ss:$8 sps:$4 sm:$0xff]   ;;  %v1414_v2 = vpack.c.bf16 %v1397_v62, %v1396_v61  ;;  %v3623_v4 = vpack.c.bf16 %v3606_v1, %v3605_v0  ;;  %v3621_v0 = vld [vmem:[#allocation2 + $0x11f] sm:$0xff]  ;;  %v3622_v1 = vld [vmem:[#allocation2 + $0x127] sm:$0xff] }
 0x1e9   :  { %1289 = vmatprep.mubr.bf16.mxu1 %v6340_v43  ;;  %1525 = vmatpush1.bf16.msra.mxu1 %v5967_v3  ;;  %v1412_v62 = vld [vmem:[#allocation2 + $0x8f] sm:$0xff] }
 0x1ea   :  { %3489 = vmatmul.mubr.bf16.gmra.mrb[20].mxu0 %v3438_v7  ;;  %1526 = vmatprep.subr.bf16.mxu1 %v5972_v5  ;;  %v1398_v7 = vld [vmem:[#allocation2 + $0x1f] sm:$0xff] }
 0x1eb   :  { %3498 = vmatprep.mubr.bf16.mxu0 %v6340_v43  ;;  %3637 = vmatpush1.bf16.msra.mxu0 %v5967_v3  ;;  %v5990_v3 = vld [vmem:[#allocation8 + $0x214] ss:$8 sps:$4 sm:$0xff]  }
 0x1ec   :  { %3638 = vmatprep.subr.bf16.mxu0 %v5972_v5  ;;  %v5988_v5 = vld [vmem:[#allocation8 + $0x210] ss:$8 sps:$4 sm:$0xff]  }
 0x1ed   :  { %1527 = vmatpush1.bf16.msra.mxu1 %v5970_v8 }
 0x1ee   :  { %1528 = vmatprep.subr.bf16.mxu1 %v5975_v45 }
 0x1ef   :  { %3639 = vmatpush1.bf16.msra.mxu0 %v5970_v8  ;;  %v1399_v8 = vld [vmem:[#allocation2 + $0x27] sm:$0xff] }
 0x1f0   :  { %1290 = vmatmul.mubr.bf16.gmra.mrb[28].mxu1 %v1133_v14  ;;  %3640 = vmatprep.subr.bf16.mxu0 %v5975_v45  ;;  %v3608_v45 = vld [vmem:[#allocation2 + $0xb7] sm:$0xff]  ;;  %v1415_v10 = vpack.c.bf16 %v1399_v8, %v1398_v7  ;;  %v5994_v14 = vld [vmem:[#allocation8 + $0x230] ss:$8 sps:$4 sm:$0xff]  }
 0x1f1   :  { %1299 = vmatprep.mubr.bf16.mxu1 %v6340_v43  ;;  %1529 = vmatpush1.bf16.msra.mxu1 %v5973_v13  ;;  %v3792_v7 = vld [vmem:[#allocation2 + $0xa8] sm:$0xff] }
 0x1f2   :  { %3499 = vmatmul.mubr.bf16.gmra.mrb[24].mxu0 %v3439_v16  ;;  %1530 = vmatprep.subr.bf16.mxu1 %v5978_v15  ;;  %v1401_v16 = vld [vmem:[#allocation2 + $0x37] sm:$0xff] }
 0x1f3   :  { %3508 = vmatprep.mubr.bf16.mxu0 %v6340_v43  ;;  %3641 = vmatpush1.bf16.msra.mxu0 %v5973_v13  ;;  %v3624_v13 = vpack.c.bf16 %v3608_v45, %v3607_v12  ;;  %v6014_v45 = vld [vmem:[#allocation8 + $0x294] ss:$8 sps:$4 sm:$0xff]   ;;  %v6017_v12 = vld [vmem:[#allocation8 + $0x2a4] ss:$8 sps:$4 sm:$0xff]  }
 0x1f4   :  { %3642 = vmatprep.subr.bf16.mxu0 %v5978_v15  ;;  %v5999_v15 = vld [vmem:[#allocation8 + $0x244] ss:$8 sps:$4 sm:$0xff]  }
 0x1f5   :  { %1531 = vmatpush1.bf16.msra.mxu1 %v5976_v17 }
 0x1f6   :  { %1532 = vmatprep.subr.bf16.mxu1 %v5981_v18 }
 0x1f7   :  { %3643 = vmatpush1.bf16.msra.mxu0 %v5976_v17  ;;  %v1400_v17 = vld [vmem:[#allocation2 + $0x2f] sm:$0xff] }
 0x1f8   :  { %1300 = vmatmul.mubr.bf16.gmra.mrb[32].mxu1 %v1134_v23  ;;  %3644 = vmatprep.subr.bf16.mxu0 %v5981_v18  ;;  %v3609_v18 = vld [vmem:[#allocation2 + $0xbf] sm:$0xff]  ;;  %v1416_v21 = vpack.c.bf16 %v1401_v16, %v1400_v17  ;;  %v6015_v17 = vld [vmem:[#allocation8 + $0x2a0] ss:$8 sps:$4 sm:$0xff]  }
 0x1f9   :  { %1309 = vmatprep.mubr.bf16.mxu1 %v6340_v43  ;;  %1533 = vmatpush1.bf16.msra.mxu1 %v5979_v22  ;;  %v3625_v23 = vpack.c.bf16 %v3610_v19, %v3609_v18  ;;  %v3794_v16 = vld [vmem:[#allocation2 + $0xb8] sm:$0xff]  ;;  %v6020_v19 = vld [vmem:[#allocation8 + $0x2b4] ss:$8 sps:$4 sm:$0xff]  }
 0x1fa   :  { %3509 = vmatmul.mubr.bf16.gmra.mrb[28].mxu0 %v3440_v26  ;;  %1534 = vmatprep.subr.bf16.mxu1 %v5984_v24  ;;  %v1402_v26 = vld [vmem:[#allocation2 + $0x3f] sm:$0xff] }
 0x1fb   :  { %3518 = vmatprep.mubr.bf16.mxu0 %v6340_v43  ;;  %3645 = vmatpush1.bf16.msra.mxu0 %v5979_v22  ;;  %v6002_v22 = vld [vmem:[#allocation8 + $0x254] ss:$8 sps:$4 sm:$0xff]  }
 0x1fc   :  { %3646 = vmatprep.subr.bf16.mxu0 %v5984_v24  ;;  %v6000_v24 = vld [vmem:[#allocation8 + $0x250] ss:$8 sps:$4 sm:$0xff]  }
 0x1fd   :  { %1535 = vmatpush1.bf16.msra.mxu1 %v5982_v27 }
 0x1fe   :  { %1803 = vmatprep.subr.bf16.mxu1 %v5987_v28 }
 0x1ff   :  { %3647 = vmatpush1.bf16.msra.mxu0 %v5982_v27  ;;  %v1403_v27 = vld [vmem:[#allocation2 + $0x47] sm:$0xff] }
 0x200   :  { %1310 = vmatmul.mubr.bf16.gmra.mrb[36].mxu1 %v1135_v33  ;;  %3818 = vmatprep.subr.bf16.mxu0 %v5987_v28  ;;  %v3612_v28 = vld [vmem:[#allocation2 + $0xd7] sm:$0xff]  ;;  %v1417_v30 = vpack.c.bf16 %v1403_v27, %v1402_v26  ;;  %v3796_v26 = vld [vmem:[#allocation2 + $0xc8] sm:$0xff] }
 0x201   :  { %1319 = vmatprep.mubr.bf16.mxu1 %v6340_v43  ;;  %v3626_v33 = vpack.c.bf16 %v3612_v28, %v3611_v32  ;;  %v6021_v27 = vld [vmem:[#allocation8 + $0x2c0] ss:$8 sps:$4 sm:$0xff]   ;;  %v6029_v32 = vld [vmem:[#allocation8 + $0x2e4] ss:$8 sps:$4 sm:$0xff]  }
 0x202   :  { %3519 = vmatmul.mubr.bf16.gmra.mrb[32].mxu0 %v3441_v34  ;;  %v6006_v34 = vld [vmem:[#allocation8 + $0x270] ss:$8 sps:$4 sm:$0xff]  }
 0x203   :  { %3528 = vmatprep.mubr.bf16.mxu0 %v6340_v43 }
 0x208   :  { %1320 = vmatmul.mubr.bf16.gmra.mrb[40].mxu1 %v1136_v39  ;;  %v3614_v39 = vld [vmem:[#allocation2 + $0xe7] sm:$0xff] }
 0x209   :  { %1329 = vmatprep.mubr.bf16.mxu1 %v6340_v43  ;;  %v3627_v41 = vpack.c.bf16 %v3614_v39, %v3613_v38  ;;  %v6032_v39 = vld [vmem:[#allocation8 + $0x2f4] ss:$8 sps:$4 sm:$0xff]  }
 0x20a   :  { %3529 = vmatmul.mubr.bf16.gmra.mrb[36].mxu0 %v3442_v40  ;;  %v1418_v40 = vpack.c.bf16 %v1405_v37, %v1404_v36  ;;  %v3798_v36 = vld [vmem:[#allocation2 + $0xd8] sm:$0xff] }
 0x20b   :  { %3538 = vmatprep.mubr.bf16.mxu0 %v6340_v43  ;;  %v6027_v37 = vld [vmem:[#allocation8 + $0x2e0] ss:$8 sps:$4 sm:$0xff]  }
 0x210   :  { %1330 = vmatmul.mubr.bf16.gmra.mrb[44].mxu1 %v1137_v47  ;;  %v3616_v47 = vld [vmem:[#allocation2 + $0xf7] sm:$0xff] }
 0x211   :  { %1339 = vmatprep.mubr.bf16.mxu1 %v6340_v43  ;;  %v3628_v49 = vpack.c.bf16 %v3616_v47, %v3615_v46  ;;  %v1688_v46 = vld [vmem:[#allocation2 + $0x58] sm:$0xff]  ;;  %v3799_v47 = vld [vmem:[#allocation2 + $0xe0] sm:$0xff] }
 0x212   :  { %3539 = vmatmul.mubr.bf16.gmra.mrb[40].mxu0 %v3443_v48  ;;  %v1419_v48 = vpack.c.bf16 %v1407_v44, %v1406_v42  ;;  %v6035_v42 = vld [vmem:[#allocation8 + $0x304] ss:$8 sps:$4 sm:$0xff]  }
 0x213   :  { %3548 = vmatprep.mubr.bf16.mxu0 %v6340_v43  ;;  %v1687_v44 = vld [vmem:[#allocation2 + $0x50] sm:$0xff] }
 0x218   :  { %1340 = vmatmul.mubr.bf16.gmra.mrb[48].mxu1 %v1138_v53  ;;  %v3618_v53 = vld [vmem:[#allocation2 + $0x107] sm:$0xff] }
 0x219   :  { %1349 = vmatprep.mubr.bf16.mxu1 %v6340_v43  ;;  %v3629_v55 = vpack.c.bf16 %v3618_v53, %v3617_v52  ;;  %v1690_v52 = vld [vmem:[#allocation2 + $0x68] sm:$0xff]  ;;  %v3801_v53 = vld [vmem:[#allocation2 + $0xf0] sm:$0xff] }
 0x21a   :  { %3549 = vmatmul.mubr.bf16.gmra.mrb[44].mxu0 %v3444_v54  ;;  %v1420_v54 = vpack.c.bf16 %v1409_v51, %v1408_v50  ;;  %v1689_v51 = vld [vmem:[#allocation2 + $0x60] sm:$0xff] }
 0x21b   :  { %3558 = vmatprep.mubr.bf16.mxu0 %v6340_v43 }
 0x220   :  { %1350 = vmatmul.mubr.bf16.gmra.mrb[52].mxu1 %v1139_v59  ;;  %v3620_v59 = vld [vmem:[#allocation2 + $0x117] sm:$0xff] }
 0x221   :  { %1552 = vmatprep.mubr.bf16.mxu1 %v6340_v43  ;;  %v3630_v61 = vpack.c.bf16 %v3620_v59, %v3619_v58  ;;  %v1692_v58 = vld [vmem:[#allocation2 + $0x78] sm:$0xff]  ;;  %v3803_v59 = vld [vmem:[#allocation2 + $0x100] sm:$0xff] }
 0x222   :  { %3559 = vmatmul.mubr.bf16.gmra.mrb[48].mxu0 %v3445_v60  ;;  %v1421_v60 = vpack.c.bf16 %v1411_v57, %v1410_v56  ;;  %v1691_v57 = vld [vmem:[#allocation2 + $0x70] sm:$0xff] }
 0x223   :  { %3664 = vmatprep.mubr.bf16.mxu0 %v6340_v43 }
 0x228   :  { %1553 = vmatmul.mubr.bf16.vlgmr.msra.gmra.mrb[20].mxu1 %v1414_v2 }
 0x229   :  { %1804 = vmatpush1.bf16.msra.mxu1 %v5985_v63  ;;  %1562 = vmatprep.mubr.bf16.mxu1 %v6340_v43 }
 0x22a   :  { %3665 = vmatmul.mubr.bf16.vlgmr.msra.gmra.mrb[16].mxu0 %v3623_v4  ;;  %1805 = vmatprep.subr.bf16.mxu1 %v5990_v3  ;;  %v1679_v4 = vld [vmem:[#allocation2 + $0x10] sm:$0xff] }
 0x22b   :  { %3819 = vmatpush1.bf16.msra.mxu0 %v5985_v63  ;;  %3674 = vmatprep.mubr.bf16.mxu0 %v6340_v43  ;;  %v1413_v63 = vld [vmem:[#allocation2 + $0x97] sm:$0xff] }
 0x22c   :  { %3820 = vmatprep.subr.bf16.mxu0 %v5990_v3  ;;  %v1422_v2 = vpack.c.bf16 %v1413_v63, %v1412_v62  ;;  %v3631_v3 = vpack.c.bf16 %v3622_v1, %v3621_v0  ;;  %v1693_v63 = vld [vmem:[#allocation2 + $0x80] sm:$0xff]  ;;  %v1694_v0 = vld [vmem:[#allocation2 + $0x88] sm:$0xff]  ;;  %v3805_v1 = vld [vmem:[#allocation2 + $0x110] sm:$0xff] }
 0x22d   :  { %1806 = vmatpush1.bf16.msra.mxu1 %v5988_v5 }
 0x22e   :  { %1807 = vmatprep.subr.bf16.mxu1 %v5993_v6 }
 0x22f   :  { %3821 = vmatpush1.bf16.msra.mxu0 %v5988_v5  ;;  %v1680_v5 = vld [vmem:[#allocation2 + $0x18] sm:$0xff] }
 0x230   :  { %1563 = vmatmul.mubr.bf16.gmra.mrb[24].mxu1 %v1415_v10  ;;  %3822 = vmatprep.subr.bf16.mxu0 %v5993_v6  ;;  %v6009_v6 = vld [vmem:[#allocation8 + $0x280] ss:$8 sps:$4 sm:$0xff]   ;;  %v1697_v8 = vpack.c.bf16 %v1680_v5, %v1679_v4 }
 0x231   :  { %1572 = vmatprep.mubr.bf16.mxu1 %v6340_v43  ;;  %1808 = vmatpush1.bf16.msra.mxu1 %v5991_v9  ;;  %v1696_v5 = vld [vmem:[#allocation2 + $0x98] sm:$0xff] }
 0x232   :  { %3675 = vmatmul.mubr.bf16.gmra.mrb[20].mxu0 %v3624_v13  ;;  %1809 = vmatprep.subr.bf16.mxu1 %v5996_v11  ;;  %v1681_v13 = vld [vmem:[#allocation2 + $0x20] sm:$0xff] }
 0x233   :  { %3684 = vmatprep.mubr.bf16.mxu0 %v6340_v43  ;;  %3823 = vmatpush1.bf16.msra.mxu0 %v5991_v9  ;;  %v3791_v9 = vld [vmem:[#allocation2 + $0xa0] sm:$0xff] }
 0x234   :  { %3824 = vmatprep.subr.bf16.mxu0 %v5996_v11  ;;  %v3809_v10 = vpack.c.bf16 %v3792_v7, %v3791_v9  ;;  %v6012_v11 = vld [vmem:[#allocation8 + $0x290] ss:$8 sps:$4 sm:$0xff]  }
 0x235   :  { %1810 = vmatpush1.bf16.msra.mxu1 %v5994_v14  ;;  %v3807_v7 = vld [vmem:[#allocation2 + $0x120] sm:$0xff] }
 0x236   :  { %1811 = vmatprep.subr.bf16.mxu1 %v5999_v15 }
 0x237   :  { %3825 = vmatpush1.bf16.msra.mxu0 %v5994_v14  ;;  %v1682_v14 = vld [vmem:[#allocation2 + $0x28] sm:$0xff] }
 0x238   :  { %1573 = vmatmul.mubr.bf16.gmra.mrb[28].mxu1 %v1416_v21  ;;  %3826 = vmatprep.subr.bf16.mxu0 %v5999_v15  ;;  %v3793_v15 = vld [vmem:[#allocation2 + $0xb0] sm:$0xff]  ;;  %v1698_v18 = vpack.c.bf16 %v1682_v14, %v1681_v13  ;;  %v6018_v21 = vld [vmem:[#allocation8 + $0x2b0] ss:$8 sps:$4 sm:$0xff]  }
 0x239   :  { %1582 = vmatprep.mubr.bf16.mxu1 %v6340_v43  ;;  %1812 = vmatpush1.bf16.msra.mxu1 %v5997_v20  ;;  %v3978_v13 = vld [vmem:[#allocation2 + $0xa9] sm:$0xff] }
 0x23a   :  { %3685 = vmatmul.mubr.bf16.gmra.mrb[24].mxu0 %v3625_v23  ;;  %1813 = vmatprep.subr.bf16.mxu1 %v6002_v22  ;;  %v1683_v23 = vld [vmem:[#allocation2 + $0x30] sm:$0xff] }
 0x23b   :  { %3694 = vmatprep.mubr.bf16.mxu0 %v6340_v43  ;;  %3827 = vmatpush1.bf16.msra.mxu0 %v5997_v20  ;;  %v3810_v20 = vpack.c.bf16 %v3794_v16, %v3793_v15  ;;  %v6038_v15 = vld [vmem:[#allocation8 + $0x314] ss:$8 sps:$4 sm:$0xff]  }
 0x23c   :  { %3828 = vmatprep.subr.bf16.mxu0 %v6002_v22  ;;  %v6023_v22 = vld [vmem:[#allocation8 + $0x2c4] ss:$8 sps:$4 sm:$0xff]   ;;  %v3977_v16 = vld [vmem:[#allocation2 + $0xa1] sm:$0xff] }
 0x23d   :  { %1814 = vmatpush1.bf16.msra.mxu1 %v6000_v24 }
 0x23e   :  { %1815 = vmatprep.subr.bf16.mxu1 %v6005_v25 }
 0x23f   :  { %3829 = vmatpush1.bf16.msra.mxu0 %v6000_v24  ;;  %v1684_v24 = vld [vmem:[#allocation2 + $0x38] sm:$0xff] }
 0x240   :  { %1583 = vmatmul.mubr.bf16.gmra.mrb[32].mxu1 %v1417_v30  ;;  %3830 = vmatprep.subr.bf16.mxu0 %v6005_v25  ;;  %v3795_v25 = vld [vmem:[#allocation2 + $0xc0] sm:$0xff]  ;;  %v1699_v28 = vpack.c.bf16 %v1684_v24, %v1683_v23  ;;  %v6039_v24 = vld [vmem:[#allocation8 + $0x320] ss:$8 sps:$4 sm:$0xff]  }
 0x241   :  { %1592 = vmatprep.mubr.bf16.mxu1 %v6340_v43  ;;  %1816 = vmatpush1.bf16.msra.mxu1 %v6003_v29  ;;  %v3811_v30 = vpack.c.bf16 %v3796_v26, %v3795_v25  ;;  %v3980_v23 = vld [vmem:[#allocation2 + $0xb9] sm:$0xff]  ;;  %v6044_v26 = vld [vmem:[#allocation8 + $0x334] ss:$8 sps:$4 sm:$0xff]  }
 0x242   :  { %3695 = vmatmul.mubr.bf16.gmra.mrb[28].mxu0 %v3626_v33  ;;  %1817 = vmatprep.subr.bf16.mxu1 %v6008_v31  ;;  %v1685_v33 = vld [vmem:[#allocation2 + $0x40] sm:$0xff] }
 0x243   :  { %3704 = vmatprep.mubr.bf16.mxu0 %v6340_v43  ;;  %3831 = vmatpush1.bf16.msra.mxu0 %v6003_v29  ;;  %v6026_v29 = vld [vmem:[#allocation8 + $0x2d4] ss:$8 sps:$4 sm:$0xff]  }
 0x244   :  { %3832 = vmatprep.subr.bf16.mxu0 %v6008_v31  ;;  %v6024_v31 = vld [vmem:[#allocation8 + $0x2d0] ss:$8 sps:$4 sm:$0xff]  }
 0x245   :  { %1818 = vmatpush1.bf16.msra.mxu1 %v6006_v34 }
 0x246   :  { %2086 = vmatprep.subr.bf16.mxu1 %v6011_v35 }
 0x247   :  { %3833 = vmatpush1.bf16.msra.mxu0 %v6006_v34  ;;  %v1686_v34 = vld [vmem:[#allocation2 + $0x48] sm:$0xff] }
 0x248   :  { %1593 = vmatmul.mubr.bf16.gmra.mrb[36].mxu1 %v1418_v40  ;;  %4004 = vmatprep.subr.bf16.mxu0 %v6011_v35  ;;  %v3797_v35 = vld [vmem:[#allocation2 + $0xd0] sm:$0xff]  ;;  %v1700_v38 = vpack.c.bf16 %v1686_v34, %v1685_v33 }
 0x249   :  { %1602 = vmatprep.mubr.bf16.mxu1 %v6340_v43  ;;  %v3812_v40 = vpack.c.bf16 %v3798_v36, %v3797_v35  ;;  %v6045_v33 = vld [vmem:[#allocation8 + $0x340] ss:$8 sps:$4 sm:$0xff]   ;;  %v6050_v35 = vld [vmem:[#allocation8 + $0x354] ss:$8 sps:$4 sm:$0xff]  }
 0x24a   :  { %3705 = vmatmul.mubr.bf16.gmra.mrb[32].mxu0 %v3627_v41  ;;  %v6030_v41 = vld [vmem:[#allocation8 + $0x2f0] ss:$8 sps:$4 sm:$0xff]  }
 0x24b   :  { %3714 = vmatprep.mubr.bf16.mxu0 %v6340_v43  ;;  %v3981_v36 = vld [vmem:[#allocation2 + $0xc1] sm:$0xff] }
 0x250   :  { %1603 = vmatmul.mubr.bf16.gmra.mrb[40].mxu1 %v1419_v48  ;;  %v3800_v48 = vld [vmem:[#allocation2 + $0xe8] sm:$0xff] }
 0x251   :  { %1612 = vmatprep.mubr.bf16.mxu1 %v6340_v43  ;;  %v3813_v50 = vpack.c.bf16 %v3800_v48, %v3799_v47  ;;  %v6056_v48 = vld [vmem:[#allocation8 + $0x374] ss:$8 sps:$4 sm:$0xff]  }
 0x252   :  { %3715 = vmatmul.mubr.bf16.gmra.mrb[36].mxu0 %v3628_v49  ;;  %v1701_v49 = vpack.c.bf16 %v1688_v46, %v1687_v44  ;;  %v3984_v44 = vld [vmem:[#allocation2 + $0xd9] sm:$0xff] }
 0x253   :  { %3724 = vmatprep.mubr.bf16.mxu0 %v6340_v43  ;;  %v6051_v46 = vld [vmem:[#allocation8 + $0x360] ss:$8 sps:$4 sm:$0xff]  }
 0x258   :  { %1613 = vmatmul.mubr.bf16.gmra.mrb[44].mxu1 %v1420_v54  ;;  %v3802_v54 = vld [vmem:[#allocation2 + $0xf8] sm:$0xff] }
 0x259   :  { %1622 = vmatprep.mubr.bf16.mxu1 %v6340_v43  ;;  %v3814_v56 = vpack.c.bf16 %v3802_v54, %v3801_v53  ;;  %v1971_v53 = vld [vmem:[#allocation2 + $0x59] sm:$0xff]  ;;  %v3985_v54 = vld [vmem:[#allocation2 + $0xe1] sm:$0xff] }
 0x25a   :  { %3725 = vmatmul.mubr.bf16.gmra.mrb[40].mxu0 %v3629_v55  ;;  %v1702_v55 = vpack.c.bf16 %v1690_v52, %v1689_v51  ;;  %v6059_v51 = vld [vmem:[#allocation8 + $0x384] ss:$8 sps:$4 sm:$0xff]  }
 0x25b   :  { %3734 = vmatprep.mubr.bf16.mxu0 %v6340_v43  ;;  %v1970_v52 = vld [vmem:[#allocation2 + $0x51] sm:$0xff] }
 0x260   :  { %1623 = vmatmul.mubr.bf16.gmra.mrb[48].mxu1 %v1421_v60  ;;  %v3804_v60 = vld [vmem:[#allocation2 + $0x108] sm:$0xff] }
 0x261   :  { %1632 = vmatprep.mubr.bf16.mxu1 %v6340_v43  ;;  %v3815_v62 = vpack.c.bf16 %v3804_v60, %v3803_v59  ;;  %v1973_v59 = vld [vmem:[#allocation2 + $0x69] sm:$0xff]  ;;  %v3987_v60 = vld [vmem:[#allocation2 + $0xf1] sm:$0xff] }
 0x262   :  { %3735 = vmatmul.mubr.bf16.gmra.mrb[44].mxu0 %v3630_v61  ;;  %v1703_v61 = vpack.c.bf16 %v1692_v58, %v1691_v57  ;;  %v1972_v58 = vld [vmem:[#allocation2 + $0x61] sm:$0xff] }
 0x263   :  { %3744 = vmatprep.mubr.bf16.mxu0 %v6340_v43 }
 0x268   :  { %1633 = vmatmul.mubr.bf16.gmra.mrb[52].mxu1 %v1422_v2  ;;  %v3806_v2 = vld [vmem:[#allocation2 + $0x118] sm:$0xff] }
 0x269   :  { %1835 = vmatprep.mubr.bf16.mxu1 %v6340_v43  ;;  %v3816_v4 = vpack.c.bf16 %v3806_v2, %v3805_v1  ;;  %v1975_v1 = vld [vmem:[#allocation2 + $0x79] sm:$0xff]  ;;  %v3989_v2 = vld [vmem:[#allocation2 + $0x101] sm:$0xff] }
 0x26a   :  { %3745 = vmatmul.mubr.bf16.gmra.mrb[48].mxu0 %v3631_v3  ;;  %v1704_v3 = vpack.c.bf16 %v1694_v0, %v1693_v63  ;;  %v1974_v0 = vld [vmem:[#allocation2 + $0x71] sm:$0xff] }
 0x26b   :  { %3850 = vmatprep.mubr.bf16.mxu0 %v6340_v43 }
 0x270   :  { %1836 = vmatmul.mubr.bf16.vlgmr.msra.gmra.mrb[20].mxu1 %v1697_v8  ;;  %v3808_v8 = vld [vmem:[#allocation2 + $0x128] sm:$0xff] }
 0x271   :  { %2087 = vmatpush1.bf16.msra.mxu1 %v6009_v6  ;;  %1845 = vmatprep.mubr.bf16.mxu1 %v6340_v43  ;;  %v3817_v9 = vpack.c.bf16 %v3808_v8, %v3807_v7  ;;  %v1977_v7 = vld [vmem:[#allocation2 + $0x89] sm:$0xff]  ;;  %v3991_v8 = vld [vmem:[#allocation2 + $0x111] sm:$0xff] }
 0x272   :  { %3851 = vmatmul.mubr.bf16.vlgmr.msra.gmra.mrb[16].mxu0 %v3809_v10  ;;  %2088 = vmatprep.subr.bf16.mxu1 %v6014_v45  ;;  %v1962_v10 = vld [vmem:[#allocation2 + $0x11] sm:$0xff] }
 0x273   :  { %4005 = vmatpush1.bf16.msra.mxu0 %v6009_v6  ;;  %3860 = vmatprep.mubr.bf16.mxu0 %v6340_v43  ;;  %v1695_v6 = vld [vmem:[#allocation2 + $0x90] sm:$0xff] }
 0x274   :  { %4006 = vmatprep.subr.bf16.mxu0 %v6014_v45  ;;  %v1705_v45 = vpack.c.bf16 %v1696_v5, %v1695_v6  ;;  %v1976_v6 = vld [vmem:[#allocation2 + $0x81] sm:$0xff] }
 0x275   :  { %2089 = vmatpush1.bf16.msra.mxu1 %v6012_v11 }
 0x276   :  { %2090 = vmatprep.subr.bf16.mxu1 %v6017_v12 }
 0x277   :  { %4007 = vmatpush1.bf16.msra.mxu0 %v6012_v11  ;;  %v1963_v11 = vld [vmem:[#allocation2 + $0x19] sm:$0xff] }
 0x278   :  { %1846 = vmatmul.mubr.bf16.gmra.mrb[24].mxu1 %v1698_v18  ;;  %4008 = vmatprep.subr.bf16.mxu0 %v6017_v12  ;;  %v6033_v12 = vld [vmem:[#allocation8 + $0x300] ss:$8 sps:$4 sm:$0xff]   ;;  %v1980_v14 = vpack.c.bf16 %v1963_v11, %v1962_v10  ;;  %v6036_v18 = vld [vmem:[#allocation8 + $0x310] ss:$8 sps:$4 sm:$0xff]  }
 0x279   :  { %1855 = vmatprep.mubr.bf16.mxu1 %v6340_v43  ;;  %2091 = vmatpush1.bf16.msra.mxu1 %v6015_v17  ;;  %v1978_v11 = vld [vmem:[#allocation2 + $0x91] sm:$0xff] }
 0x27a   :  { %3861 = vmatmul.mubr.bf16.gmra.mrb[20].mxu0 %v3810_v20  ;;  %2092 = vmatprep.subr.bf16.mxu1 %v6020_v19  ;;  %v1965_v20 = vld [vmem:[#allocation2 + $0x29] sm:$0xff] }
 0x27b   :  { %3870 = vmatprep.mubr.bf16.mxu0 %v6340_v43  ;;  %4009 = vmatpush1.bf16.msra.mxu0 %v6015_v17  ;;  %v3995_v17 = vpack.c.bf16 %v3978_v13, %v3977_v16  ;;  %v3993_v13 = vld [vmem:[#allocation2 + $0x121] sm:$0xff] }
 0x27c   :  { %4010 = vmatprep.subr.bf16.mxu0 %v6020_v19  ;;  %v6041_v19 = vld [vmem:[#allocation8 + $0x324] ss:$8 sps:$4 sm:$0xff]  }
 0x27d   :  { %2093 = vmatpush1.bf16.msra.mxu1 %v6018_v21 }
 0x27e   :  { %2094 = vmatprep.subr.bf16.mxu1 %v6023_v22 }
 0x27f   :  { %4011 = vmatpush1.bf16.msra.mxu0 %v6018_v21  ;;  %v1964_v21 = vld [vmem:[#allocation2 + $0x21] sm:$0xff] }
 0x280   :  { %1856 = vmatmul.mubr.bf16.gmra.mrb[28].mxu1 %v1699_v28  ;;  %4012 = vmatprep.subr.bf16.mxu0 %v6023_v22  ;;  %v3979_v22 = vld [vmem:[#allocation2 + $0xb1] sm:$0xff]  ;;  %v1981_v25 = vpack.c.bf16 %v1965_v20, %v1964_v21  ;;  %v6042_v28 = vld [vmem:[#allocation8 + $0x330] ss:$8 sps:$4 sm:$0xff]  }
 0x281   :  { %1865 = vmatprep.mubr.bf16.mxu1 %v6340_v43  ;;  %2095 = vmatpush1.bf16.msra.mxu1 %v6021_v27  ;;  %v4164_v20 = vld [vmem:[#allocation2 + $0xb3] sm:$0xff] }
 0x282   :  { %3871 = vmatmul.mubr.bf16.gmra.mrb[24].mxu0 %v3811_v30  ;;  %2096 = vmatprep.subr.bf16.mxu1 %v6026_v29  ;;  %v1966_v30 = vld [vmem:[#allocation2 + $0x31] sm:$0xff] }
 0x283   :  { %3880 = vmatprep.mubr.bf16.mxu0 %v6340_v43  ;;  %4013 = vmatpush1.bf16.msra.mxu0 %v6021_v27  ;;  %v3996_v27 = vpack.c.bf16 %v3980_v23, %v3979_v22  ;;  %v6062_v22 = vld [vmem:[#allocation8 + $0x394] ss:$8 sps:$4 sm:$0xff]  }
 0x284   :  { %4014 = vmatprep.subr.bf16.mxu0 %v6026_v29  ;;  %v6047_v29 = vld [vmem:[#allocation8 + $0x344] ss:$8 sps:$4 sm:$0xff]   ;;  %v4163_v23 = vld [vmem:[#allocation2 + $0xab] sm:$0xff] }
 0x285   :  { %2097 = vmatpush1.bf16.msra.mxu1 %v6024_v31 }
 0x286   :  { %2098 = vmatprep.subr.bf16.mxu1 %v6029_v32 }
 0x287   :  { %4015 = vmatpush1.bf16.msra.mxu0 %v6024_v31  ;;  %v1967_v31 = vld [vmem:[#allocation2 + $0x39] sm:$0xff] }
 0x288   :  { %1866 = vmatmul.mubr.bf16.gmra.mrb[32].mxu1 %v1700_v38  ;;  %4016 = vmatprep.subr.bf16.mxu0 %v6029_v32  ;;  %v3982_v32 = vld [vmem:[#allocation2 + $0xc9] sm:$0xff]  ;;  %v1982_v34 = vpack.c.bf16 %v1967_v31, %v1966_v30 }
 0x289   :  { %1875 = vmatprep.mubr.bf16.mxu1 %v6340_v43  ;;  %2099 = vmatpush1.bf16.msra.mxu1 %v6027_v37  ;;  %v6048_v38 = vld [vmem:[#allocation8 + $0x350] ss:$8 sps:$4 sm:$0xff]   ;;  %v6063_v31 = vld [vmem:[#allocation8 + $0x3a0] ss:$8 sps:$4 sm:$0xff]  }
 0x28a   :  { %3881 = vmatmul.mubr.bf16.gmra.mrb[28].mxu0 %v3812_v40  ;;  %2100 = vmatprep.subr.bf16.mxu1 %v6032_v39  ;;  %v1968_v40 = vld [vmem:[#allocation2 + $0x41] sm:$0xff] }
 0x28b   :  { %3890 = vmatprep.mubr.bf16.mxu0 %v6340_v43  ;;  %4017 = vmatpush1.bf16.msra.mxu0 %v6027_v37  ;;  %v3997_v37 = vpack.c.bf16 %v3982_v32, %v3981_v36  ;;  %v4166_v30 = vld [vmem:[#allocation2 + $0xc3] sm:$0xff]  ;;  %v6071_v36 = vld [vmem:[#allocation8 + $0x3c4] ss:$8 sps:$4 sm:$0xff]  }
 0x28c   :  { %4018 = vmatprep.subr.bf16.mxu0 %v6032_v39  ;;  %v6053_v39 = vld [vmem:[#allocation8 + $0x364] ss:$8 sps:$4 sm:$0xff]  }
 0x28d   :  { %2101 = vmatpush1.bf16.msra.mxu1 %v6030_v41 }
 0x28e   :  { %2369 = vmatprep.subr.bf16.mxu1 %v6035_v42 }
 0x28f   :  { %4019 = vmatpush1.bf16.msra.mxu0 %v6030_v41  ;;  %v1969_v41 = vld [vmem:[#allocation2 + $0x49] sm:$0xff] }
 0x290   :  { %1876 = vmatmul.mubr.bf16.gmra.mrb[36].mxu1 %v1701_v49  ;;  %4190 = vmatprep.subr.bf16.mxu0 %v6035_v42  ;;  %v3983_v42 = vld [vmem:[#allocation2 + $0xd1] sm:$0xff]  ;;  %v1983_v47 = vpack.c.bf16 %v1969_v41, %v1968_v40 }
 0x291   :  { %1885 = vmatprep.mubr.bf16.mxu1 %v6340_v43  ;;  %v3998_v49 = vpack.c.bf16 %v3984_v44, %v3983_v42  ;;  %v6069_v40 = vld [vmem:[#allocation8 + $0x3c0] ss:$8 sps:$4 sm:$0xff]   ;;  %v6074_v42 = vld [vmem:[#allocation8 + $0x3d4] ss:$8 sps:$4 sm:$0xff]  }
 0x292   :  { %3891 = vmatmul.mubr.bf16.gmra.mrb[32].mxu0 %v3813_v50  ;;  %v6054_v50 = vld [vmem:[#allocation8 + $0x370] ss:$8 sps:$4 sm:$0xff]  }
 0x293   :  { %3900 = vmatprep.mubr.bf16.mxu0 %v6340_v43  ;;  %v4167_v44 = vld [vmem:[#allocation2 + $0xcb] sm:$0xff] }
 0x298   :  { %1886 = vmatmul.mubr.bf16.gmra.mrb[40].mxu1 %v1702_v55  ;;  %v3986_v55 = vld [vmem:[#allocation2 + $0xe9] sm:$0xff] }
 0x299   :  { %1895 = vmatprep.mubr.bf16.mxu1 %v6340_v43  ;;  %v3999_v57 = vpack.c.bf16 %v3986_v55, %v3985_v54  ;;  %v6080_v55 = vld [vmem:[#allocation8 + $0x3f4] ss:$8 sps:$4 sm:$0xff]  }
 0x29a   :  { %3901 = vmatmul.mubr.bf16.gmra.mrb[36].mxu0 %v3814_v56  ;;  %v1984_v56 = vpack.c.bf16 %v1971_v53, %v1970_v52  ;;  %v4170_v52 = vld [vmem:[#allocation2 + $0xe3] sm:$0xff]  ;;  %v6075_v53 = vld [vmem:[#allocation8 + $0x3e0] ss:$8 sps:$4 sm:$0xff]  }
 0x29b   :  { %3910 = vmatprep.mubr.bf16.mxu0 %v6340_v43 }
 0x2a0   :  { %1896 = vmatmul.mubr.bf16.gmra.mrb[44].mxu1 %v1703_v61  ;;  %v3988_v61 = vld [vmem:[#allocation2 + $0xf9] sm:$0xff] }
 0x2a1   :  { %1905 = vmatprep.mubr.bf16.mxu1 %v6340_v43  ;;  %v4000_v63 = vpack.c.bf16 %v3988_v61, %v3987_v60  ;;  %v2254_v60 = vld [vmem:[#allocation2 + $0x63] sm:$0xff]  ;;  %v4171_v61 = vld [vmem:[#allocation2 + $0xeb] sm:$0xff] }
 0x2a2   :  { %3911 = vmatmul.mubr.bf16.gmra.mrb[40].mxu0 %v3815_v62  ;;  %v1985_v62 = vpack.c.bf16 %v1973_v59, %v1972_v58  ;;  %v6083_v58 = vld [vmem:[#allocation8 + $0x404] ss:$8 sps:$4 sm:$0xff]  }
 0x2a3   :  { %3920 = vmatprep.mubr.bf16.mxu0 %v6340_v43  ;;  %v2253_v59 = vld [vmem:[#allocation2 + $0x5b] sm:$0xff] }
 0x2a8   :  { %1906 = vmatmul.mubr.bf16.gmra.mrb[48].mxu1 %v1704_v3  ;;  %v3990_v3 = vld [vmem:[#allocation2 + $0x109] sm:$0xff] }
 0x2a9   :  { %1915 = vmatprep.mubr.bf16.mxu1 %v6340_v43  ;;  %v4001_v5 = vpack.c.bf16 %v3990_v3, %v3989_v2  ;;  %v2256_v2 = vld [vmem:[#allocation2 + $0x73] sm:$0xff]  ;;  %v4173_v3 = vld [vmem:[#allocation2 + $0xfb] sm:$0xff] }
 0x2aa   :  { %3921 = vmatmul.mubr.bf16.gmra.mrb[44].mxu0 %v3816_v4  ;;  %v1986_v4 = vpack.c.bf16 %v1975_v1, %v1974_v0  ;;  %v2255_v1 = vld [vmem:[#allocation2 + $0x6b] sm:$0xff] }
 0x2ab   :  { %3930 = vmatprep.mubr.bf16.mxu0 %v6340_v43 }
 0x2b0   :  { %1916 = vmatmul.mubr.bf16.gmra.mrb[52].mxu1 %v1705_v45  ;;  %v3992_v45 = vld [vmem:[#allocation2 + $0x119] sm:$0xff] }
 0x2b1   :  { %2118 = vmatprep.mubr.bf16.mxu1 %v6340_v43  ;;  %v4002_v10 = vpack.c.bf16 %v3992_v45, %v3991_v8  ;;  %v2258_v8 = vld [vmem:[#allocation2 + $0x83] sm:$0xff]  ;;  %v4175_v45 = vld [vmem:[#allocation2 + $0x10b] sm:$0xff] }
 0x2b2   :  { %3931 = vmatmul.mubr.bf16.gmra.mrb[48].mxu0 %v3817_v9  ;;  %v1987_v9 = vpack.c.bf16 %v1977_v7, %v1976_v6  ;;  %v2257_v7 = vld [vmem:[#allocation2 + $0x7b] sm:$0xff] }
 0x2b3   :  { %4036 = vmatprep.mubr.bf16.mxu0 %v6340_v43 }
 0x2b8   :  { %2119 = vmatmul.mubr.bf16.vlgmr.msra.gmra.mrb[20].mxu1 %v1980_v14  ;;  %v3994_v14 = vld [vmem:[#allocation2 + $0x129] sm:$0xff] }
 0x2b9   :  { %2370 = vmatpush1.bf16.msra.mxu1 %v6033_v12  ;;  %2128 = vmatprep.mubr.bf16.mxu1 %v6340_v43  ;;  %v4003_v16 = vpack.c.bf16 %v3994_v14, %v3993_v13  ;;  %v2260_v13 = vld [vmem:[#allocation2 + $0x93] sm:$0xff]  ;;  %v4177_v14 = vld [vmem:[#allocation2 + $0x11b] sm:$0xff] }
 0x2ba   :  { %4037 = vmatmul.mubr.bf16.vlgmr.msra.gmra.mrb[16].mxu0 %v3995_v17  ;;  %2371 = vmatprep.subr.bf16.mxu1 %v6038_v15  ;;  %v2245_v17 = vld [vmem:[#allocation2 + $0x1b] sm:$0xff] }
 0x2bb   :  { %4191 = vmatpush1.bf16.msra.mxu0 %v6033_v12  ;;  %4046 = vmatprep.mubr.bf16.mxu0 %v6340_v43  ;;  %v1979_v12 = vld [vmem:[#allocation2 + $0x99] sm:$0xff] }
 0x2bc   :  { %4192 = vmatprep.subr.bf16.mxu0 %v6038_v15  ;;  %v1988_v15 = vpack.c.bf16 %v1979_v12, %v1978_v11  ;;  %v2259_v12 = vld [vmem:[#allocation2 + $0x8b] sm:$0xff] }
 0x2bd   :  { %2372 = vmatpush1.bf16.msra.mxu1 %v6036_v18 }
 0x2be   :  { %2373 = vmatprep.subr.bf16.mxu1 %v6041_v19 }
 0x2bf   :  { %4193 = vmatpush1.bf16.msra.mxu0 %v6036_v18  ;;  %v2246_v18 = vld [vmem:[#allocation2 + $0x23] sm:$0xff] }
 0x2c0   :  { %2129 = vmatmul.mubr.bf16.gmra.mrb[24].mxu1 %v1981_v25  ;;  %4194 = vmatprep.subr.bf16.mxu0 %v6041_v19  ;;  %v6057_v19 = vld [vmem:[#allocation8 + $0x380] ss:$8 sps:$4 sm:$0xff]   ;;  %v2263_v21 = vpack.c.bf16 %v2246_v18, %v2245_v17  ;;  %v6060_v25 = vld [vmem:[#allocation8 + $0x390] ss:$8 sps:$4 sm:$0xff]  }
 0x2c1   :  { %2138 = vmatprep.mubr.bf16.mxu1 %v6340_v43  ;;  %2374 = vmatpush1.bf16.msra.mxu1 %v6039_v24  ;;  %v2261_v18 = vld [vmem:[#allocation2 + $0x9b] sm:$0xff] }
 0x2c2   :  { %4047 = vmatmul.mubr.bf16.gmra.mrb[20].mxu0 %v3996_v27  ;;  %2375 = vmatprep.subr.bf16.mxu1 %v6044_v26  ;;  %v2248_v27 = vld [vmem:[#allocation2 + $0x33] sm:$0xff] }
 0x2c3   :  { %4056 = vmatprep.mubr.bf16.mxu0 %v6340_v43  ;;  %4195 = vmatpush1.bf16.msra.mxu0 %v6039_v24  ;;  %v4181_v24 = vpack.c.bf16 %v4164_v20, %v4163_v23  ;;  %v4179_v20 = vld [vmem:[#allocation2 + $0x12b] sm:$0xff] }
 0x2c4   :  { %4196 = vmatprep.subr.bf16.mxu0 %v6044_v26  ;;  %v6065_v26 = vld [vmem:[#allocation8 + $0x3a4] ss:$8 sps:$4 sm:$0xff]  }
 0x2c5   :  { %2376 = vmatpush1.bf16.msra.mxu1 %v6042_v28 }
 0x2c6   :  { %2377 = vmatprep.subr.bf16.mxu1 %v6047_v29 }
 0x2c7   :  { %4197 = vmatpush1.bf16.msra.mxu0 %v6042_v28  ;;  %v2247_v28 = vld [vmem:[#allocation2 + $0x2b] sm:$0xff] }
 0x2c8   :  { %2139 = vmatmul.mubr.bf16.gmra.mrb[28].mxu1 %v1982_v34  ;;  %4198 = vmatprep.subr.bf16.mxu0 %v6047_v29  ;;  %v4165_v29 = vld [vmem:[#allocation2 + $0xbb] sm:$0xff]  ;;  %v2264_v32 = vpack.c.bf16 %v2248_v27, %v2247_v28 }
 0x2c9   :  { %2148 = vmatprep.mubr.bf16.mxu1 %v6340_v43  ;;  %2378 = vmatpush1.bf16.msra.mxu1 %v6045_v33  ;;  %v4182_v34 = vpack.c.bf16 %v4166_v30, %v4165_v29  ;;  %v4350_v27 = vld [vmem:[#allocation2 + $0xb4] sm:$0xff]  ;;  %v6086_v29 = vld [vmem:[#allocation8 + $0x414] ss:$8 sps:$4 sm:$0xff]  }
 0x2ca   :  { %4057 = vmatmul.mubr.bf16.gmra.mrb[24].mxu0 %v3997_v37  ;;  %2379 = vmatprep.subr.bf16.mxu1 %v6050_v35  ;;  %v2249_v37 = vld [vmem:[#allocation2 + $0x3b] sm:$0xff]  ;;  %v4349_v30 = vld [vmem:[#allocation2 + $0xac] sm:$0xff] }
 0x2cb   :  { %4066 = vmatprep.mubr.bf16.mxu0 %v6340_v43  ;;  %4199 = vmatpush1.bf16.msra.mxu0 %v6045_v33  ;;  %v6068_v33 = vld [vmem:[#allocation8 + $0x3b4] ss:$8 sps:$4 sm:$0xff]  }
 0x2cc   :  { %4200 = vmatprep.subr.bf16.mxu0 %v6050_v35  ;;  %v6066_v35 = vld [vmem:[#allocation8 + $0x3b0] ss:$8 sps:$4 sm:$0xff]  }
 0x2cd   :  { %2380 = vmatpush1.bf16.msra.mxu1 %v6048_v38 }
 0x2ce   :  { %2381 = vmatprep.subr.bf16.mxu1 %v6053_v39 }
 0x2cf   :  { %4201 = vmatpush1.bf16.msra.mxu0 %v6048_v38  ;;  %v2250_v38 = vld [vmem:[#allocation2 + $0x43] sm:$0xff] }
 0x2d0   :  { %2149 = vmatmul.mubr.bf16.gmra.mrb[32].mxu1 %v1983_v47  ;;  %4202 = vmatprep.subr.bf16.mxu0 %v6053_v39  ;;  %v4168_v39 = vld [vmem:[#allocation2 + $0xd3] sm:$0xff]  ;;  %v2265_v41 = vpack.c.bf16 %v2250_v38, %v2249_v37  ;;  %v6072_v47 = vld [vmem:[#allocation8 + $0x3d0] ss:$8 sps:$4 sm:$0xff]  }
 0x2d1   :  { %2158 = vmatprep.mubr.bf16.mxu1 %v6340_v43  ;;  %2382 = vmatpush1.bf16.msra.mxu1 %v6051_v46  ;;  %v4352_v37 = vld [vmem:[#allocation2 + $0xc4] sm:$0xff]  ;;  %v6087_v38 = vld [vmem:[#allocation8 + $0x420] ss:$8 sps:$4 sm:$0xff]  }
 0x2d2   :  { %4067 = vmatmul.mubr.bf16.gmra.mrb[28].mxu0 %v3998_v49  ;;  %2383 = vmatprep.subr.bf16.mxu1 %v6056_v48  ;;  %v2251_v49 = vld [vmem:[#allocation2 + $0x4b] sm:$0xff] }
 0x2d3   :  { %4076 = vmatprep.mubr.bf16.mxu0 %v6340_v43  ;;  %4203 = vmatpush1.bf16.msra.mxu0 %v6051_v46  ;;  %v4183_v46 = vpack.c.bf16 %v4168_v39, %v4167_v44  ;;  %v6095_v44 = vld [vmem:[#allocation8 + $0x444] ss:$8 sps:$4 sm:$0xff]  }
 0x2d4   :  { %4204 = vmatprep.subr.bf16.mxu0 %v6056_v48  ;;  %v6077_v48 = vld [vmem:[#allocation8 + $0x3e4] ss:$8 sps:$4 sm:$0xff]  }
 0x2d5   :  { %2384 = vmatpush1.bf16.msra.mxu1 %v6054_v50 }
 0x2d6   :  { %2652 = vmatprep.subr.bf16.mxu1 %v6059_v51 }
 0x2d7   :  { %4205 = vmatpush1.bf16.msra.mxu0 %v6054_v50  ;;  %v2252_v50 = vld [vmem:[#allocation2 + $0x53] sm:$0xff] }
 0x2d8   :  { %2159 = vmatmul.mubr.bf16.gmra.mrb[36].mxu1 %v1984_v56  ;;  %4376 = vmatprep.subr.bf16.mxu0 %v6059_v51  ;;  %v4169_v51 = vld [vmem:[#allocation2 + $0xdb] sm:$0xff]  ;;  %v2266_v54 = vpack.c.bf16 %v2252_v50, %v2251_v49 }
 0x2d9   :  { %2168 = vmatprep.mubr.bf16.mxu1 %v6340_v43  ;;  %v4184_v56 = vpack.c.bf16 %v4170_v52, %v4169_v51  ;;  %v6093_v49 = vld [vmem:[#allocation8 + $0x440] ss:$8 sps:$4 sm:$0xff]   ;;  %v6098_v51 = vld [vmem:[#allocation8 + $0x454] ss:$8 sps:$4 sm:$0xff]  }
 0x2da   :  { %4077 = vmatmul.mubr.bf16.gmra.mrb[32].mxu0 %v3999_v57  ;;  %v6078_v57 = vld [vmem:[#allocation8 + $0x3f0] ss:$8 sps:$4 sm:$0xff]   ;;  %v4353_v52 = vld [vmem:[#allocation2 + $0xcc] sm:$0xff] }
 0x2db   :  { %4086 = vmatprep.mubr.bf16.mxu0 %v6340_v43 }
 0x2e0   :  { %2169 = vmatmul.mubr.bf16.gmra.mrb[40].mxu1 %v1985_v62  ;;  %v4172_v62 = vld [vmem:[#allocation2 + $0xf3] sm:$0xff] }
 0x2e1   :  { %2178 = vmatprep.mubr.bf16.mxu1 %v6340_v43  ;;  %v4185_v0 = vpack.c.bf16 %v4172_v62, %v4171_v61  ;;  %v6104_v62 = vld [vmem:[#allocation8 + $0x474] ss:$8 sps:$4 sm:$0xff]  }
 0x2e2   :  { %4087 = vmatmul.mubr.bf16.gmra.mrb[36].mxu0 %v4000_v63  ;;  %v2267_v63 = vpack.c.bf16 %v2254_v60, %v2253_v59  ;;  %v4356_v59 = vld [vmem:[#allocation2 + $0xe4] sm:$0xff]  ;;  %v6099_v60 = vld [vmem:[#allocation8 + $0x460] ss:$8 sps:$4 sm:$0xff]  }
 0x2e3   :  { %4096 = vmatprep.mubr.bf16.mxu0 %v6340_v43 }
 0x2e8   :  { %2179 = vmatmul.mubr.bf16.gmra.mrb[44].mxu1 %v1986_v4  ;;  %v4174_v4 = vld [vmem:[#allocation2 + $0x103] sm:$0xff] }
 0x2e9   :  { %2188 = vmatprep.mubr.bf16.mxu1 %v6340_v43  ;;  %v4186_v6 = vpack.c.bf16 %v4174_v4, %v4173_v3  ;;  %v4357_v3 = vld [vmem:[#allocation2 + $0xec] sm:$0xff]  ;;  %v4358_v4 = vld [vmem:[#allocation2 + $0xf4] sm:$0xff] }
 0x2ea   :  { %4097 = vmatmul.mubr.bf16.gmra.mrb[40].mxu0 %v4001_v5  ;;  %v2268_v5 = vpack.c.bf16 %v2256_v2, %v2255_v1  ;;  %v2536_v1 = vld [vmem:[#allocation2 + $0x5c] sm:$0xff]  ;;  %v2537_v2 = vld [vmem:[#allocation2 + $0x64] sm:$0xff] }
 0x2eb   :  { %4106 = vmatprep.mubr.bf16.mxu0 %v6340_v43 }
 0x2f0   :  { %2189 = vmatmul.mubr.bf16.gmra.mrb[48].mxu1 %v1987_v9  ;;  %v4176_v9 = vld [vmem:[#allocation2 + $0x113] sm:$0xff] }
 0x2f1   :  { %2198 = vmatprep.mubr.bf16.mxu1 %v6340_v43  ;;  %v4187_v11 = vpack.c.bf16 %v4176_v9, %v4175_v45  ;;  %v4359_v45 = vld [vmem:[#allocation2 + $0xfc] sm:$0xff]  ;;  %v4360_v9 = vld [vmem:[#allocation2 + $0x104] sm:$0xff] }
 0x2f2   :  { %4107 = vmatmul.mubr.bf16.gmra.mrb[44].mxu0 %v4002_v10  ;;  %v2269_v10 = vpack.c.bf16 %v2258_v8, %v2257_v7  ;;  %v2538_v7 = vld [vmem:[#allocation2 + $0x6c] sm:$0xff]  ;;  %v2539_v8 = vld [vmem:[#allocation2 + $0x74] sm:$0xff] }
 0x2f3   :  { %4116 = vmatprep.mubr.bf16.mxu0 %v6340_v43 }
 0x2f8   :  { %2199 = vmatmul.mubr.bf16.gmra.mrb[52].mxu1 %v1988_v15  ;;  %v4178_v15 = vld [vmem:[#allocation2 + $0x123] sm:$0xff] }
 0x2f9   :  { %2401 = vmatprep.mubr.bf16.mxu1 %v6340_v43  ;;  %v4188_v17 = vpack.c.bf16 %v4178_v15, %v4177_v14  ;;  %v4361_v14 = vld [vmem:[#allocation2 + $0x10c] sm:$0xff]  ;;  %v4362_v15 = vld [vmem:[#allocation2 + $0x114] sm:$0xff] }
 0x2fa   :  { %4117 = vmatmul.mubr.bf16.gmra.mrb[48].mxu0 %v4003_v16  ;;  %v2270_v16 = vpack.c.bf16 %v2260_v13, %v2259_v12  ;;  %v2540_v12 = vld [vmem:[#allocation2 + $0x7c] sm:$0xff]  ;;  %v2541_v13 = vld [vmem:[#allocation2 + $0x84] sm:$0xff] }
 0x2fb   :  { %4222 = vmatprep.mubr.bf16.mxu0 %v6340_v43 }
 0x300   :  { %2402 = vmatmul.mubr.bf16.vlgmr.msra.gmra.mrb[20].mxu1 %v2263_v21  ;;  %v4180_v21 = vld [vmem:[#allocation2 + $0x133] sm:$0xff] }
 0x301   :  { %2653 = vmatpush1.bf16.msra.mxu1 %v6057_v19  ;;  %2411 = vmatprep.mubr.bf16.mxu1 %v6340_v43  ;;  %v4189_v23 = vpack.c.bf16 %v4180_v21, %v4179_v20  ;;  %v4363_v20 = vld [vmem:[#allocation2 + $0x11c] sm:$0xff]  ;;  %v4364_v21 = vld [vmem:[#allocation2 + $0x124] sm:$0xff] }
 0x302   :  { %4223 = vmatmul.mubr.bf16.vlgmr.msra.gmra.mrb[16].mxu0 %v4181_v24  ;;  %2654 = vmatprep.subr.bf16.mxu1 %v6062_v22  ;;  %v2528_v24 = vld [vmem:[#allocation2 + $0x1c] sm:$0xff] }
 0x303   :  { %4377 = vmatpush1.bf16.msra.mxu0 %v6057_v19  ;;  %4232 = vmatprep.mubr.bf16.mxu0 %v6340_v43  ;;  %v2262_v19 = vld [vmem:[#allocation2 + $0xa3] sm:$0xff] }
 0x304   :  { %4378 = vmatprep.subr.bf16.mxu0 %v6062_v22  ;;  %v2271_v22 = vpack.c.bf16 %v2262_v19, %v2261_v18  ;;  %v2542_v18 = vld [vmem:[#allocation2 + $0x8c] sm:$0xff]  ;;  %v2543_v19 = vld [vmem:[#allocation2 + $0x94] sm:$0xff] }
 0x305   :  { %2655 = vmatpush1.bf16.msra.mxu1 %v6060_v25 }
 0x306   :  { %2656 = vmatprep.subr.bf16.mxu1 %v6065_v26 }
 0x307   :  { %4379 = vmatpush1.bf16.msra.mxu0 %v6060_v25  ;;  %v2529_v25 = vld [vmem:[#allocation2 + $0x24] sm:$0xff] }
 0x308   :  { %2412 = vmatmul.mubr.bf16.gmra.mrb[24].mxu1 %v2264_v32  ;;  %4380 = vmatprep.subr.bf16.mxu0 %v6065_v26  ;;  %v6081_v26 = vld [vmem:[#allocation8 + $0x400] ss:$8 sps:$4 sm:$0xff]   ;;  %v2546_v28 = vpack.c.bf16 %v2529_v25, %v2528_v24  ;;  %v6084_v32 = vld [vmem:[#allocation8 + $0x410] ss:$8 sps:$4 sm:$0xff]  }
 0x309   :  { %2421 = vmatprep.mubr.bf16.mxu1 %v6340_v43  ;;  %2657 = vmatpush1.bf16.msra.mxu1 %v6063_v31  ;;  %v2544_v24 = vld [vmem:[#allocation2 + $0x9c] sm:$0xff]  ;;  %v2545_v25 = vld [vmem:[#allocation2 + $0xa4] sm:$0xff] }
 0x30a   :  { %4233 = vmatmul.mubr.bf16.gmra.mrb[20].mxu0 %v4182_v34  ;;  %2658 = vmatprep.subr.bf16.mxu1 %v6068_v33  ;;  %v2531_v34 = vld [vmem:[#allocation2 + $0x34] sm:$0xff] }
 0x30b   :  { %4242 = vmatprep.mubr.bf16.mxu0 %v6340_v43  ;;  %4381 = vmatpush1.bf16.msra.mxu0 %v6063_v31  ;;  %v4367_v31 = vpack.c.bf16 %v4350_v27, %v4349_v30  ;;  %v4366_v27 = vld [vmem:[#allocation2 + $0x134] sm:$0xff]  ;;  %v2811_v30 = vld [vmem:[#allocation2 + $0x1d] sm:$0xff] }
 0x30c   :  { %4382 = vmatprep.subr.bf16.mxu0 %v6068_v33  ;;  %v6089_v33 = vld [vmem:[#allocation8 + $0x424] ss:$8 sps:$4 sm:$0xff]  }
 0x30d   :  { %2659 = vmatpush1.bf16.msra.mxu1 %v6066_v35 }
 0x30e   :  { %2660 = vmatprep.subr.bf16.mxu1 %v6071_v36 }
 0x30f   :  { %4383 = vmatpush1.bf16.msra.mxu0 %v6066_v35  ;;  %v2530_v35 = vld [vmem:[#allocation2 + $0x2c] sm:$0xff] }
 0x310   :  { %2422 = vmatmul.mubr.bf16.gmra.mrb[28].mxu1 %v2265_v41  ;;  %4384 = vmatprep.subr.bf16.mxu0 %v6071_v36  ;;  %v4351_v36 = vld [vmem:[#allocation2 + $0xbc] sm:$0xff]  ;;  %v2547_v39 = vpack.c.bf16 %v2531_v34, %v2530_v35  ;;  %v4535_v34 = vld [vmem:[#allocation2 + $0xad] sm:$0xff] }
 0x311   :  { %2431 = vmatprep.mubr.bf16.mxu1 %v6340_v43  ;;  %2661 = vmatpush1.bf16.msra.mxu1 %v6069_v40  ;;  %v4368_v41 = vpack.c.bf16 %v4352_v37, %v4351_v36  ;;  %v2814_v36 = vld [vmem:[#allocation2 + $0x35] sm:$0xff]  ;;  %v2813_v37 = vld [vmem:[#allocation2 + $0x2d] sm:$0xff] }
 0x312   :  { %4243 = vmatmul.mubr.bf16.gmra.mrb[24].mxu0 %v4183_v46  ;;  %2662 = vmatprep.subr.bf16.mxu1 %v6074_v42  ;;  %v2532_v46 = vld [vmem:[#allocation2 + $0x3c] sm:$0xff] }
 0x313   :  { %4252 = vmatprep.mubr.bf16.mxu0 %v6340_v43  ;;  %4385 = vmatpush1.bf16.msra.mxu0 %v6069_v40  ;;  %v6092_v40 = vld [vmem:[#allocation8 + $0x434] ss:$8 sps:$4 sm:$0xff]  }
 0x314   :  { %4386 = vmatprep.subr.bf16.mxu0 %v6074_v42  ;;  %v6090_v42 = vld [vmem:[#allocation8 + $0x430] ss:$8 sps:$4 sm:$0xff]  }
 0x315   :  { %2663 = vmatpush1.bf16.msra.mxu1 %v6072_v47 }
 0x316   :  { %2664 = vmatprep.subr.bf16.mxu1 %v6077_v48 }
 0x317   :  { %4387 = vmatpush1.bf16.msra.mxu0 %v6072_v47  ;;  %v2533_v47 = vld [vmem:[#allocation2 + $0x44] sm:$0xff] }
 0x318   :  { %2432 = vmatmul.mubr.bf16.gmra.mrb[32].mxu1 %v2266_v54  ;;  %4388 = vmatprep.subr.bf16.mxu0 %v6077_v48  ;;  %v4354_v48 = vld [vmem:[#allocation2 + $0xd4] sm:$0xff]  ;;  %v2548_v50 = vpack.c.bf16 %v2533_v47, %v2532_v46  ;;  %v6096_v54 = vld [vmem:[#allocation8 + $0x450] ss:$8 sps:$4 sm:$0xff]  }
 0x319   :  { %2441 = vmatprep.mubr.bf16.mxu1 %v6340_v43  ;;  %2665 = vmatpush1.bf16.msra.mxu1 %v6075_v53  ;;  %v4540_v46 = vld [vmem:[#allocation2 + $0xd5] sm:$0xff] }
 0x31a   :  { %4253 = vmatmul.mubr.bf16.gmra.mrb[28].mxu0 %v4184_v56  ;;  %2666 = vmatprep.subr.bf16.mxu1 %v6080_v55  ;;  %v2534_v56 = vld [vmem:[#allocation2 + $0x4c] sm:$0xff] }
 0x31b   :  { %4262 = vmatprep.mubr.bf16.mxu0 %v6340_v43  ;;  %4389 = vmatpush1.bf16.msra.mxu0 %v6075_v53  ;;  %v4369_v53 = vpack.c.bf16 %v4354_v48, %v4353_v52  ;;  %v4539_v48 = vld [vmem:[#allocation2 + $0xcd] sm:$0xff]  ;;  %v4541_v52 = vld [vmem:[#allocation2 + $0xdd] sm:$0xff] }
 0x31c   :  { %4390 = vmatprep.subr.bf16.mxu0 %v6080_v55  ;;  %v6101_v55 = vld [vmem:[#allocation8 + $0x464] ss:$8 sps:$4 sm:$0xff]  }
 0x31d   :  { %2667 = vmatpush1.bf16.msra.mxu1 %v6078_v57 }
 0x31e   :  { %2935 = vmatprep.subr.bf16.mxu1 %v6083_v58 }
 0x31f   :  { %4391 = vmatpush1.bf16.msra.mxu0 %v6078_v57  ;;  %v2535_v57 = vld [vmem:[#allocation2 + $0x54] sm:$0xff] }
 0x320   :  { %2442 = vmatmul.mubr.bf16.gmra.mrb[36].mxu1 %v2267_v63  ;;  %4562 = vmatprep.subr.bf16.mxu0 %v6083_v58  ;;  %v4355_v58 = vld [vmem:[#allocation2 + $0xdc] sm:$0xff]  ;;  %v2549_v61 = vpack.c.bf16 %v2535_v57, %v2534_v56  ;;  %v2820_v57 = vld [vmem:[#allocation2 + $0x65] sm:$0xff] }
 0x321   :  { %2451 = vmatprep.mubr.bf16.mxu1 %v6340_v43  ;;  %v4370_v63 = vpack.c.bf16 %v4356_v59, %v4355_v58  ;;  %v2819_v56 = vld [vmem:[#allocation2 + $0x5d] sm:$0xff]  ;;  %v4543_v58 = vld [vmem:[#allocation2 + $0xed] sm:$0xff]  ;;  %v4544_v59 = vld [vmem:[#allocation2 + $0xf5] sm:$0xff] }
 0x322   :  { %4263 = vmatmul.mubr.bf16.gmra.mrb[32].mxu0 %v4185_v0  ;;  %v6102_v0 = vld [vmem:[#allocation8 + $0x470] ss:$8 sps:$4 sm:$0xff]  }
 0x323   :  { %4272 = vmatprep.mubr.bf16.mxu0 %v6340_v43 }
 0x328   :  { %2452 = vmatmul.mubr.bf16.gmra.mrb[40].mxu1 %v2268_v5  ;;  %v2550_v5 = vpack.c.bf16 %v2537_v2, %v2536_v1  ;;  %v4546_v1 = vld [vmem:[#allocation2 + $0x105] sm:$0xff] }
 0x329   :  { %2461 = vmatprep.mubr.bf16.mxu1 %v6340_v43 }
 0x32a   :  { %4273 = vmatmul.mubr.bf16.gmra.mrb[36].mxu0 %v4186_v6  ;;  %v4371_v6 = vpack.c.bf16 %v4358_v4, %v4357_v3  ;;  %v2823_v4 = vld [vmem:[#allocation2 + $0x7d] sm:$0xff] }
 0x32b   :  { %4282 = vmatprep.mubr.bf16.mxu0 %v6340_v43 }
 0x330   :  { %2462 = vmatmul.mubr.bf16.gmra.mrb[44].mxu1 %v2269_v10  ;;  %v2551_v10 = vpack.c.bf16 %v2539_v8, %v2538_v7  ;;  %v4548_v7 = vld [vmem:[#allocation2 + $0x115] sm:$0xff] }
 0x331   :  { %2471 = vmatprep.mubr.bf16.mxu1 %v6340_v43 }
 0x332   :  { %4283 = vmatmul.mubr.bf16.gmra.mrb[40].mxu0 %v4187_v11  ;;  %v4372_v11 = vpack.c.bf16 %v4360_v9, %v4359_v45  ;;  %v2825_v9 = vld [vmem:[#allocation2 + $0x8d] sm:$0xff] }
 0x333   :  { %4292 = vmatprep.mubr.bf16.mxu0 %v6340_v43 }
 0x338   :  { %2472 = vmatmul.mubr.bf16.gmra.mrb[48].mxu1 %v2270_v16  ;;  %v2552_v16 = vpack.c.bf16 %v2541_v13, %v2540_v12  ;;  %v4550_v12 = vld [vmem:[#allocation2 + $0x125] sm:$0xff] }
 0x339   :  { %2481 = vmatprep.mubr.bf16.mxu1 %v6340_v43 }
 0x33a   :  { %4293 = vmatmul.mubr.bf16.gmra.mrb[44].mxu0 %v4188_v17  ;;  %v4373_v17 = vpack.c.bf16 %v4362_v15, %v4361_v14  ;;  %v2827_v15 = vld [vmem:[#allocation2 + $0x9d] sm:$0xff] }
 0x33b   :  { %4302 = vmatprep.mubr.bf16.mxu0 %v6340_v43 }
 0x340   :  { %2482 = vmatmul.mubr.bf16.gmra.mrb[52].mxu1 %v2271_v22  ;;  %v2553_v22 = vpack.c.bf16 %v2543_v19, %v2542_v18  ;;  %v4552_v18 = vld [vmem:[#allocation2 + $0x135] sm:$0xff] }
 0x341   :  { %2684 = vmatprep.mubr.bf16.mxu1 %v6340_v43 }
 0x342   :  { %4303 = vmatmul.mubr.bf16.gmra.mrb[48].mxu0 %v4189_v23  ;;  %v4374_v23 = vpack.c.bf16 %v4364_v21, %v4363_v20 }
 0x343   :  { %4408 = vmatprep.mubr.bf16.mxu0 %v6340_v43 }
 0x348   :  { %2685 = vmatmul.mubr.bf16.vlgmr.msra.gmra.mrb[20].mxu1 %v2546_v28  ;;  %v2554_v28 = vpack.c.bf16 %v2545_v25, %v2544_v24 }
 0x349   :  { %2936 = vmatpush1.bf16.msra.mxu1 %v6081_v26  ;;  %2694 = vmatprep.mubr.bf16.mxu1 %v6340_v43 }
 0x34a   :  { %4409 = vmatmul.mubr.bf16.vlgmr.msra.gmra.mrb[16].mxu0 %v4367_v31  ;;  %2937 = vmatprep.subr.bf16.mxu1 %v6086_v29  ;;  %v2812_v31 = vld [vmem:[#allocation2 + $0x25] sm:$0xff] }
 0x34b   :  { %4563 = vmatpush1.bf16.msra.mxu0 %v6081_v26  ;;  %4418 = vmatprep.mubr.bf16.mxu0 %v6340_v43  ;;  %v4365_v26 = vld [vmem:[#allocation2 + $0x12c] sm:$0xff] }
 0x34c   :  { %4564 = vmatprep.subr.bf16.mxu0 %v6086_v29  ;;  %v4375_v29 = vpack.c.bf16 %v4366_v27, %v4365_v26 }
 0x34d   :  { %2938 = vmatpush1.bf16.msra.mxu1 %v6084_v32 }
 0x34e   :  { %2939 = vmatprep.subr.bf16.mxu1 %v6089_v33 }
 0x34f   :  { %4565 = vmatpush1.bf16.msra.mxu0 %v6084_v32  ;;  %v4536_v32 = vld [vmem:[#allocation2 + $0xb5] sm:$0xff] }
 0x350   :  { %2695 = vmatmul.mubr.bf16.gmra.mrb[24].mxu1 %v2547_v39  ;;  %4566 = vmatprep.subr.bf16.mxu0 %v6089_v33  ;;  %v2829_v33 = vpack.c.bf16 %v2812_v31, %v2811_v30  ;;  %v4553_v35 = vpack.c.bf16 %v4536_v32, %v4535_v34  ;;  %v4538_v39 = vld [vmem:[#allocation2 + $0xc5] sm:$0xff] }
 0x351   :  { %2704 = vmatprep.mubr.bf16.mxu1 %v6340_v43  ;;  %2940 = vmatpush1.bf16.msra.mxu1 %v6087_v38 }
 0x352   :  { %4419 = vmatmul.mubr.bf16.gmra.mrb[20].mxu0 %v4368_v41  ;;  %2941 = vmatprep.subr.bf16.mxu1 %v6092_v40 }
 0x353   :  { %4428 = vmatprep.mubr.bf16.mxu0 %v6340_v43  ;;  %4567 = vmatpush1.bf16.msra.mxu0 %v6087_v38  ;;  %v4537_v38 = vld [vmem:[#allocation2 + $0xbd] sm:$0xff] }
 0x354   :  { %4568 = vmatprep.subr.bf16.mxu0 %v6092_v40  ;;  %v2830_v40 = vpack.c.bf16 %v2814_v36, %v2813_v37  ;;  %v4554_v41 = vpack.c.bf16 %v4538_v39, %v4537_v38 }
 0x355   :  { %2942 = vmatpush1.bf16.msra.mxu1 %v6090_v42 }
 0x356   :  { %2943 = vmatprep.subr.bf16.mxu1 %v6095_v44 }
 0x357   :  { %4569 = vmatpush1.bf16.msra.mxu0 %v6090_v42  ;;  %v2815_v42 = vld [vmem:[#allocation2 + $0x3d] sm:$0xff] }
 0x358   :  { %2705 = vmatmul.mubr.bf16.gmra.mrb[28].mxu1 %v2548_v50  ;;  %4570 = vmatprep.subr.bf16.mxu0 %v6095_v44  ;;  %v2816_v44 = vld [vmem:[#allocation2 + $0x45] sm:$0xff]  ;;  %v2817_v50 = vld [vmem:[#allocation2 + $0x4d] sm:$0xff] }
 0x359   :  { %2714 = vmatprep.mubr.bf16.mxu1 %v6340_v43  ;;  %2944 = vmatpush1.bf16.msra.mxu1 %v6093_v49  ;;  %v2831_v47 = vpack.c.bf16 %v2816_v44, %v2815_v42 }
 0x35a   :  { %4429 = vmatmul.mubr.bf16.gmra.mrb[24].mxu0 %v4369_v53  ;;  %2945 = vmatprep.subr.bf16.mxu1 %v6098_v51  ;;  %v4542_v53 = vld [vmem:[#allocation2 + $0xe5] sm:$0xff] }
 0x35b   :  { %4438 = vmatprep.mubr.bf16.mxu0 %v6340_v43  ;;  %4571 = vmatpush1.bf16.msra.mxu0 %v6093_v49  ;;  %v4555_v49 = vpack.c.bf16 %v4540_v46, %v4539_v48 }
 0x35c   :  { %4572 = vmatprep.subr.bf16.mxu0 %v6098_v51  ;;  %v2818_v51 = vld [vmem:[#allocation2 + $0x55] sm:$0xff] }
 0x35d   :  { %2946 = vmatpush1.bf16.msra.mxu1 %v6096_v54 }
 0x35e   :  { %2947 = vmatprep.subr.bf16.mxu1 %v6101_v55 }
 0x35f   :  { %4573 = vmatpush1.bf16.msra.mxu0 %v6096_v54  ;;  %v2832_v54 = vpack.c.bf16 %v2818_v51, %v2817_v50 }
 0x360   :  { %2715 = vmatmul.mubr.bf16.gmra.mrb[32].mxu1 %v2549_v61  ;;  %4574 = vmatprep.subr.bf16.mxu0 %v6101_v55  ;;  %v4556_v55 = vpack.c.bf16 %v4542_v53, %v4541_v52  ;;  %v4557_v61 = vpack.c.bf16 %v4544_v59, %v4543_v58  ;;  %v6652_v52 = vld [vmem:[%s6806_s4] ss:$0 sm:$0xff]  ;;  %s6341_s4 = smov [#allocation11]  }
 0x361   :  { %2724 = vmatprep.mubr.bf16.mxu1 %v6340_v43  ;;  %2948 = vmatpush1.bf16.msra.mxu1 %v6099_v60  ;;  %s4996_s23 = sshll.u32 %s6341_s4, 4  ;;  %s4997_s23 = int_to_ptr.vmem [resolvable:$true] %s4996_s23 }
 0x362   :  { %4439 = vmatmul.mubr.bf16.gmra.mrb[28].mxu0 %v4370_v63  ;;  %2949 = vmatprep.subr.bf16.mxu1 %v6104_v62  ;;  %v2822_v63 = vld [vmem:[#allocation2 + $0x75] sm:$0xff]  ;;  %s6301_s25 = scalar_lea.vmem %s4997_s23, 2304  ;;  %p6306_p5 = scmp.lt.s32.totalorder %s4997_s23, %s4997_s23 }
 0x363   :  { %4448 = vmatprep.mubr.bf16.mxu0 %v6340_v43  ;;  %4575 = vmatpush1.bf16.msra.mxu0 %v6099_v60  ;;  %v2833_v60 = vpack.c.bf16 %v2820_v57, %v2819_v56  ;;  %p6302_p4 = scmp.ne.s32.totalorder %s4997_s23, %s6301_s25  ;;  %p6307_p6 = scmp.lt.s32.totalorder %s6301_s25, %s6301_s25 }
 0x364   :  { %4576 = vmatprep.subr.bf16.mxu0 %v6104_v62  ;;  %v2821_v62 = vld [vmem:[#allocation2 + $0x6d] sm:$0xff] }
 0x365   :  { %2950 = vmatpush1.bf16.msra.mxu1 %v6102_v0  ;;  %v2834_v2 = vpack.c.bf16 %v2822_v63, %v2821_v62  ;;  %p6308_p7 = por %p6307_p6, %p6306_p5 }
 0x367   :  { %4577 = vmatpush1.bf16.msra.mxu0 %v6102_v0  ;;  %v4545_v0 = vld [vmem:[#allocation2 + $0xfd] sm:$0xff]  ;;  %p6309_p8 = pnand %p6308_p7, %p6302_p4 }
 0x368   :  { %2725 = vmatmul.mubr.bf16.gmra.mrb[36].mxu1 %v2550_v5  ;;  %v4558_v3 = vpack.c.bf16 %v4546_v1, %v4545_v0  ;;  %v2824_v5 = vld [vmem:[#allocation2 + $0x85] sm:$0xff] }
 0x369   :  { %2734 = vmatprep.mubr.bf16.mxu1 %v6340_v43  ;;  %v2835_v8 = vpack.c.bf16 %v2824_v5, %v2823_v4 }
 0x36a   :  { %4449 = vmatmul.mubr.bf16.gmra.mrb[32].mxu0 %v4371_v6  ;;  %v4547_v6 = vld [vmem:[#allocation2 + $0x10d] sm:$0xff] }
 0x36b   :  { %4458 = vmatprep.mubr.bf16.mxu0 %v6340_v43  ;;  %v4559_v45 = vpack.c.bf16 %v4548_v7, %v4547_v6 }
 0x370   :  { %2735 = vmatmul.mubr.bf16.gmra.mrb[40].mxu1 %v2551_v10  ;;  %v2826_v10 = vld [vmem:[#allocation2 + $0x95] sm:$0xff] }
 0x371   :  { %2744 = vmatprep.mubr.bf16.mxu1 %v6340_v43  ;;  %v2836_v13 = vpack.c.bf16 %v2826_v10, %v2825_v9 }
 0x372   :  { %4459 = vmatmul.mubr.bf16.gmra.mrb[36].mxu0 %v4372_v11  ;;  %v4549_v11 = vld [vmem:[#allocation2 + $0x11d] sm:$0xff] }
 0x373   :  { %4468 = vmatprep.mubr.bf16.mxu0 %v6340_v43  ;;  %v4560_v14 = vpack.c.bf16 %v4550_v12, %v4549_v11 }
 0x378   :  { %2745 = vmatmul.mubr.bf16.gmra.mrb[44].mxu1 %v2552_v16  ;;  %v2828_v16 = vld [vmem:[#allocation2 + $0xa5] sm:$0xff] }
 0x379   :  { %2754 = vmatprep.mubr.bf16.mxu1 %v6340_v43  ;;  %v2837_v19 = vpack.c.bf16 %v2828_v16, %v2827_v15 }
 0x37a   :  { %4469 = vmatmul.mubr.bf16.gmra.mrb[40].mxu0 %v4373_v17  ;;  %v4551_v17 = vld [vmem:[#allocation2 + $0x12d] sm:$0xff] }
 0x37b   :  { %4478 = vmatprep.mubr.bf16.mxu0 %v6340_v43  ;;  %v4561_v20 = vpack.c.bf16 %v4552_v18, %v4551_v17 }
 0x380   :  { %2755 = vmatmul.mubr.bf16.gmra.mrb[48].mxu1 %v2553_v22 }
 0x381   :  { %2764 = vmatprep.mubr.bf16.mxu1 %v6340_v43 }
 0x382   :  { %4479 = vmatmul.mubr.bf16.gmra.mrb[44].mxu0 %v4374_v23 }
 0x383   :  { %4488 = vmatprep.mubr.bf16.mxu0 %v6340_v43 }
 0x388   :  { %2765 = vmatmul.mubr.bf16.gmra.mrb[52].mxu1 %v2554_v28 }
 0x389   :  { %2967 = vmatprep.mubr.bf16.mxu1 %v6340_v43 }
 0x38a   :  { %4489 = vmatmul.mubr.bf16.gmra.mrb[48].mxu0 %v4375_v29 }
 0x38b   :  { %4594 = vmatprep.mubr.bf16.mxu0 %v6340_v43 }
 0x390   :  { %2968 = vmatmul.mubr.bf16.vlgmr.msra.gmra.mrb[20].mxu1 %v2829_v33 }
 0x391   :  { %2977 = vmatprep.mubr.bf16.mxu1 %v6340_v43 }
 0x392   :  { %4595 = vmatmul.mubr.bf16.vlgmr.msra.gmra.mrb[16].mxu0 %v4553_v35 }
 0x393   :  { %4604 = vmatprep.mubr.bf16.mxu0 %v6340_v43 }
 0x398   :  { %2978 = vmatmul.mubr.bf16.gmra.mrb[24].mxu1 %v2830_v40 }
 0x399   :  { %2987 = vmatprep.mubr.bf16.mxu1 %v6340_v43 }
 0x39a   :  { %4605 = vmatmul.mubr.bf16.gmra.mrb[20].mxu0 %v4554_v41 }
 0x39b   :  { %4614 = vmatprep.mubr.bf16.mxu0 %v6340_v43 }
 0x3a0   :  { %2988 = vmatmul.mubr.bf16.gmra.mrb[28].mxu1 %v2831_v47 }
 0x3a1   :  { %2997 = vmatprep.mubr.bf16.mxu1 %v6340_v43 }
 0x3a2   :  { %4615 = vmatmul.mubr.bf16.gmra.mrb[24].mxu0 %v4555_v49 }
 0x3a3   :  { %4624 = vmatprep.mubr.bf16.mxu0 %v6340_v43 }
 0x3a8   :  { %2998 = vmatmul.mubr.bf16.gmra.mrb[32].mxu1 %v2832_v54 }
 0x3a9   :  { %3007 = vmatprep.mubr.bf16.mxu1 %v6340_v43 }
 0x3aa   :  { %4625 = vmatmul.mubr.bf16.gmra.mrb[28].mxu0 %v4556_v55 }
 0x3ab   :  { %4634 = vmatprep.mubr.bf16.mxu0 %v6340_v43 }
 0x3b0   :  { %3008 = vmatmul.mubr.bf16.gmra.mrb[36].mxu1 %v2833_v60 }
 0x3b1   :  { %3017 = vmatprep.mubr.bf16.mxu1 %v6340_v43 }
 0x3b2   :  { %4635 = vmatmul.mubr.bf16.gmra.mrb[32].mxu0 %v4557_v61 }
 0x3b3   :  { %4644 = vmatprep.mubr.bf16.mxu0 %v6340_v43 }
 0x3b8   :  { %3018 = vmatmul.mubr.bf16.gmra.mrb[40].mxu1 %v2834_v2 }
 0x3b9   :  { %3027 = vmatprep.mubr.bf16.mxu1 %v6340_v43 }
 0x3ba   :  { %4645 = vmatmul.mubr.bf16.gmra.mrb[36].mxu0 %v4558_v3 }
 0x3bb   :  { %4654 = vmatprep.mubr.bf16.mxu0 %v6340_v43 }
 0x3c0   :  { %3028 = vmatmul.mubr.bf16.gmra.mrb[44].mxu1 %v2835_v8 }
 0x3c1   :  { %3037 = vmatprep.mubr.bf16.mxu1 %v6340_v43 }
 0x3c2   :  { %4655 = vmatmul.mubr.bf16.gmra.mrb[40].mxu0 %v4559_v45 }
 0x3c3   :  { %4664 = vmatprep.mubr.bf16.mxu0 %v6340_v43 }
 0x3c8   :  { %3038 = vmatmul.mubr.bf16.gmra.mrb[48].mxu1 %v2836_v13 }
 0x3c9   :  { %3047 = vmatprep.mubr.bf16.mxu1 %v6340_v43 }
 0x3ca   :  { %4665 = vmatmul.mubr.bf16.gmra.mrb[44].mxu0 %v4560_v14 }
 0x3cb   :  { %4674 = vmatprep.mubr.bf16.mxu0 %v6340_v43 }
 0x3d0   :  { %3048 = vmatmul.mubr.bf16.gmra.mrb[52].mxu1 %v2837_v19 }
 0x3d2   :  { %4675 = vmatmul.mubr.bf16.gmra.mrb[48].mxu0 %v4561_v20 }
 0x463   :  { %v2969_v21 = vpop.f32.mrb[20].mxu1 }
 0x464   :  { %v2971_v22 = vpop.f32.mrb[21].mxu1  ;;  %v3101_v63 = vadd.f32 %v6652_v52, %v2969_v21 }
 0x465   :  { %v2973_v23 = vpop.f32.mrb[22].mxu1  ;;  %v4596_v24 = vpop.f32.mrb[16].mxu0 }
 0x466   :  { %v2975_v25 = vpop.f32.mrb[23].mxu1  ;;  %v4598_v26 = vpop.f32.mrb[17].mxu0  ;;  %v4721_v3 = vadd.f32 %v6652_v52, %v4596_v24  ;;  %v3102_v7 = vadd.f32 %v6652_v52, %v2973_v23 }
 0x467   :  { %v4739_v27 = vmax.f32 %v2971_v22, %v4598_v26  ;;  %v4600_v28 = vpop.f32.mrb[18].mxu0 }
 0x468   :  { %v4602_v29 = vpop.f32.mrb[19].mxu0  ;;  %v4722_v45 = vadd.f32 %v6652_v52, %v4600_v28 }
 0x469   :  { %v4757_v30 = vsub.f32 %v2971_v22, %v4739_v27  ;;  %v4811_v31 = vsub.f32 %v4598_v26, %v4739_v27  ;;  %v4740_v32 = vmax.f32 %v2975_v25, %v4602_v29 }
 0x46b   :  { %v4775_v33 = vmul.f32 1.442695, %v4757_v30  ;;  %v4829_v43 = vmul.f32 1.442695, %v4811_v31  ;;  %v4758_v34 = vsub.f32 %v2975_v25, %v4740_v32  ;;  %v4812_v35 = vsub.f32 %v4602_v29, %v4740_v32  ;;  %v6641_v36 = vpop.f32.mrb[24].mxu1 }
 0x46c   :  { %v2981_v37 = vpop.f32.mrb[25].mxu1  ;;  %v3103_v30 = vadd.f32 %v6652_v52, %v6641_v36 }
 0x46d   :  { %6105 = vpow2.f32 %v4775_v33  ;;  %v4777_v38 = vmul.f32 1.442695, %v4758_v34  ;;  %v4831_v39 = vmul.f32 1.442695, %v4812_v35  ;;  %v6643_v40 = vpop.f32.mrb[26].mxu1  ;;  %v6645_v41 = vpop.f32.mrb[20].mxu0 }
 0x46e   :  { %6107 = vpow2.f32 %v4829_v43  ;;  %v2985_v42 = vpop.f32.mrb[27].mxu1  ;;  %v4608_v44 = vpop.f32.mrb[21].mxu0  ;;  %v4723_v35 = vadd.f32 %v6652_v52, %v6645_v41 }
 0x46f   :  { %6109 = vpow2.f32 %v4777_v38  ;;  %v4741_v46 = vmax.f32 %v2981_v37, %v4608_v44  ;;  %v6647_v47 = vpop.f32.mrb[22].mxu0 }
 0x470   :  { %6111 = vpow2.f32 %v4831_v39  ;;  %v4612_v48 = vpop.f32.mrb[23].mxu0  ;;  %v4724_v36 = vadd.f32 %v6652_v52, %v6647_v47 }
 0x471   :  { %v4759_v49 = vsub.f32 %v2981_v37, %v4741_v46  ;;  %v4813_v50 = vsub.f32 %v4608_v44, %v4741_v46  ;;  %v4742_v51 = vmax.f32 %v2985_v42, %v4612_v48 }
 0x473   :  { %v4779_v53 = vmul.f32 1.442695, %v4759_v49  ;;  %v4833_v54 = vmul.f32 1.442695, %v4813_v50  ;;  %v4760_v55 = vsub.f32 %v2985_v42, %v4742_v51  ;;  %v4814_v56 = vsub.f32 %v4612_v48, %v4742_v51  ;;  %v6654_v57 = vpop.f32.mrb[28].mxu1 }
 0x474   :  { %v2991_v58 = vpop.f32.mrb[29].mxu1  ;;  %v3104_v42 = vadd.f32 %v6652_v52, %v6643_v40 }
 0x475   :  { %6113 = vpow2.f32 %v4779_v53  ;;  %v4781_v59 = vmul.f32 1.442695, %v4760_v55  ;;  %v4835_v60 = vmul.f32 1.442695, %v4814_v56  ;;  %v6656_v61 = vpop.f32.mrb[30].mxu1  ;;  %v6658_v62 = vpop.f32.mrb[24].mxu0 }
 0x476   :  { %6115 = vpow2.f32 %v4833_v54  ;;  %v2995_v0 = vpop.f32.mrb[31].mxu1  ;;  %v4618_v1 = vpop.f32.mrb[25].mxu0 }
 0x477   :  { %v6106_v2 = vpop.eup %6105  ;;  %6117 = vpow2.f32 %v4781_v59  ;;  %v4743_v4 = vmax.f32 %v2991_v58, %v4618_v1  ;;  %v6662_v5 = vpop.f32.mrb[26].mxu0 }
 0x478   :  { %v6108_v6 = vpop.eup %6107  ;;  %v4865_v8 = vmul.f32 %v6106_v2, %v3101_v63  ;;  %6119 = vpow2.f32 %v4835_v60  ;;  %v4622_v9 = vpop.f32.mrb[27].mxu0 }
 0x479   :  { %v6110_v10 = vpop.eup %6109  ;;  %v4883_v11 = vmul.f32 %v6108_v6, %v4721_v3  ;;  %v4919_v12 = vadd.f32 %v6108_v6, %v6106_v2  ;;  %v4761_v13 = vsub.f32 %v2991_v58, %v4743_v4  ;;  %v4815_v14 = vsub.f32 %v4618_v1, %v4743_v4 }
 0x47a   :  { %v6112_v15 = vpop.eup %6111  ;;  %v4866_v16 = vmul.f32 %v6110_v10, %v3102_v7  ;;  %v4744_v17 = vmax.f32 %v2995_v0, %v4622_v9 }
 0x47b   :  { %v4901_v18 = vadd.f32 %v4883_v11, %v4865_v8  ;;  %6121 = vrcp.f32 %v4919_v12  ;;  %v4884_v19 = vmul.f32 %v6112_v15, %v4722_v45  ;;  %v4920_v20 = vadd.f32 %v6112_v15, %v6110_v10  ;;  %v6666_v21 = vpop.f32.mrb[32].mxu1 }
 0x47c   :  { %v4783_v22 = vmul.f32 1.442695, %v4761_v13  ;;  %v4837_v23 = vmul.f32 1.442695, %v4815_v14  ;;  %v4762_v24 = vsub.f32 %v2995_v0, %v4744_v17  ;;  %v4816_v25 = vsub.f32 %v4622_v9, %v4744_v17  ;;  %v3001_v26 = vpop.f32.mrb[33].mxu1 }
 0x47d   :  { %v4902_v27 = vadd.f32 %v4884_v19, %v4866_v16  ;;  %6123 = vrcp.f32 %v4920_v20  ;;  %v6668_v28 = vpop.f32.mrb[34].mxu1  ;;  %v6670_v29 = vpop.f32.mrb[28].mxu0  ;;  %v3105_v12 = vadd.f32 %v6652_v52, %v6654_v57  ;;  %v3106_v17 = vadd.f32 %v6652_v52, %v6656_v61 }
 0x47e   :  { %6125 = vpow2.f32 %v4783_v22  ;;  %v4785_v31 = vmul.f32 1.442695, %v4762_v24  ;;  %v4839_v32 = vmul.f32 1.442695, %v4816_v25  ;;  %v3005_v33 = vpop.f32.mrb[35].mxu1  ;;  %v4628_v43 = vpop.f32.mrb[29].mxu0 }
 0x47f   :  { %v6114_v34 = vpop.eup %6113  ;;  %6127 = vpow2.f32 %v4837_v23  ;;  %v4745_v37 = vmax.f32 %v3001_v26, %v4628_v43  ;;  %v6676_v38 = vpop.f32.mrb[30].mxu0 }
 0x480   :  { %v6116_v39 = vpop.eup %6115  ;;  %v4867_v44 = vmul.f32 %v6114_v34, %v3103_v30  ;;  %6129 = vpow2.f32 %v4785_v31  ;;  %v4632_v46 = vpop.f32.mrb[31].mxu0 }
 0x481   :  { %v6118_v48 = vpop.eup %6117  ;;  %v4885_v49 = vmul.f32 %v6116_v39, %v4723_v35  ;;  %v4921_v50 = vadd.f32 %v6116_v39, %v6114_v34  ;;  %6131 = vpow2.f32 %v4839_v32  ;;  %v4763_v51 = vsub.f32 %v3001_v26, %v4745_v37 }
 0x482   :  { %v6120_v41 = vpop.eup %6119  ;;  %v4868_v53 = vmul.f32 %v6118_v48, %v3104_v42  ;;  %v4817_v54 = vsub.f32 %v4628_v43, %v4745_v37  ;;  %v4746_v55 = vmax.f32 %v3005_v33, %v4632_v46 }
 0x483   :  { %v4903_v56 = vadd.f32 %v4885_v49, %v4867_v44  ;;  %6133 = vrcp.f32 %v4921_v50  ;;  %v4886_v58 = vmul.f32 %v6120_v41, %v4724_v36  ;;  %v4922_v59 = vadd.f32 %v6120_v41, %v6118_v48  ;;  %v6682_v40 = vpop.f32.mrb[36].mxu1 }
 0x484   :  { %v4787_v60 = vmul.f32 1.442695, %v4763_v51  ;;  %v4841_v63 = vmul.f32 1.442695, %v4817_v54  ;;  %v4764_v47 = vsub.f32 %v3005_v33, %v4746_v55  ;;  %v4818_v0 = vsub.f32 %v4632_v46, %v4746_v55  ;;  %v3011_v1 = vpop.f32.mrb[37].mxu1 }
 0x485   :  { %v6122_v2 = vpop.eup %6121  ;;  %v4904_v3 = vadd.f32 %v4886_v58, %v4868_v53  ;;  %6135 = vrcp.f32 %v4922_v59  ;;  %v6684_v4 = vpop.f32.mrb[38].mxu1  ;;  %v3107_v41 = vadd.f32 %v6652_v52, %v6666_v21  ;;  %v4728_v21 = vadd.f32 %v6652_v52, %v6676_v38 }
 0x486   :  { %v6686_v6 = vpop.f32.mrb[32].mxu0  ;;  %v4955_v7 = vmul.f32 %v6122_v2, %v4901_v18  ;;  %6137 = vpow2.f32 %v4787_v60  ;;  %v4789_v8 = vmul.f32 1.442695, %v4764_v47  ;;  %v4843_v45 = vmul.f32 1.442695, %v4818_v0  ;;  %v3015_v9 = vpop.f32.mrb[39].mxu1 }
 0x487   :  { %v4638_v10 = vpop.f32.mrb[33].mxu0  ;;  %v6124_v11 = vpop.eup %6123  ;;  %6139 = vpow2.f32 %v4841_v63  ;;  %v4725_v18 = vadd.f32 %v6652_v52, %v6658_v62  ;;  %v3108_v60 = vadd.f32 %v6652_v52, %v6668_v28 }
 0x488   :  { %v4747_v13 = vmax.f32 %v3011_v1, %v4638_v10  ;;  %v6690_v14 = vpop.f32.mrb[34].mxu0  ;;  %v6126_v15 = vpop.eup %6125  ;;  %4973 = vst [vmem:[#allocation11] sm:$0xff] %v4955_v7  ;;  %v4956_v16 = vmul.f32 %v6124_v11, %v4902_v27  ;;  %6141 = vpow2.f32 %v4789_v8  ;;  %v4726_v27 = vadd.f32 %v6652_v52, %v6662_v5 }
 0x489   :  { %v4642_v19 = vpop.f32.mrb[35].mxu0  ;;  %v6128_v20 = vpop.eup %6127  ;;  %v4869_v22 = vmul.f32 %v6126_v15, %v3105_v12  ;;  %6143 = vpow2.f32 %v4843_v45 }
 0x48a   :  { %v4765_v23 = vsub.f32 %v3011_v1, %v4747_v13  ;;  %v4819_v57 = vsub.f32 %v4638_v10, %v4747_v13  ;;  %v6130_v24 = vpop.eup %6129  ;;  %4974 = vst [vmem:[#allocation11 + $0x8] sm:$0xff] %v4956_v16  ;;  %v4887_v25 = vmul.f32 %v6128_v20, %v4725_v18  ;;  %v4923_v26 = vadd.f32 %v6128_v20, %v6126_v15 }
 0x48b   :  { %v4748_v30 = vmax.f32 %v3015_v9, %v4642_v19  ;;  %v6132_v31 = vpop.eup %6131  ;;  %v4870_v61 = vmul.f32 %v6130_v24, %v3106_v17  ;;  %v6698_v62 = vpop.f32.mrb[40].mxu1 }
 0x48c   :  { %v4791_v32 = vmul.f32 1.442695, %v4765_v23  ;;  %v4845_v33 = vmul.f32 1.442695, %v4819_v57  ;;  %v4905_v43 = vadd.f32 %v4887_v25, %v4869_v22  ;;  %6145 = vrcp.f32 %v4923_v26  ;;  %v3021_v37 = vpop.f32.mrb[41].mxu1 }
 0x48d   :  { %v4888_v34 = vmul.f32 %v6132_v31, %v4726_v27  ;;  %v4924_v35 = vadd.f32 %v6132_v31, %v6130_v24  ;;  %v6134_v39 = vpop.eup %6133  ;;  %v4766_v42 = vsub.f32 %v3015_v9, %v4748_v30  ;;  %v4820_v44 = vsub.f32 %v4642_v19, %v4748_v30  ;;  %v6700_v36 = vpop.f32.mrb[42].mxu1 }
 0x48e   :  { %6147 = vpow2.f32 %v4791_v32  ;;  %v6702_v46 = vpop.f32.mrb[36].mxu0  ;;  %v4957_v5 = vmul.f32 %v6134_v39, %v4903_v56  ;;  %v3025_v49 = vpop.f32.mrb[43].mxu1  ;;  %v4727_v56 = vadd.f32 %v6652_v52, %v6670_v29  ;;  %v3109_v23 = vadd.f32 %v6652_v52, %v6682_v40 }
 0x48f   :  { %v4906_v48 = vadd.f32 %v4888_v34, %v4870_v61  ;;  %6149 = vrcp.f32 %v4924_v35  ;;  %v4648_v50 = vpop.f32.mrb[37].mxu0  ;;  %v6136_v51 = vpop.eup %6135  ;;  %v4793_v53 = vmul.f32 1.442695, %v4766_v42  ;;  %v4847_v54 = vmul.f32 1.442695, %v4820_v44 }
 0x490   :  { %6151 = vpow2.f32 %v4845_v33  ;;  %v6706_v55 = vpop.f32.mrb[38].mxu0  ;;  %v6138_v58 = vpop.eup %6137  ;;  %4975 = vst [vmem:[#allocation11 + $0x10] sm:$0xff] %v4957_v5  ;;  %v4958_v59 = vmul.f32 %v6136_v51, %v4904_v3  ;;  %v4749_v63 = vmax.f32 %v3021_v37, %v4648_v50  ;;  %v4729_v32 = vadd.f32 %v6652_v52, %v6686_v6 }
 0x491   :  { %v4652_v47 = vpop.f32.mrb[39].mxu0  ;;  %v6140_v0 = vpop.eup %6139  ;;  %v4871_v1 = vmul.f32 %v6138_v58, %v3107_v41  ;;  %6153 = vpow2.f32 %v4793_v53  ;;  %v3110_v39 = vadd.f32 %v6652_v52, %v6684_v4  ;;  %v4730_v6 = vadd.f32 %v6652_v52, %v6690_v14 }
 0x492   :  { %v4750_v2 = vmax.f32 %v3025_v49, %v4652_v47  ;;  %v6142_v7 = vpop.eup %6141  ;;  %4976 = vst [vmem:[#allocation11 + $0x18] sm:$0xff] %v4958_v59  ;;  %v4889_v8 = vmul.f32 %v6140_v0, %v4727_v56  ;;  %v4925_v45 = vadd.f32 %v6140_v0, %v6138_v58  ;;  %6155 = vpow2.f32 %v4847_v54 }
 0x493   :  { %v4767_v3 = vsub.f32 %v3021_v37, %v4749_v63  ;;  %v6144_v9 = vpop.eup %6143  ;;  %v4872_v28 = vmul.f32 %v6142_v7, %v3108_v60  ;;  %v4821_v10 = vsub.f32 %v4648_v50, %v4749_v63  ;;  %v6714_v12 = vpop.f32.mrb[44].mxu1 }
 0x494   :  { %v4768_v11 = vsub.f32 %v3025_v49, %v4750_v2  ;;  %v4822_v29 = vsub.f32 %v4652_v47, %v4750_v2  ;;  %v4907_v13 = vadd.f32 %v4889_v8, %v4871_v1  ;;  %6157 = vrcp.f32 %v4925_v45  ;;  %v3031_v38 = vpop.f32.mrb[45].mxu1 }
 0x495   :  { %v4890_v15 = vmul.f32 %v6144_v9, %v4728_v21  ;;  %v4926_v16 = vadd.f32 %v6144_v9, %v6142_v7  ;;  %v4795_v17 = vmul.f32 1.442695, %v4767_v3  ;;  %v4849_v18 = vmul.f32 1.442695, %v4821_v10  ;;  %v6720_v24 = vpop.f32.mrb[46].mxu1  ;;  %v6722_v25 = vpop.f32.mrb[40].mxu0 }
 0x496   :  { %v4797_v19 = vmul.f32 1.442695, %v4768_v11  ;;  %v6146_v20 = vpop.eup %6145  ;;  %v4851_v57 = vmul.f32 1.442695, %v4822_v29  ;;  %v3035_v30 = vpop.f32.mrb[47].mxu1  ;;  %v3111_v1 = vadd.f32 %v6652_v52, %v6698_v62  ;;  %v3112_v21 = vadd.f32 %v6652_v52, %v6700_v36 }
 0x497   :  { %v6716_v22 = vadd.f32 %v4890_v15, %v4872_v28  ;;  %6159 = vrcp.f32 %v4926_v16  ;;  %v4959_v27 = vmul.f32 %v6146_v20, %v4905_v43  ;;  %v4658_v31 = vpop.f32.mrb[41].mxu0  ;;  %v4731_v11 = vadd.f32 %v6652_v52, %v6702_v46 }
 0x498   :  { %v6148_v26 = vpop.eup %6147  ;;  %6161 = vpow2.f32 %v4795_v17  ;;  %v4751_v34 = vmax.f32 %v3031_v38, %v4658_v31  ;;  %v6726_v35 = vpop.f32.mrb[42].mxu0 }
 0x499   :  { %v6150_v61 = vpop.eup %6149  ;;  %v4873_v33 = vmul.f32 %v6148_v26, %v3109_v23  ;;  %6163 = vpow2.f32 %v4849_v18  ;;  %4977 = vst [vmem:[#allocation11 + $0x20] sm:$0xff] %v4959_v27  ;;  %v4662_v43 = vpop.f32.mrb[43].mxu0 }
 0x49a   :  { %v6152_v40 = vpop.eup %6151  ;;  %v4960_v37 = vmul.f32 %v6150_v61, %v4906_v48  ;;  %6165 = vpow2.f32 %v4797_v19  ;;  %v4769_v5 = vsub.f32 %v3031_v38, %v4751_v34  ;;  %v4823_v50 = vsub.f32 %v4658_v31, %v4751_v34 }
 0x49b   :  { %v4891_v42 = vmul.f32 %v6152_v40, %v4729_v32  ;;  %v4927_v44 = vadd.f32 %v6152_v40, %v6148_v26  ;;  %6167 = vpow2.f32 %v4851_v57  ;;  %v6154_v49 = vpop.eup %6153  ;;  %v4752_v51 = vmax.f32 %v3035_v30, %v4662_v43  ;;  %v6732_v41 = vpop.f32.mrb[48].mxu1 }
 0x49c   :  { %4978 = vst [vmem:[#allocation11 + $0x28] sm:$0xff] %v4960_v37  ;;  %v6156_v53 = vpop.eup %6155  ;;  %v4874_v4 = vmul.f32 %v6154_v49, %v3110_v39  ;;  %v4799_v54 = vmul.f32 1.442695, %v4769_v5  ;;  %v3041_v58 = vpop.f32.mrb[49].mxu1  ;;  %v4853_v56 = vmul.f32 1.442695, %v4823_v50 }
 0x49d   :  { %v6734_v48 = vadd.f32 %v4891_v42, %v4873_v33  ;;  %6169 = vrcp.f32 %v4927_v44  ;;  %v4892_v59 = vmul.f32 %v6156_v53, %v4730_v6  ;;  %v4928_v60 = vadd.f32 %v6156_v53, %v6154_v49  ;;  %v6736_v47 = vpop.f32.mrb[50].mxu1  ;;  %v6738_v0 = vpop.f32.mrb[44].mxu0 }
 0x49e   :  { %v4770_v63 = vsub.f32 %v3035_v30, %v4752_v51  ;;  %v6158_v14 = vpop.eup %6157  ;;  %6171 = vpow2.f32 %v4799_v54  ;;  %v4824_v2 = vsub.f32 %v4662_v43, %v4752_v51  ;;  %v3045_v7 = vpop.f32.mrb[51].mxu1  ;;  %v3113_v51 = vadd.f32 %v6652_v52, %v6714_v12 }
 0x49f   :  { %v4668_v8 = vpop.f32.mrb[45].mxu0  ;;  %v4961_v45 = vmul.f32 %v6158_v14, %v4907_v13  ;;  %v6744_v3 = vadd.f32 %v4892_v59, %v4874_v4  ;;  %6173 = vrcp.f32 %v4928_v60  ;;  %v4732_v13 = vadd.f32 %v6652_v52, %v6706_v55 }
 0x4a0   :  { %v4801_v9 = vmul.f32 1.442695, %v4770_v63  ;;  %v6746_v28 = vpop.f32.mrb[46].mxu0  ;;  %6175 = vpow2.f32 %v4853_v56  ;;  %v4855_v62 = vmul.f32 1.442695, %v4824_v2  ;;  %v4753_v29 = vmax.f32 %v3041_v58, %v4668_v8 }
 0x4a1   :  { %v6160_v10 = vpop.eup %6159  ;;  %v4672_v15 = vpop.f32.mrb[47].mxu0  ;;  %4979 = vst [vmem:[#allocation11 + $0x30] sm:$0xff] %v4961_v45  ;;  %v3114_v54 = vadd.f32 %v6652_v52, %v6720_v24  ;;  %v4734_v63 = vadd.f32 %v6652_v52, %v6726_v35 }
 0x4a2   :  { %v6162_v36 = vpop.eup %6161  ;;  %v4962_v16 = vmul.f32 %v6160_v10, %v6716_v22  ;;  %6177 = vpow2.f32 %v4801_v9  ;;  %v4754_v38 = vmax.f32 %v3045_v7, %v4672_v15  ;;  %v4771_v19 = vsub.f32 %v3041_v58, %v4753_v29 }
 0x4a3   :  { %v6164_v17 = vpop.eup %6163  ;;  %v4875_v18 = vmul.f32 %v6162_v36, %v3111_v1  ;;  %6179 = vpow2.f32 %v4855_v62  ;;  %v4825_v20 = vsub.f32 %v4668_v8, %v4753_v29  ;;  %v6753_v30 = vpop.f32.mrb[52].mxu1  ;;  %v4733_v58 = vadd.f32 %v6652_v52, %v6722_v25 }
 0x4a4   :  { %v6166_v23 = vpop.eup %6165  ;;  %4980 = vst [vmem:[#allocation11 + $0x38] sm:$0xff] %v4962_v16  ;;  %v4893_v46 = vmul.f32 %v6164_v17, %v4731_v11  ;;  %v4929_v57 = vadd.f32 %v6164_v17, %v6162_v36  ;;  %v4772_v26 = vsub.f32 %v3045_v7, %v4754_v38  ;;  %v4826_v27 = vsub.f32 %v4672_v15, %v4754_v38  ;;  %v3051_v55 = vpop.f32.mrb[53].mxu1 }
 0x4a5   :  { %v6168_v31 = vpop.eup %6167  ;;  %v4876_v22 = vmul.f32 %v6166_v23, %v3112_v21  ;;  %v4803_v61 = vmul.f32 1.442695, %v4771_v19  ;;  %v4857_v32 = vmul.f32 1.442695, %v4825_v20  ;;  %v6755_v37 = vpop.f32.mrb[54].mxu1  ;;  %v3115_v38 = vadd.f32 %v6652_v52, %v6732_v41 }
 0x4a6   :  { %v4911_v33 = vadd.f32 %v4893_v46, %v4875_v18  ;;  %6181 = vrcp.f32 %v4929_v57  ;;  %v4894_v34 = vmul.f32 %v6168_v31, %v4732_v13  ;;  %v4930_v40 = vadd.f32 %v6168_v31, %v6166_v23  ;;  %v6757_v39 = vpop.f32.mrb[48].mxu0  ;;  %v3055_v5 = vpop.f32.mrb[55].mxu1 }
 0x4a7   :  { %v6170_v43 = vpop.eup %6169  ;;  %6183 = vpow2.f32 %v4803_v61  ;;  %v4805_v42 = vmul.f32 1.442695, %v4772_v26  ;;  %v4859_v44 = vmul.f32 1.442695, %v4826_v27  ;;  %v4678_v49 = vpop.f32.mrb[49].mxu0  ;;  %v4735_v20 = vadd.f32 %v6652_v52, %v6738_v0 }
 0x4a8   :  { %v4963_v6 = vmul.f32 %v6170_v43, %v6734_v48  ;;  %v4912_v50 = vadd.f32 %v4894_v34, %v4876_v22  ;;  %6185 = vrcp.f32 %v4930_v40  ;;  %v6762_v53 = vpop.f32.mrb[50].mxu0  ;;  %v6172_v4 = vpop.eup %6171  ;;  %v4755_v59 = vmax.f32 %v3051_v55, %v4678_v49 }
 0x4a9   :  { %6187 = vpow2.f32 %v4857_v32  ;;  %v4682_v60 = vpop.f32.mrb[51].mxu0  ;;  %v6174_v56 = vpop.eup %6173  ;;  %v4877_v48 = vmul.f32 %v6172_v4, %v3113_v51  ;;  %v3116_v26 = vadd.f32 %v6652_v52, %v6736_v47  ;;  %v4736_v41 = vadd.f32 %v6652_v52, %v6746_v28 }
 0x4aa   :  { %4981 = vst [vmem:[#allocation11 + $0x40] sm:$0xff] %v4963_v6  ;;  %6189 = vpow2.f32 %v4805_v42  ;;  %v4756_v12 = vmax.f32 %v3055_v5, %v4682_v60  ;;  %v6176_v14 = vpop.eup %6175  ;;  %v4964_v1 = vmul.f32 %v6174_v56, %v6744_v3  ;;  %v4773_v21 = vsub.f32 %v3051_v55, %v4755_v59 }
 0x4ab   :  { %6191 = vpow2.f32 %v4859_v44  ;;  %v4827_v24 = vsub.f32 %v4678_v49, %v4755_v59  ;;  %v4895_v7 = vmul.f32 %v6176_v14, %v4733_v58  ;;  %v4931_v25 = vadd.f32 %v6176_v14, %v6172_v4 }
 0x4ac   :  { %v6178_v2 = vpop.eup %6177  ;;  %v4774_v8 = vsub.f32 %v3055_v5, %v4756_v12  ;;  %v4828_v45 = vsub.f32 %v4682_v60, %v4756_v12  ;;  %4982 = vst [vmem:[#allocation11 + $0x48] sm:$0xff] %v4964_v1  ;;  %v4807_v11 = vmul.f32 1.442695, %v4773_v21  ;;  %v3117_v47 = vadd.f32 %v6652_v52, %v6753_v30 }
 0x4ad   :  { %v6180_v9 = vpop.eup %6179  ;;  %v4878_v10 = vmul.f32 %v6178_v2, %v3114_v54  ;;  %v4861_v62 = vmul.f32 1.442695, %v4827_v24  ;;  %v4913_v29 = vadd.f32 %v4895_v7, %v4877_v48  ;;  %6193 = vrcp.f32 %v4931_v25 }
 0x4ae   :  { %v4896_v35 = vmul.f32 %v6180_v9, %v4734_v63  ;;  %v4932_v15 = vadd.f32 %v6180_v9, %v6178_v2  ;;  %6195 = vpow2.f32 %v4807_v11  ;;  %v4809_v36 = vmul.f32 1.442695, %v4774_v8 }
 0x4af   :  { %v4863_v3 = vmul.f32 1.442695, %v4828_v45  ;;  %v4737_v5 = vadd.f32 %v6652_v52, %v6757_v39  ;;  %v4738_v58 = vadd.f32 %v6652_v52, %v6762_v53 }
 0x4b0   :  { %v6182_v16 = vpop.eup %6181  ;;  %v4914_v13 = vadd.f32 %v4896_v35, %v4878_v10  ;;  %6197 = vrcp.f32 %v4932_v15 }
 0x4b1   :  { %v6184_v17 = vpop.eup %6183  ;;  %v4965_v18 = vmul.f32 %v6182_v16, %v4911_v33  ;;  %6199 = vpow2.f32 %v4861_v62 }
 0x4b2   :  { %v6186_v19 = vpop.eup %6185  ;;  %v4879_v23 = vmul.f32 %v6184_v17, %v3115_v38  ;;  %6201 = vpow2.f32 %v4809_v36 }
 0x4b3   :  { %v6188_v46 = vpop.eup %6187  ;;  %4983 = vst [vmem:[#allocation11 + $0x50] sm:$0xff] %v4965_v18  ;;  %v4966_v57 = vmul.f32 %v6186_v19, %v4912_v50  ;;  %6203 = vpow2.f32 %v4863_v3  ;;  %v3118_v50 = vadd.f32 %v6652_v52, %v6755_v37 }
 0x4b4   :  { %v6190_v27 = vpop.eup %6189  ;;  %v4897_v31 = vmul.f32 %v6188_v46, %v4735_v20  ;;  %v4933_v22 = vadd.f32 %v6188_v46, %v6184_v17 }
 0x4b5   :  { %v6192_v61 = vpop.eup %6191  ;;  %4984 = vst [vmem:[#allocation11 + $0x58] sm:$0xff] %v4966_v57  ;;  %v4880_v32 = vmul.f32 %v6190_v27, %v3116_v26 }
 0x4b6   :  { %v4915_v55 = vadd.f32 %v4897_v31, %v4879_v23  ;;  %6205 = vrcp.f32 %v4933_v22  ;;  %v4898_v0 = vmul.f32 %v6192_v61, %v4736_v41  ;;  %v4934_v33 = vadd.f32 %v6192_v61, %v6190_v27 }
 0x4b7   :  { %v6194_v34 = vpop.eup %6193 }
 0x4b8   :  { %v4916_v40 = vadd.f32 %v4898_v0, %v4880_v32  ;;  %6207 = vrcp.f32 %v4934_v33  ;;  %v6196_v43 = vpop.eup %6195  ;;  %v4967_v42 = vmul.f32 %v6194_v34, %v4913_v29 }
 0x4b9   :  { %v4881_v28 = vmul.f32 %v6196_v43, %v3117_v47 }
 0x4ba   :  { %v6198_v44 = vpop.eup %6197  ;;  %4985 = vst [vmem:[#allocation11 + $0x60] sm:$0xff] %v4967_v42 }
 0x4bb   :  { %v6200_v49 = vpop.eup %6199  ;;  %v4968_v6 = vmul.f32 %v6198_v44, %v4914_v13 }
 0x4bc   :  { %v6202_v51 = vpop.eup %6201  ;;  %v4899_v4 = vmul.f32 %v6200_v49, %v4737_v5  ;;  %v4935_v54 = vadd.f32 %v6200_v49, %v6196_v43 }
 0x4bd   :  { %v6204_v30 = vpop.eup %6203  ;;  %4986 = vst [vmem:[#allocation11 + $0x68] sm:$0xff] %v4968_v6  ;;  %v4882_v59 = vmul.f32 %v6202_v51, %v3118_v50 }
 0x4be   :  { %v4917_v60 = vadd.f32 %v4899_v4, %v4881_v28  ;;  %6209 = vrcp.f32 %v4935_v54  ;;  %v4900_v56 = vmul.f32 %v6204_v30, %v4738_v58  ;;  %v4936_v39 = vadd.f32 %v6204_v30, %v6202_v51 }
 0x4c0   :  { %v6206_v48 = vpop.eup %6205  ;;  %v4918_v63 = vadd.f32 %v4900_v56, %v4882_v59  ;;  %6211 = vrcp.f32 %v4936_v39 }
 0x4c1   :  { %v4969_v12 = vmul.f32 %v6206_v48, %v4915_v55 }
 0x4c2   :  { %v6208_v14 = vpop.eup %6207 }
 0x4c3   :  { %4987 = vst [vmem:[#allocation11 + $0x70] sm:$0xff] %v4969_v12  ;;  %v4970_v37 = vmul.f32 %v6208_v14, %v4916_v40 }
 0x4c5   :  { %4988 = vst [vmem:[#allocation11 + $0x78] sm:$0xff] %v4970_v37 }
 0x4c8   :  { %v6210_v1 = vpop.eup %6209 }
 0x4c9   :  { %v4971_v21 = vmul.f32 %v6210_v1, %v4917_v60 }
 0x4ca   :  { %v6212_v52 = vpop.eup %6211 }
 0x4cb   :  { %4989 = vst [vmem:[#allocation11 + $0x80] sm:$0xff] %v4971_v21  ;;  %v4972_v53 = vmul.f32 %v6212_v52, %v4918_v63 }
 0x4cd   :  { %4990 = vst [vmem:[#allocation11 + $0x88] sm:$0xff] %v4972_v53 }
 0x4ce   :  { %6312 = shalt.err (!%p6309_p8)
}
 0x4cf   :  { %s6313_s28 = scalar_lea.hbm %s6808_s6, 2304 }
 0x4d0   :  { %p6314_p9 = scmp.ne.s32.totalorder %s6808_s6, %s6313_s28  ;;  %p6317_p10 = scmp.lt.u32.totalorder %s6313_s28, %s6808_s6 }
 0x4d2   :  { %p6319_p11 = pnand %p6317_p10, %p6314_p9 }
 0x4d4   :  { %6322 = shalt.err (!%p6319_p11)
}
 0x4d5   :  { %5002 = dma.vmem_to_hbm [thread:$0]  %s4997_s23, 2304, %s6808_s6, [#allocation5], %s6336_s0, %s6336_s0, %s6337_s24  }
 0x4d6   :  { %6329 = dma.done.wait [#allocation5], 2304  }
 0x4d7   :  { %6330 = vsyncadd [#allocation5], 4294964992 }
 0x4d8   :  { %5006 = vsyncpa [#allocation4], 1 }
 0x4d9   :  { %5007 = vsyncpa [#allocation7], 1 }
 0x4da   :  { %5008 = vsyncpa [#allocation10], 1 }
 0x4db   :  { %5009 = vsyncpa [#allocation5], 1 }

</bundles_post_ra>
